<compile_context>
chip_gen: v6e
topology: v6e:2x2x1
jax: 0.10.0
libtpu: 0.0.40
codegen_flags: <defaults>
</compile_context>

<pallas_src>
import math

import numpy as np
import jax
import jax.numpy as jnp
from jax import lax
from jax.experimental import pallas as pl
from jax.experimental.pallas import tpu as pltpu

OUT_LANES = 128                        # lane-dense fused output width
XFORM_CLIP = math.log(1000.0 / 16.0)   # torchvision BoxCoder bbox_xform_clip


# --------------------- fused RPN head + decode + clip kernel ----------------
def _make_rpn_fused_kernel(*, th, W, C, stride_h, stride_w):
    tm = th * W                        # output rows (spatial positions) per tile

    def kernel(x_ref, wc_ref, bc_ref, wh_ref, bh_ref, cv_ref, out_ref):
        # x_ref : (H+2, W+2, C) padded NHWC image (whole image resident in VMEM)
        # wc_ref: (9, C, C) conv taps (tap = ky*3+kx, layout [C_in, C_out])
        # wh_ref: (C, 256) fused head: [:,0:128] "linear" slab, [:,128:256] "exp" slab
        # cv_ref: (8, 128) per-lane decode constants
        # out   : (tm, 128) = [obj(A) | per-anchor (x1,y1,x2,y2) (4A) | 0-pad]
        t = pl.program_id(1)
        h0 = t * th                                    # first output H-row of tile

        # ---- 3x3 conv (padding=1) as 9 shifted (tm, C) @ (C, C) MXU matmuls ----
        # TODO(synk): for small C (< 64) a single (tm, 9C) @ (9C, C) im2col matmul
        # would fill the MXU contraction dim better; 9-tap form kept (right shape
        # for production C >= 256).
        acc = jnp.zeros((tm, C), jnp.float32)
        for ky in range(3):
            for kx in range(3):
                xwin = x_ref[pl.ds(h0 + ky, th), pl.ds(kx, W), :]      # (th, W, C)
                acc = acc + jnp.dot(xwin.reshape(tm, C), wc_ref[ky * 3 + kx],
                                    preferred_element_type=jnp.float32)
        hidden = jnp.maximum(acc + bc_ref[...], 0.0)                   # ReLU, f32

        # ---- fused cls + bbox head: one lane-dense (tm, 256) matmul ----
        raw = (jnp.dot(hidden.astype(wh_ref.dtype), wh_ref[...],
                       preferred_element_type=jnp.float32) + bh_ref[...])
        dl = raw[:, :OUT_LANES]        # [cls | tx/ty per box lane | 0]
        de = raw[:, OUT_LANES:]        # [ 0  | tw/th per box lane | 0]

        # ---- lane-parallel box_coder.decode + clip_boxes_to_image ----
        # const rows: 0 inv-lin-w, 1 inv-exp-w, 2 ctr_x sel, 3 ctr_y sel,
        #             4 anchor size, 5 half size, 6 sign(-1 x1/y1,+1 x2/y2), 7 clamp-hi
        cv = cv_ref[...]
        ri = lax.broadcasted_iota(jnp.int32, (th, W, OUT_LANES), 0).reshape(
            tm, OUT_LANES)
        ci = lax.broadcasted_iota(jnp.int32, (th, W, OUT_LANES), 1).reshape(
            tm, OUT_LANES)
        ctr = ((ci.astype(jnp.float32) * stride_w) * cv[2:3]
               + ((h0 + ri).astype(jnp.float32) * stride_h) * cv[3:4])
        tl = dl * cv[0:1]                                   # dx/wx, dy/wy
        te = jnp.minimum(de * cv[1:2], XFORM_CLIP)          # clip(dw/ww), clip(dh/wh)
        pc = tl * cv[4:5] + ctr                             # size*delta + anchor ctr
        half = jnp.exp(te) * cv[5:6]                        # 0.5 * exp(d) * size
        box = jnp.clip(pc + cv[6:7] * half, 0.0, cv[7:8])   # -/+ half, clamp to image
        # box lanes -> decoded boxes; cls lanes -> raw logits; pad lanes -> 0
        out_ref[...] = jnp.where(cv[7:8] > 0.0, box, dl)    # ONE dense store

    return kernel


def _build_decode_consts(A, sizes, box_weights, img_h, img_w):
    """(8, 128) per-lane constants for the lane-parallel decode epilogue."""
    wx, wy, ww, wh = (float(v) for v in box_weights)
    sizes = np.asarray(sizes, np.float32)
    lanes = np.arange(OUT_LANES)
    box = (lanes >= A) & (lanes < 5 * A)
    k = np.where(box, (lanes - A) % 4, 0)       # 0:x1 1:y1 2:x2 3:y2
    a = np.where(box, (lanes - A) // 4, 0)      # anchor index
    isx = box & (k % 2 == 0)
    isy = box & (k % 2 == 1)
    cv = np.zeros((8, OUT_LANES), np.float32)
    cv[0] = np.where(isx, 1.0 / wx, np.where(isy, 1.0 / wy,
                                             np.where(lanes < A, 1.0, 0.0)))
    cv[1] = np.where(isx, 1.0 / ww, np.where(isy, 1.0 / wh, 0.0))
    cv[2] = isx.astype(np.float32)
    cv[3] = isy.astype(np.float32)
    sz = np.where(box, sizes[a], 0.0)
    cv[4] = sz
    cv[5] = 0.5 * sz
    cv[6] = np.where(box, np.where(k < 2, -1.0, 1.0), 0.0)
    cv[7] = np.where(isx, img_w, np.where(isy, img_h, 0.0))
    return jnp.asarray(cv)


def _pick_th(H, W, target_rows=1024):
    """Largest H-row tile whose (th*W, 128) output block is legal and <= target."""
    if H * W <= target_rows:
        return H
    cand = [th for th in range(1, H + 1)
            if H % th == 0 and (th * W) % 8 == 0 and th * W <= target_rows]
    return max(cand) if cand else H


def _vmem_capacity_bytes(default=64 * 2 ** 20):
    try:
        return int(pltpu.get_tpu_info().vmem_capacity_bytes)
    except Exception:
        return default


def rpn_head_decode(x, packed_params, image_shape, anchor_sizes, box_weights,
                    *, compute_dtype=jnp.bfloat16):
    """Fused RPN head + box decode + clip.

    Returns objectness logits (N, H*W*A) and clipped proposals (N, H*W*A, 4),
    both in concat_box_prediction_layers' (n, h, w, a) ordering.
    """
    w_conv_taps, b_conv, w_head, b_head = packed_params
    N, C, H, W = x.shape
    A = len(anchor_sizes)
    assert 5 * A <= OUT_LANES
    img_h, img_w = (float(s) for s in image_shape)
    stride_h, stride_w = img_h / H, img_w / W

    th = _pick_th(H, W)
    T = H // th
    tm = th * W
    Hp, Wp, HW = H + 2, W + 2, H * W

    # NHWC + 1-pixel zero halo; matmul operands in compute_dtype (f32 accumulate).
    # TODO(synk): producing NHWC (+ halo) upstream would remove these two
    # wrapper-side HBM passes over the feature map.
    x_pad = jnp.pad(jnp.transpose(x, (0, 2, 3, 1)),
                    ((0, 0), (1, 1), (1, 1), (0, 0))).astype(compute_dtype)
    w_conv_taps = w_conv_taps.astype(compute_dtype)
    w_head = w_head.astype(compute_dtype)
    cvec = _build_decode_consts(A, anchor_sizes, box_weights, img_h, img_w)

    kernel = _make_rpn_fused_kernel(th=th, W=W, C=C,
                                    stride_h=stride_h, stride_w=stride_w)

    # Generation-aware VMEM budget (v7x 64 MiB vs v5e/v6e 128 MiB).
    # TODO(synk): feature maps too large for whole-image VMEM residency on v7x
    # should switch to memory_space=pl.ANY + manually double-buffered (th+2)-row
    # halo DMA windows.
    isz = jnp.dtype(compute_dtype).itemsize
    fixed = 2 * (Hp * Wp * C + 9 * C * C + C * 2 * OUT_LANES) * isz
    per_tile = 2 * tm * OUT_LANES * 4 + 8 * tm * max(C, 2 * OUT_LANES) * 4
    cap = _vmem_capacity_bytes()
    vmem_limit = int(min(max(2 * (fixed + per_tile), 32 * 2 ** 20),
                         int(0.85 * cap)))

    out = pl.pallas_call(
        kernel,
        out_shape=jax.ShapeDtypeStruct((N, HW, OUT_LANES), jnp.float32),
        grid_spec=pltpu.PrefetchScalarGridSpec(
            num_scalar_prefetch=0,
            grid=(N, T),
            in_specs=[
                # whole padded image per n; re-used (no re-DMA) across the T axis
                pl.BlockSpec((None, Hp, Wp, C), lambda n, t: (n, 0, 0, 0)),
                pl.BlockSpec((9, C, C), lambda n, t: (0, 0, 0)),
                pl.BlockSpec((1, C), lambda n, t: (0, 0)),
                pl.BlockSpec((C, 2 * OUT_LANES), lambda n, t: (0, 0)),
                pl.BlockSpec((1, 2 * OUT_LANES), lambda n, t: (0, 0)),
                pl.BlockSpec((8, OUT_LANES), lambda n, t: (0, 0)),
            ],
            out_specs=pl.BlockSpec((None, tm, OUT_LANES), lambda n, t: (n, t, 0)),
        ),
        compiler_params=pltpu.CompilerParams(
            dimension_semantics=("parallel", "parallel"),
            vmem_limit_bytes=vmem_limit),
    )(x_pad, w_conv_taps, b_conv, w_head, b_head, cvec)

    # already in (n, h, w, a[, 4]) order -> no transpose needed
    obj = out[:, :, 0:A].reshape(N, HW * A)
    proposals = out[:, :, A:5 * A].reshape(N, HW * A, 4)
    return obj, proposals


# ------------------------------ params & glue --------------------------------
def init_rpn_params(key, in_channels, num_anchors):
    """Torch-layout RPNHead params (normal std=0.01 weights, zero biases)."""
    kc, kcls, kbox = jax.random.split(key, 3)
    C, A = in_channels, num_anchors
    w_conv = 0.01 * jax.random.normal(kc, (C, C, 3, 3), jnp.float32)   # (O,I,kh,kw)
    b_conv = jnp.zeros((C,), jnp.float32)
    w_cls = 0.01 * jax.random.normal(kcls, (A, C), jnp.float32)
    b_cls = jnp.zeros((A,), jnp.float32)
    w_box = 0.01 * jax.random.normal(kbox, (4 * A, C), jnp.float32)    # row a*4+k
    b_box = jnp.zeros((4 * A,), jnp.float32)
    return (w_conv, b_conv, w_cls, b_cls, w_box, b_box)


def pack_rpn_params(raw_params):
    """Torch layouts -> fused-kernel layouts (tap-major conv, wide lane-padded head).

    Head column l of the "linear" slab:  l<A -> cls ; l=A+4a+k -> tx(a) (k in {0,2})
    or ty(a) (k in {1,3}).  Same columns of the "exp" slab carry tw(a)/th(a).
    """
    w_conv, b_conv, w_cls, b_cls, w_box, b_box = raw_params
    C, A = w_conv.shape[0], w_cls.shape[0]
    # (O, I, ky, kx) -> (tap = ky*3+kx, I, O)
    w_conv_taps = jnp.transpose(w_conv, (2, 3, 1, 0)).reshape(9, C, C)
    wb = w_box.reshape(A, 4, C)
    bb = b_box.reshape(A, 4)
    lin_w = wb[:, [0, 1, 0, 1], :].reshape(4 * A, C)
    lin_b = bb[:, [0, 1, 0, 1]].reshape(4 * A)
    exp_w = wb[:, [2, 3, 2, 3], :].reshape(4 * A, C)
    exp_b = bb[:, [2, 3, 2, 3]].reshape(4 * A)
    pad = OUT_LANES - 5 * A
    L = jnp.pad(jnp.concatenate([w_cls, lin_w], axis=0), ((0, pad), (0, 0)))
    Lb = jnp.pad(jnp.concatenate([b_cls, lin_b], axis=0), (0, pad))
    E = jnp.pad(jnp.concatenate([jnp.zeros((A, C), w_box.dtype), exp_w], axis=0),
                ((0, pad), (0, 0)))
    Eb = jnp.pad(jnp.concatenate([jnp.zeros((A,), b_box.dtype), exp_b], axis=0),
                 (0, pad))
    w_head = jnp.concatenate([L, E], axis=0).T                     # (C, 256)
    b_head = jnp.concatenate([Lb, Eb]).reshape(1, 2 * OUT_LANES)
    return (w_conv_taps, b_conv.reshape(1, C), w_head, b_head)


def generate_anchors(feat_h, feat_w, stride_h, stride_w, sizes):
    """AnchorsGenerator equivalent: ratio-1.0 anchors, (h, w, a) ordering."""
    base = jnp.asarray([[-s / 2.0, -s / 2.0, s / 2.0, s / 2.0] for s in sizes],
                       jnp.float32)
    ys = jnp.arange(feat_h, dtype=jnp.float32) * stride_h
    xs = jnp.arange(feat_w, dtype=jnp.float32) * stride_w
    sy, sx = jnp.meshgrid(ys, xs, indexing="ij")
    shifts = jnp.stack([sx.ravel(), sy.ravel(), sx.ravel(), sy.ravel()], axis=1)
    return (shifts[:, None, :] + base[None, :, :]).reshape(-1, 4)


def rpn_reference(x, raw_params, image_shape, anchor_sizes, box_weights):
    """Pure-JAX reference of head + concat ordering + decode + clip (f32)."""
    w_conv, b_conv, w_cls, b_cls, w_box, b_box = raw_params
    N, C, H, W = x.shape
    A = w_cls.shape[0]
    h = lax.conv_general_dilated(x, w_conv, (1, 1), ((1, 1), (1, 1)),
                                 dimension_numbers=("NCHW", "OIHW", "NCHW"))
    h = jnp.maximum(h + b_conv[None, :, None, None], 0.0)
    obj = jnp.einsum("nchw,ac->nahw", h, w_cls) + b_cls[None, :, None, None]
    reg = jnp.einsum("nchw,dc->ndhw", h, w_box) + b_box[None, :, None, None]
    obj_flat = jnp.transpose(obj, (0, 2, 3, 1)).reshape(N, H * W * A)
    reg_flat = jnp.transpose(reg.reshape(N, A, 4, H, W),
                             (0, 3, 4, 1, 2)).reshape(N, H * W * A, 4)
    img_h, img_w = (float(s) for s in image_shape)
    anchors = generate_anchors(H, W, img_h / H, img_w / W, anchor_sizes)
    wx, wy, ww, wh = box_weights
    widths = anchors[:, 2] - anchors[:, 0]
    heights = anchors[:, 3] - anchors[:, 1]
    ctr_x = anchors[:, 0] + 0.5 * widths
    ctr_y = anchors[:, 1] + 0.5 * heights
    dx, dy = reg_flat[..., 0] / wx, reg_flat[..., 1] / wy
    dw = jnp.minimum(reg_flat[..., 2] / ww, XFORM_CLIP)
    dh = jnp.minimum(reg_flat[..., 3] / wh, XFORM_CLIP)
    pcx, pcy = dx * widths + ctr_x, dy * heights + ctr_y
    pw, ph = jnp.exp(dw) * widths, jnp.exp(dh) * heights
    x1 = jnp.clip(pcx - 0.5 * pw, 0.0, img_w)
    y1 = jnp.clip(pcy - 0.5 * ph, 0.0, img_h)
    x2 = jnp.clip(pcx + 0.5 * pw, 0.0, img_w)
    y2 = jnp.clip(pcy + 0.5 * ph, 0.0, img_h)
    return obj_flat, jnp.stack([x1, y1, x2, y2], axis=-1)


def rpn_forward(x, packed_params, image_shape, anchor_sizes, box_weights,
                pre_nms_top_n=100, *, compute_dtype=jnp.bfloat16):
    """Inference forward of RegionProposoalNetwork (training=False path)."""
    N = x.shape[0]
    obj, proposals = rpn_head_decode(x, packed_params, image_shape, anchor_sizes,
                                     box_weights, compute_dtype=compute_dtype)
    # filter_proposals (single feature level): per-image top-k + sigmoid
    k = min(pre_nms_top_n, obj.shape[1])
    top_scores, top_idx = lax.top_k(obj, k)
    batch_idx = jnp.arange(N)[:, None]
    boxes = proposals[batch_idx, top_idx]
    scores = jax.nn.sigmoid(top_scores)
    # TODO(synk): remove_small_boxes + torchvision NMS (data-dependent shapes) and
    # the training-only matcher/sampler/loss path have no clean static-shape
    # Pallas equivalent; returning per-image pre-NMS top-k boxes/scores.
    return boxes, scores


if __name__ == "__main__":
    key = jax.random.PRNGKey(0)
    k_x, k_p = jax.random.split(key)

    # small shapes: batch=2, channels=16, feature 16x16, image 128x128, A=3
    N, C, H, W = 2, 16, 16, 16
    image_shape = (128.0, 128.0)
    anchor_sizes = (32.0, 64.0, 128.0)
    box_weights = (1.0, 1.0, 1.0, 1.0)
    A = len(anchor_sizes)

    x = jax.random.normal(k_x, (N, C, H, W), jnp.float32)
    raw_params = init_rpn_params(k_p, C, A)
    packed = pack_rpn_params(raw_params)

    # correctness spot-check of the fused kernel (f32 matmuls) vs pure-JAX ref
    obj_k, props_k = rpn_head_decode(x, packed, image_shape, anchor_sizes,
                                     box_weights, compute_dtype=jnp.float32)
    obj_r, props_r = rpn_reference(x, raw_params, image_shape, anchor_sizes,
                                   box_weights)
    assert float(jnp.max(jnp.abs(obj_k - obj_r))) < 1e-2
    assert float(jnp.max(jnp.abs(props_k - props_r))) < 5e-1

    # production path: bf16 MXU matmuls, f32 accumulation/epilogue
    boxes, scores = rpn_forward(x, packed, image_shape, anchor_sizes,
                                box_weights, pre_nms_top_n=100)
    jax.block_until_ready((boxes, scores))

    assert boxes.shape == (N, 100, 4) and scores.shape == (N, 100)
    assert bool(jnp.all(jnp.isfinite(boxes))) and bool(jnp.all(jnp.isfinite(scores)))
    print("KERNEL_OK")
</pallas_src>

<mosaic_0001>
module attributes {stable_mosaic.version = 11 : i64} {
  func.func @kernel(%arg0: i32, %arg1: i32, %arg2: memref<1x18x18x16xf32, #tpu.memory_space<vmem>>, %arg3: memref<9x16x16xf32, #tpu.memory_space<vmem>>, %arg4: memref<1x16xf32, #tpu.memory_space<vmem>>, %arg5: memref<16x256xf32, #tpu.memory_space<vmem>>, %arg6: memref<1x256xf32, #tpu.memory_space<vmem>>, %arg7: memref<8x128xf32, #tpu.memory_space<vmem>>, %arg8: memref<1x256x128xf32, #tpu.memory_space<vmem>>) attributes {dimension_semantics = [#tpu.dimension_semantics<parallel>, #tpu.dimension_semantics<parallel>], iteration_bounds = array<i64: 2, 1>, scalar_prefetch = 0 : i64, scratch_operands = 0 : i64, tpu.core_type = #tpu.core_type<tc>, window_params = [{transform_indices = @transform_0, window_bounds = array<i64: 1, 18, 18, 16>}, {pipeline_mode = #tpu.pipeline_mode<synchronous>, transform_indices = @transform_1, window_bounds = array<i64: 9, 16, 16>}, {pipeline_mode = #tpu.pipeline_mode<synchronous>, transform_indices = @transform_2, window_bounds = array<i64: 1, 16>}, {pipeline_mode = #tpu.pipeline_mode<synchronous>, transform_indices = @transform_3, window_bounds = array<i64: 16, 256>}, {pipeline_mode = #tpu.pipeline_mode<synchronous>, transform_indices = @transform_4, window_bounds = array<i64: 1, 256>}, {pipeline_mode = #tpu.pipeline_mode<synchronous>, transform_indices = @transform_5, window_bounds = array<i64: 8, 128>}, {transform_indices = @transform_6, window_bounds = array<i64: 1, 256, 128>}]} {
    %c16_i32 = arith.constant 16 : i32
    %0 = arith.muli %arg1, %c16_i32 : i32
    %cst = arith.constant 0.000000e+00 : f32
    %1 = vector.broadcast %cst : f32 to vector<256x16xf32>
    %c0_i32 = arith.constant 0 : i32
    %2 = arith.addi %0, %c0_i32 : i32
    %c0 = arith.constant 0 : index
    %3 = arith.index_cast %2 : i32 to index
    %c0_0 = arith.constant 0 : index
    %c0_1 = arith.constant 0 : index
    %4 = vector.load %arg2[%c0, %3, %c0_0, %c0_1] : memref<1x18x18x16xf32, #tpu.memory_space<vmem>>, vector<1x16x16x16xf32>
    %5 = vector.shape_cast %4 : vector<1x16x16x16xf32> to vector<16x16x16xf32>
    %6 = vector.shape_cast %5 : vector<16x16x16xf32> to vector<256x16xf32>
    %c0_2 = arith.constant 0 : index
    %c0_3 = arith.constant 0 : index
    %c0_4 = arith.constant 0 : index
    %7 = vector.load %arg3[%c0_2, %c0_3, %c0_4] : memref<9x16x16xf32, #tpu.memory_space<vmem>>, vector<1x16x16xf32>
    %8 = vector.shape_cast %7 : vector<1x16x16xf32> to vector<16x16xf32>
    %cst_5 = arith.constant dense<0.000000e+00> : vector<256x16xf32>
    %9 = tpu.matmul %6, %8, %cst_5 {dimension_numbers = #tpu.dot_dimension_numbers<[1], [0], [0], [1], [0, 0, 1, 1], [], []>} : vector<256x16xf32>, vector<16x16xf32>, vector<256x16xf32> -> vector<256x16xf32>
    %10 = arith.addf %1, %9 : vector<256x16xf32>
    %c0_i32_6 = arith.constant 0 : i32
    %11 = arith.addi %0, %c0_i32_6 : i32
    %c0_7 = arith.constant 0 : index
    %12 = arith.index_cast %11 : i32 to index
    %c1 = arith.constant 1 : index
    %c0_8 = arith.constant 0 : index
    %13 = vector.load %arg2[%c0_7, %12, %c1, %c0_8] : memref<1x18x18x16xf32, #tpu.memory_space<vmem>>, vector<1x16x16x16xf32>
    %14 = vector.shape_cast %13 : vector<1x16x16x16xf32> to vector<16x16x16xf32>
    %15 = vector.shape_cast %14 : vector<16x16x16xf32> to vector<256x16xf32>
    %c1_9 = arith.constant 1 : index
    %c0_10 = arith.constant 0 : index
    %c0_11 = arith.constant 0 : index
    %16 = vector.load %arg3[%c1_9, %c0_10, %c0_11] : memref<9x16x16xf32, #tpu.memory_space<vmem>>, vector<1x16x16xf32>
    %17 = vector.shape_cast %16 : vector<1x16x16xf32> to vector<16x16xf32>
    %cst_12 = arith.constant dense<0.000000e+00> : vector<256x16xf32>
    %18 = tpu.matmul %15, %17, %cst_12 {dimension_numbers = #tpu.dot_dimension_numbers<[1], [0], [0], [1], [0, 0, 1, 1], [], []>} : vector<256x16xf32>, vector<16x16xf32>, vector<256x16xf32> -> vector<256x16xf32>
    %19 = arith.addf %10, %18 : vector<256x16xf32>
    %c0_i32_13 = arith.constant 0 : i32
    %20 = arith.addi %0, %c0_i32_13 : i32
    %c0_14 = arith.constant 0 : index
    %21 = arith.index_cast %20 : i32 to index
    %c2 = arith.constant 2 : index
    %c0_15 = arith.constant 0 : index
    %22 = vector.load %arg2[%c0_14, %21, %c2, %c0_15] : memref<1x18x18x16xf32, #tpu.memory_space<vmem>>, vector<1x16x16x16xf32>
    %23 = vector.shape_cast %22 : vector<1x16x16x16xf32> to vector<16x16x16xf32>
    %24 = vector.shape_cast %23 : vector<16x16x16xf32> to vector<256x16xf32>
    %c2_16 = arith.constant 2 : index
    %c0_17 = arith.constant 0 : index
    %c0_18 = arith.constant 0 : index
    %25 = vector.load %arg3[%c2_16, %c0_17, %c0_18] : memref<9x16x16xf32, #tpu.memory_space<vmem>>, vector<1x16x16xf32>
    %26 = vector.shape_cast %25 : vector<1x16x16xf32> to vector<16x16xf32>
    %cst_19 = arith.constant dense<0.000000e+00> : vector<256x16xf32>
    %27 = tpu.matmul %24, %26, %cst_19 {dimension_numbers = #tpu.dot_dimension_numbers<[1], [0], [0], [1], [0, 0, 1, 1], [], []>} : vector<256x16xf32>, vector<16x16xf32>, vector<256x16xf32> -> vector<256x16xf32>
    %28 = arith.addf %19, %27 : vector<256x16xf32>
    %c1_i32 = arith.constant 1 : i32
    %29 = arith.addi %0, %c1_i32 : i32
    %c0_20 = arith.constant 0 : index
    %30 = arith.index_cast %29 : i32 to index
    %c0_21 = arith.constant 0 : index
    %c0_22 = arith.constant 0 : index
    %31 = vector.load %arg2[%c0_20, %30, %c0_21, %c0_22] : memref<1x18x18x16xf32, #tpu.memory_space<vmem>>, vector<1x16x16x16xf32>
    %32 = vector.shape_cast %31 : vector<1x16x16x16xf32> to vector<16x16x16xf32>
    %33 = vector.shape_cast %32 : vector<16x16x16xf32> to vector<256x16xf32>
    %c3 = arith.constant 3 : index
    %c0_23 = arith.constant 0 : index
    %c0_24 = arith.constant 0 : index
    %34 = vector.load %arg3[%c3, %c0_23, %c0_24] : memref<9x16x16xf32, #tpu.memory_space<vmem>>, vector<1x16x16xf32>
    %35 = vector.shape_cast %34 : vector<1x16x16xf32> to vector<16x16xf32>
    %cst_25 = arith.constant dense<0.000000e+00> : vector<256x16xf32>
    %36 = tpu.matmul %33, %35, %cst_25 {dimension_numbers = #tpu.dot_dimension_numbers<[1], [0], [0], [1], [0, 0, 1, 1], [], []>} : vector<256x16xf32>, vector<16x16xf32>, vector<256x16xf32> -> vector<256x16xf32>
    %37 = arith.addf %28, %36 : vector<256x16xf32>
    %c1_i32_26 = arith.constant 1 : i32
    %38 = arith.addi %0, %c1_i32_26 : i32
    %c0_27 = arith.constant 0 : index
    %39 = arith.index_cast %38 : i32 to index
    %c1_28 = arith.constant 1 : index
    %c0_29 = arith.constant 0 : index
    %40 = vector.load %arg2[%c0_27, %39, %c1_28, %c0_29] : memref<1x18x18x16xf32, #tpu.memory_space<vmem>>, vector<1x16x16x16xf32>
    %41 = vector.shape_cast %40 : vector<1x16x16x16xf32> to vector<16x16x16xf32>
    %42 = vector.shape_cast %41 : vector<16x16x16xf32> to vector<256x16xf32>
    %c4 = arith.constant 4 : index
    %c0_30 = arith.constant 0 : index
    %c0_31 = arith.constant 0 : index
    %43 = vector.load %arg3[%c4, %c0_30, %c0_31] : memref<9x16x16xf32, #tpu.memory_space<vmem>>, vector<1x16x16xf32>
    %44 = vector.shape_cast %43 : vector<1x16x16xf32> to vector<16x16xf32>
    %cst_32 = arith.constant dense<0.000000e+00> : vector<256x16xf32>
    %45 = tpu.matmul %42, %44, %cst_32 {dimension_numbers = #tpu.dot_dimension_numbers<[1], [0], [0], [1], [0, 0, 1, 1], [], []>} : vector<256x16xf32>, vector<16x16xf32>, vector<256x16xf32> -> vector<256x16xf32>
    %46 = arith.addf %37, %45 : vector<256x16xf32>
    %c1_i32_33 = arith.constant 1 : i32
    %47 = arith.addi %0, %c1_i32_33 : i32
    %c0_34 = arith.constant 0 : index
    %48 = arith.index_cast %47 : i32 to index
    %c2_35 = arith.constant 2 : index
    %c0_36 = arith.constant 0 : index
    %49 = vector.load %arg2[%c0_34, %48, %c2_35, %c0_36] : memref<1x18x18x16xf32, #tpu.memory_space<vmem>>, vector<1x16x16x16xf32>
    %50 = vector.shape_cast %49 : vector<1x16x16x16xf32> to vector<16x16x16xf32>
    %51 = vector.shape_cast %50 : vector<16x16x16xf32> to vector<256x16xf32>
    %c5 = arith.constant 5 : index
    %c0_37 = arith.constant 0 : index
    %c0_38 = arith.constant 0 : index
    %52 = vector.load %arg3[%c5, %c0_37, %c0_38] : memref<9x16x16xf32, #tpu.memory_space<vmem>>, vector<1x16x16xf32>
    %53 = vector.shape_cast %52 : vector<1x16x16xf32> to vector<16x16xf32>
    %cst_39 = arith.constant dense<0.000000e+00> : vector<256x16xf32>
    %54 = tpu.matmul %51, %53, %cst_39 {dimension_numbers = #tpu.dot_dimension_numbers<[1], [0], [0], [1], [0, 0, 1, 1], [], []>} : vector<256x16xf32>, vector<16x16xf32>, vector<256x16xf32> -> vector<256x16xf32>
    %55 = arith.addf %46, %54 : vector<256x16xf32>
    %c2_i32 = arith.constant 2 : i32
    %56 = arith.addi %0, %c2_i32 : i32
    %c0_40 = arith.constant 0 : index
    %57 = arith.index_cast %56 : i32 to index
    %c0_41 = arith.constant 0 : index
    %c0_42 = arith.constant 0 : index
    %58 = vector.load %arg2[%c0_40, %57, %c0_41, %c0_42] : memref<1x18x18x16xf32, #tpu.memory_space<vmem>>, vector<1x16x16x16xf32>
    %59 = vector.shape_cast %58 : vector<1x16x16x16xf32> to vector<16x16x16xf32>
    %60 = vector.shape_cast %59 : vector<16x16x16xf32> to vector<256x16xf32>
    %c6 = arith.constant 6 : index
    %c0_43 = arith.constant 0 : index
    %c0_44 = arith.constant 0 : index
    %61 = vector.load %arg3[%c6, %c0_43, %c0_44] : memref<9x16x16xf32, #tpu.memory_space<vmem>>, vector<1x16x16xf32>
    %62 = vector.shape_cast %61 : vector<1x16x16xf32> to vector<16x16xf32>
    %cst_45 = arith.constant dense<0.000000e+00> : vector<256x16xf32>
    %63 = tpu.matmul %60, %62, %cst_45 {dimension_numbers = #tpu.dot_dimension_numbers<[1], [0], [0], [1], [0, 0, 1, 1], [], []>} : vector<256x16xf32>, vector<16x16xf32>, vector<256x16xf32> -> vector<256x16xf32>
    %64 = arith.addf %55, %63 : vector<256x16xf32>
    %c2_i32_46 = arith.constant 2 : i32
    %65 = arith.addi %0, %c2_i32_46 : i32
    %c0_47 = arith.constant 0 : index
    %66 = arith.index_cast %65 : i32 to index
    %c1_48 = arith.constant 1 : index
    %c0_49 = arith.constant 0 : index
    %67 = vector.load %arg2[%c0_47, %66, %c1_48, %c0_49] : memref<1x18x18x16xf32, #tpu.memory_space<vmem>>, vector<1x16x16x16xf32>
    %68 = vector.shape_cast %67 : vector<1x16x16x16xf32> to vector<16x16x16xf32>
    %69 = vector.shape_cast %68 : vector<16x16x16xf32> to vector<256x16xf32>
    %c7 = arith.constant 7 : index
    %c0_50 = arith.constant 0 : index
    %c0_51 = arith.constant 0 : index
    %70 = vector.load %arg3[%c7, %c0_50, %c0_51] : memref<9x16x16xf32, #tpu.memory_space<vmem>>, vector<1x16x16xf32>
    %71 = vector.shape_cast %70 : vector<1x16x16xf32> to vector<16x16xf32>
    %cst_52 = arith.constant dense<0.000000e+00> : vector<256x16xf32>
    %72 = tpu.matmul %69, %71, %cst_52 {dimension_numbers = #tpu.dot_dimension_numbers<[1], [0], [0], [1], [0, 0, 1, 1], [], []>} : vector<256x16xf32>, vector<16x16xf32>, vector<256x16xf32> -> vector<256x16xf32>
    %73 = arith.addf %64, %72 : vector<256x16xf32>
    %c2_i32_53 = arith.constant 2 : i32
    %74 = arith.addi %0, %c2_i32_53 : i32
    %c0_54 = arith.constant 0 : index
    %75 = arith.index_cast %74 : i32 to index
    %c2_55 = arith.constant 2 : index
    %c0_56 = arith.constant 0 : index
    %76 = vector.load %arg2[%c0_54, %75, %c2_55, %c0_56] : memref<1x18x18x16xf32, #tpu.memory_space<vmem>>, vector<1x16x16x16xf32>
    %77 = vector.shape_cast %76 : vector<1x16x16x16xf32> to vector<16x16x16xf32>
    %78 = vector.shape_cast %77 : vector<16x16x16xf32> to vector<256x16xf32>
    %c8 = arith.constant 8 : index
    %c0_57 = arith.constant 0 : index
    %c0_58 = arith.constant 0 : index
    %79 = vector.load %arg3[%c8, %c0_57, %c0_58] : memref<9x16x16xf32, #tpu.memory_space<vmem>>, vector<1x16x16xf32>
    %80 = vector.shape_cast %79 : vector<1x16x16xf32> to vector<16x16xf32>
    %cst_59 = arith.constant dense<0.000000e+00> : vector<256x16xf32>
    %81 = tpu.matmul %78, %80, %cst_59 {dimension_numbers = #tpu.dot_dimension_numbers<[1], [0], [0], [1], [0, 0, 1, 1], [], []>} : vector<256x16xf32>, vector<16x16xf32>, vector<256x16xf32> -> vector<256x16xf32>
    %82 = arith.addf %73, %81 : vector<256x16xf32>
    %c0_60 = arith.constant 0 : index
    %c0_61 = arith.constant 0 : index
    %83 = vector.load %arg4[%c0_60, %c0_61] : memref<1x16xf32, #tpu.memory_space<vmem>>, vector<1x16xf32>
    %84 = vector.broadcast %83 : vector<1x16xf32> to vector<256x16xf32>
    %85 = arith.addf %82, %84 : vector<256x16xf32>
    %cst_62 = arith.constant 0.000000e+00 : f32
    %86 = vector.broadcast %cst_62 : f32 to vector<256x16xf32>
    %87 = arith.maximumf %85, %86 : vector<256x16xf32>
    %c0_63 = arith.constant 0 : index
    %c0_64 = arith.constant 0 : index
    %88 = vector.load %arg5[%c0_63, %c0_64] : memref<16x256xf32, #tpu.memory_space<vmem>>, vector<16x256xf32>
    %cst_65 = arith.constant dense<0.000000e+00> : vector<256x256xf32>
    %89 = tpu.matmul %87, %88, %cst_65 {dimension_numbers = #tpu.dot_dimension_numbers<[1], [0], [0], [1], [0, 0, 1, 1], [], []>} : vector<256x16xf32>, vector<16x256xf32>, vector<256x256xf32> -> vector<256x256xf32>
    %c0_66 = arith.constant 0 : index
    %c0_67 = arith.constant 0 : index
    %90 = vector.load %arg6[%c0_66, %c0_67] : memref<1x256xf32, #tpu.memory_space<vmem>>, vector<1x256xf32>
    %91 = vector.broadcast %90 : vector<1x256xf32> to vector<256x256xf32>
    %92 = arith.addf %89, %91 : vector<256x256xf32>
    %93 = vector.extract_strided_slice %92 {offsets = [0, 0], sizes = [256, 128], strides = [1, 1]} : vector<256x256xf32> to vector<256x128xf32>
    %94 = vector.extract_strided_slice %92 {offsets = [0, 128], sizes = [256, 128], strides = [1, 1]} : vector<256x256xf32> to vector<256x128xf32>
    %c0_68 = arith.constant 0 : index
    %c0_69 = arith.constant 0 : index
    %95 = vector.load %arg7[%c0_68, %c0_69] : memref<8x128xf32, #tpu.memory_space<vmem>>, vector<8x128xf32>
    %96 = tpu.iota {dimensions = array<i32: 0>} : vector<16x16x128xi32>
    %97 = vector.shape_cast %96 : vector<16x16x128xi32> to vector<256x128xi32>
    %98 = tpu.iota {dimensions = array<i32: 1>} : vector<16x16x128xi32>
    %99 = vector.shape_cast %98 : vector<16x16x128xi32> to vector<256x128xi32>
    %100 = arith.sitofp %99 : vector<256x128xi32> to vector<256x128xf32>
    %cst_70 = arith.constant 8.000000e+00 : f32
    %101 = vector.broadcast %cst_70 : f32 to vector<256x128xf32>
    %102 = arith.mulf %100, %101 : vector<256x128xf32>
    %103 = vector.extract_strided_slice %95 {offsets = [2, 0], sizes = [1, 128], strides = [1, 1]} : vector<8x128xf32> to vector<1x128xf32>
    %104 = vector.broadcast %103 : vector<1x128xf32> to vector<256x128xf32>
    %105 = arith.mulf %102, %104 : vector<256x128xf32>
    %106 = vector.broadcast %0 : i32 to vector<256x128xi32>
    %107 = arith.addi %106, %97 : vector<256x128xi32>
    %108 = arith.sitofp %107 : vector<256x128xi32> to vector<256x128xf32>
    %cst_71 = arith.constant 8.000000e+00 : f32
    %109 = vector.broadcast %cst_71 : f32 to vector<256x128xf32>
    %110 = arith.mulf %108, %109 : vector<256x128xf32>
    %111 = vector.extract_strided_slice %95 {offsets = [3, 0], sizes = [1, 128], strides = [1, 1]} : vector<8x128xf32> to vector<1x128xf32>
    %112 = vector.broadcast %111 : vector<1x128xf32> to vector<256x128xf32>
    %113 = arith.mulf %110, %112 : vector<256x128xf32>
    %114 = arith.addf %105, %113 : vector<256x128xf32>
    %115 = vector.extract_strided_slice %95 {offsets = [0, 0], sizes = [1, 128], strides = [1, 1]} : vector<8x128xf32> to vector<1x128xf32>
    %116 = vector.broadcast %115 : vector<1x128xf32> to vector<256x128xf32>
    %117 = arith.mulf %93, %116 : vector<256x128xf32>
    %118 = vector.extract_strided_slice %95 {offsets = [1, 0], sizes = [1, 128], strides = [1, 1]} : vector<8x128xf32> to vector<1x128xf32>
    %119 = vector.broadcast %118 : vector<1x128xf32> to vector<256x128xf32>
    %120 = arith.mulf %94, %119 : vector<256x128xf32>
    %cst_72 = arith.constant 4.13516665 : f32
    %121 = vector.broadcast %cst_72 : f32 to vector<256x128xf32>
    %122 = arith.minimumf %120, %121 : vector<256x128xf32>
    %123 = vector.extract_strided_slice %95 {offsets = [4, 0], sizes = [1, 128], strides = [1, 1]} : vector<8x128xf32> to vector<1x128xf32>
    %124 = vector.broadcast %123 : vector<1x128xf32> to vector<256x128xf32>
    %125 = arith.mulf %117, %124 : vector<256x128xf32>
    %126 = arith.addf %125, %114 : vector<256x128xf32>
    %127 = math.exp %122 : vector<256x128xf32>
    %128 = vector.extract_strided_slice %95 {offsets = [5, 0], sizes = [1, 128], strides = [1, 1]} : vector<8x128xf32> to vector<1x128xf32>
    %129 = vector.broadcast %128 : vector<1x128xf32> to vector<256x128xf32>
    %130 = arith.mulf %127, %129 : vector<256x128xf32>
    %131 = vector.extract_strided_slice %95 {offsets = [6, 0], sizes = [1, 128], strides = [1, 1]} : vector<8x128xf32> to vector<1x128xf32>
    %132 = vector.broadcast %131 : vector<1x128xf32> to vector<256x128xf32>
    %133 = arith.mulf %132, %130 : vector<256x128xf32>
    %134 = arith.addf %126, %133 : vector<256x128xf32>
    %135 = vector.extract_strided_slice %95 {offsets = [7, 0], sizes = [1, 128], strides = [1, 1]} : vector<8x128xf32> to vector<1x128xf32>
    %cst_73 = arith.constant 0.000000e+00 : f32
    %136 = vector.broadcast %cst_73 : f32 to vector<256x128xf32>
    %137 = arith.maximumf %136, %134 : vector<256x128xf32>
    %138 = vector.broadcast %135 : vector<1x128xf32> to vector<256x128xf32>
    %139 = arith.minimumf %138, %137 : vector<256x128xf32>
    %140 = vector.extract_strided_slice %95 {offsets = [7, 0], sizes = [1, 128], strides = [1, 1]} : vector<8x128xf32> to vector<1x128xf32>
    %cst_74 = arith.constant 0.000000e+00 : f32
    %141 = vector.broadcast %cst_74 : f32 to vector<1x128xf32>
    %142 = arith.cmpf ogt, %140, %141 : vector<1x128xf32>
    %143 = vector.shape_cast %142 : vector<1x128xi1> to vector<1x128xi1>
    %144 = vector.broadcast %143 : vector<1x128xi1> to vector<256x128xi1>
    %145 = arith.select %144, %139, %93 : vector<256x128xi1>, vector<256x128xf32>
    %c0_75 = arith.constant 0 : index
    %c0_76 = arith.constant 0 : index
    %c0_77 = arith.constant 0 : index
    %146 = vector.load %arg8[%c0_75, %c0_76, %c0_77] : memref<1x256x128xf32, #tpu.memory_space<vmem>>, vector<1x256x128xf32>
    %147 = vector.shape_cast %146 : vector<1x256x128xf32> to vector<256x128xf32>
    %148 = vector.shape_cast %145 : vector<256x128xf32> to vector<1x256x128xf32>
    tpu.vector_store %arg8[%c0_75, %c0_76, %c0_77], %148 {strides = array<i32>} : memref<1x256x128xf32, #tpu.memory_space<vmem>>, vector<1x256x128xf32>,
    return
  }
  func.func @transform_0(%arg0: i32, %arg1: i32) -> (i32, i32, i32, i32) {
    %c0_i32 = arith.constant 0 : i32
    %c0_i32_0 = arith.constant 0 : i32
    %c0_i32_1 = arith.constant 0 : i32
    %c0_i32_2 = arith.constant 0 : i32
    return %arg0, %c0_i32, %c0_i32_0, %c0_i32_1 : i32, i32, i32, i32
  }
  func.func @transform_1(%arg0: i32, %arg1: i32) -> (i32, i32, i32) {
    %c0_i32 = arith.constant 0 : i32
    %c0_i32_0 = arith.constant 0 : i32
    %c0_i32_1 = arith.constant 0 : i32
    %c0_i32_2 = arith.constant 0 : i32
    return %c0_i32, %c0_i32_0, %c0_i32_1 : i32, i32, i32
  }
  func.func @transform_2(%arg0: i32, %arg1: i32) -> (i32, i32) {
    %c0_i32 = arith.constant 0 : i32
    %c0_i32_0 = arith.constant 0 : i32
    %c0_i32_1 = arith.constant 0 : i32
    return %c0_i32, %c0_i32_0 : i32, i32
  }
  func.func @transform_3(%arg0: i32, %arg1: i32) -> (i32, i32) {
    %c0_i32 = arith.constant 0 : i32
    %c0_i32_0 = arith.constant 0 : i32
    %c0_i32_1 = arith.constant 0 : i32
    return %c0_i32, %c0_i32_0 : i32, i32
  }
  func.func @transform_4(%arg0: i32, %arg1: i32) -> (i32, i32) {
    %c0_i32 = arith.constant 0 : i32
    %c0_i32_0 = arith.constant 0 : i32
    %c0_i32_1 = arith.constant 0 : i32
    return %c0_i32, %c0_i32_0 : i32, i32
  }
  func.func @transform_5(%arg0: i32, %arg1: i32) -> (i32, i32) {
    %c0_i32 = arith.constant 0 : i32
    %c0_i32_0 = arith.constant 0 : i32
    %c0_i32_1 = arith.constant 0 : i32
    return %c0_i32, %c0_i32_0 : i32, i32
  }
  func.func @transform_6(%arg0: i32, %arg1: i32) -> (i32, i32, i32) {
    %c0_i32 = arith.constant 0 : i32
    %c0_i32_0 = arith.constant 0 : i32
    return %arg0, %arg1, %c0_i32 : i32, i32, i32
  }
}

</mosaic_0001>

<bundles_post_ra>
// kernel: tpu_custom_call.1
= control target key start
LH: loop header
LB: loop body
LE: loop exit
PB: predicated region body
PF: predicated region fallthrough
CT: control target
= control target key end

     0   :  { %11 = vsyncpa [#allocation3], 0  ;;  %s8918_s0 = inlined_call_operand.vmem [shape: f32[2,18,18,16], index: 0, kind: input, shape index: {}]   ;;  %s8919_s1 = inlined_call_operand.vmem [shape: f32[9,16,16], index: 1, kind: input, shape index: {}]   ;;  %s8920_s2 = inlined_call_operand.vmem [shape: f32[1,16], index: 2, kind: input, shape index: {}]   ;;  %s8921_s3 = inlined_call_operand.vmem [shape: f32[16,256], index: 3, kind: input, shape index: {}]   ;;  %s8922_s4 = inlined_call_operand.vmem [shape: f32[1,256], index: 4, kind: input, shape index: {}]   ;;  %s8923_s5 = inlined_call_operand.vmem [shape: f32[8,128], index: 5, kind: input, shape index: {}]   ;;  %s8924_s6 = inlined_call_operand.hbm [shape: f32[2,256,128], index: 6, kind: output, shape index: {}]  }
   0x1   :  { %13 = vsyncpa [#allocation3 + $0x1], 0  ;;  %s6396_s21 = smov 0   ;;  %s6398_s22 = smov 0  }
   0x2   :  { %s6400_s23 = smov 0   ;;  %s6402_s24 = smov 0  }
   0x3   :  { %s6404_s25 = smov 0   ;;  %s6406_s26 = smov 0  }
   0x4 LB: > { %s4834_s27 = sadd.s32 4294967295, %s6354_s26   ;;  %s4835_s28 = sadd.s32 4294967294, %s6354_s26   ;;  %s6354_s26 = sphi %s6406_s26, %s19_s26   ;;  %s6350_s25 = sphi %s6404_s25, %s9005_s25   ;;  %s6346_s24 = sphi %s6402_s24, %s9004_s24   ;;  %s6342_s23 = sphi %s6400_s23, %s9003_s23   ;;  %s6338_s22 = sphi %s6398_s22, %s9002_s22   ;;  %s6334_s21 = sphi %s6396_s21, %s9001_s21  }
   0x5   : > { %s31_s29 = sadd.s32 1, %s6350_s25  ;;  %s171_s30 = sadd.s32 1, %s6342_s23 }
   0x6   : > { %p33_p0 = scmp.ge.s32.totalorder %s31_s29, 2  ;;  %p181_p1 = scmp.ne.s32.totalorder %s6342_s23, %s6338_s22 }
   0x7   : > { %p182_p2 = scmp.eq.s32.totalorder %s4834_s27, 1  ;;  %p187_p3 = scmp.ne.s32.totalorder %s6338_s22, %s6334_s21 }
   0x8   : > { %s9007_s29 = smov (%p33_p0, %s31_s29), 0  ;;  %p188_p5 = scmp.eq.s32.totalorder %s4835_s28, 1 }
   0x9   : > { %p6436_p4 = por %p182_p2, %p181_p1  ;;  %s166_s8 = ssub.s32 %s6350_s25, %s9007_s29 }
   0xa   : > { %p4838_p6 = scmp.ge.s32.totalorder %s6354_s26, 1  ;;  %p169_p7 = scmp.eq.s32.totalorder %s166_s8, 0 }
   0xb   : > { %p6443_p8 = por %p188_p5, %p187_p3  ;;  %p229_p9 = scmp.lt.s32.totalorder %s6354_s26, 3 }
   0xc   : > { %s6449_s10 = scalar_select %p169_p7, %s6342_s23, %s171_s30  }
   0xd   : > { %p230_p10 = pnand %p4838_p6, %p229_p9 }
   0xf   : > { %233 = sbr.rel (%p230_p10) target bundleno = 885 (0x375), region = 44 }
  0x14   : > { %v4842_v0 = vld [vmem:[%s8919_s1 + $0x18] sm:$0xff]  ;;  %v4841_v1 = vld [vmem:[%s8919_s1 + $0x10] sm:$0xff]  ;;  %p259_p11 = scmp.lt.s32.totalorder %s6346_s24, 1  ;;  %v301_v2 = vld [vmem:[%s8919_s1 + $0x8] sm:$0xff]  ;;  %vm337_vm0 = vcmask 130048   ;;  %s256_s12 = sand.u32 1, %s6338_s22  }
  0x15   : > { %5682 = vmatprep.subr.mxu0 %v4842_v0  ;;  %6150 = vmatprep.subr.mxu1 %v301_v2  ;;  %v300_v3 = vld [vmem:[%s8919_s1] sm:$0xff]  ;;  %v4974_v4 = vld [vmem:[%s8919_s1 + $0x38] sm:$0xff]  ;;  %v6494_v11 = vld [vmem:[%s8919_s1 + $0x28] sm:$0xff]  ;;  %s4839_s13 = sshll.u32 %s256_s12, 8  ;;  %s5375_s15 = sshll.u32 %s6346_s24, 12 }
  0x16   : > { %5683 = vmatpush3.msra.mxu0 %v4842_v0  ;;  %s260_s19 = scalar_select %p259_p11, %s6346_s24, 1  ;;  %6152 = vmatpush3.msra.mxu1 %v301_v2  ;;  %v4973_v15 = vld [vmem:[%s8919_s1 + $0x30] sm:$0xff]  ;;  %v5106_v42 = vld [vmem:[%s8919_s1 + $0x58] sm:$0xff] }
  0x17   : > { %5684 = vmatprep.subr.mxu0 %v4841_v1  ;;  %6151 = vmatprep.subr.mxu1 %v300_v3  ;;  %v5105_v47 = vld [vmem:[%s8919_s1 + $0x50] sm:$0xff]  ;;  %s8314_s14 = scalar_lea.vmem [#allocation2], %s4839_s13  ;;  %s8873_s24 = scalar_lea.sflag [#allocation3], %s256_s12 }
  0x18   : > { %5685 = vmatpush3.msra.mxu0 %v4841_v1  ;;  %s6154_s28 = smul.u32 432, %s260_s19  ;;  %6153 = vmatpush3.msra.mxu1 %v300_v3  ;;  %s4751_s16 = sshll.u32 %s8314_s14, 4  ;;  %s8866_s16 = int_to_ptr.vmem [resolvable:$true] %s4751_s16 }
  0x19   : > { %5734 = vmatprep.subr.mxu0 %v301_v2  ;;  %5838 = vmatprep.subr.mxu1 %v4974_v4  ;;  %s8864_s19 = scalar_lea.hbm %s8924_s6, %s5375_s15  ;;  %s6358_s20 = smov [#allocation2]  }
  0x1a   : > { %s6471_s11 = scalar_lea.vmem %s8918_s0, %s6154_s28  ;;  %s6282_s27 = sshll.u32 %s6358_s20, 4  ;;  %s6283_s27 = int_to_ptr.vmem [resolvable:$false] %s6282_s27 }
  0x1b   : > { %v302_v5 = vld [vmem:[%s6471_s11 + $0x1] sm:$0xff]  ;;  %v303_v6 = vld [vmem:[%s6471_s11 + $0x9] sm:$0xff]  ;;  %v6476_v7 = vld [vmem:[%s6471_s11 + $0x19] sm:$0xff]  ;;  %s6284_s28 = scalar_lea.vmem %s6283_s27, 8192  ;;  %p6285_p1 = scmp.lt.s32.totalorder %s8866_s16, %s6283_s27 }
  0x1c   : > { %5686 = vmatprep.mubr.msk.f32.mxu0 %vm337_vm0, %v302_v5  ;;  %v6483_v8 = vld [vmem:[%s6471_s11 + $0x21] sm:$0xff]  ;;  %v6486_v9 = vld [vmem:[%s6471_s11 + $0x31] sm:$0xff]  ;;  %v6506_v13 = vld [vmem:[%s6471_s11 + $0x39] sm:$0xff] }
  0x1d   : > { %5687 = vmatmul.mubr.msk.f32.vlgmr.msra.gmra.mxu0 %vm337_vm0, %v303_v6  ;;  %v6489_v10 = vld [vmem:[%s6471_s11 + $0xc0] sm:$0xff]  ;;  %v6501_v12 = vld [vmem:[%s6471_s11 + $0xc8] sm:$0xff]  ;;  %v6511_v14 = vld [vmem:[%s6471_s11 + $0xd8] sm:$0xff] }
  0x1e   : > { %5735 = vmatpush3.msra.mxu0 %v301_v2  ;;  %5689 = vmatprep.mubr.msk.f32.mxu0 %vm337_vm0, %v6476_v7  ;;  %v6517_v16 = vld [vmem:[%s6471_s11 + $0x49] sm:$0xff]  ;;  %v6522_v17 = vld [vmem:[%s6471_s11 + $0xe0] sm:$0xff]  ;;  %v6533_v19 = vld [vmem:[%s6471_s11 + $0x51] sm:$0xff] }
  0x1f   : > { %5736 = vmatprep.subr.mxu0 %v300_v3  ;;  %5762 = vmatprep.mubr.msk.f32.mxu1 %vm337_vm0, %v6489_v10  ;;  %v6526_v18 = vld [vmem:[%s6471_s11 + $0xf0] sm:$0xff]  ;;  %v6538_v20 = vld [vmem:[%s6471_s11 + $0x61] sm:$0xff]  ;;  %v6543_v21 = vld [vmem:[%s6471_s11 + $0xf8] sm:$0xff] }
  0x20   : > { %5737 = vmatpush3.msra.mxu0 %v300_v3  ;;  %5763 = vmatmul.mubr.msk.f32.vlgmr.msra.gmra.mxu1 %vm337_vm0, %v6501_v12  ;;  %v6546_v22 = vld [vmem:[%s6471_s11 + $0x108] sm:$0xff]  ;;  %v6558_v24 = vld [vmem:[%s6471_s11 + $0x79] sm:$0xff]  ;;  %v6563_v25 = vld [vmem:[%s6471_s11 + $0x110] sm:$0xff] }
  0x21   : > { %5690 = vmatmul.mubr.msk.f32.gmra.mxu0 %vm337_vm0, %v6483_v8  ;;  %5765 = vmatprep.mubr.msk.f32.mxu1 %vm337_vm0, %v6511_v14  ;;  %v6553_v23 = vld [vmem:[%s6471_s11 + $0x69] sm:$0xff]  ;;  %v6566_v26 = vld [vmem:[%s6471_s11 + $0x120] sm:$0xff]  ;;  %v6578_v28 = vld [vmem:[%s6471_s11 + $0x91] sm:$0xff] }
  0x22   : > { %5692 = vmatprep.mubr.msk.f32.mxu0 %vm337_vm0, %v6486_v9  ;;  %5786 = vmatprep.subr.mxu0 %v6494_v11  ;;  %v6573_v27 = vld [vmem:[%s6471_s11 + $0x81] sm:$0xff]  ;;  %v6586_v30 = vld [vmem:[%s6471_s11 + $0x138] sm:$0xff]  ;;  %v6598_v32 = vld [vmem:[%s6471_s11 + $0xa9] sm:$0xff] }
  0x23   : > { %5839 = vmatpush3.msra.mxu1 %v4974_v4  ;;  %v6583_v29 = vld [vmem:[%s6471_s11 + $0x128] sm:$0xff]  ;;  %v6593_v31 = vld [vmem:[%s6471_s11 + $0x99] sm:$0xff]  ;;  %v6606_v34 = vld [vmem:[%s6471_s11 + $0x150] sm:$0xff] }
  0x24   : > { %5840 = vmatprep.subr.mxu1 %v4973_v15  ;;  %5766 = vmatmul.mubr.msk.f32.gmra.mxu1 %vm337_vm0, %v6522_v17  ;;  %v6603_v33 = vld [vmem:[%s6471_s11 + $0x140] sm:$0xff]  ;;  %v6613_v35 = vld [vmem:[%s6471_s11 + $0xb1] sm:$0xff]  ;;  %v6626_v38 = vld [vmem:[%s6471_s11 + $0x168] sm:$0xff] }
  0x25   : > { %5693 = vmatmul.mubr.msk.f32.gmra.mxu0 %vm337_vm0, %v6506_v13  ;;  %5768 = vmatprep.mubr.msk.f32.mxu1 %vm337_vm0, %v6526_v18  ;;  %v6618_v36 = vld [vmem:[%s6471_s11 + $0xc1] sm:$0xff]  ;;  %v6623_v37 = vld [vmem:[%s6471_s11 + $0x158] sm:$0xff]  ;;  %v6633_v39 = vld [vmem:[%s6471_s11 + $0xc9] sm:$0xff] }
  0x26   : > { %5695 = vmatprep.mubr.msk.f32.mxu0 %vm337_vm0, %v6517_v16  ;;  %5841 = vmatpush3.msra.mxu1 %v4973_v15  ;;  %v6638_v40 = vld [vmem:[%s6471_s11 + $0xd9] sm:$0xff]  ;;  %v6643_v41 = vld [vmem:[%s6471_s11 + $0x170] sm:$0xff]  ;;  %v6653_v43 = vld [vmem:[%s6471_s11 + $0xe1] sm:$0xff] }
  0x27   : > { %5942 = vmatprep.subr.mxu1 %v5106_v42  ;;  %v6658_v44 = vld [vmem:[%s6471_s11 + $0x18] sm:$0xff]  ;;  %v6668_v46 = vld [vmem:[%s6471_s11 + $0x20] sm:$0xff]  ;;  %v6679_v49 = vld [vmem:[%s6471_s11 + $0x30] sm:$0xff] }
  0x28   : > { %5769 = vmatmul.mubr.msk.f32.gmra.mxu1 %vm337_vm0, %v6543_v21  ;;  %v6661_v45 = vld [vmem:[%s6471_s11 + $0xf1] sm:$0xff]  ;;  %v6676_v48 = vld [vmem:[%s6471_s11 + $0xf9] sm:$0xff]  ;;  %v6684_v50 = vld [vmem:[%s6471_s11 + $0x109] sm:$0xff] }
  0x29   : > { %5696 = vmatmul.mubr.msk.f32.gmra.mxu0 %vm337_vm0, %v6533_v19  ;;  %5771 = vmatprep.mubr.msk.f32.mxu1 %vm337_vm0, %v6546_v22  ;;  %v6691_v51 = vld [vmem:[%s6471_s11 + $0x38] sm:$0xff]  ;;  %v6699_v53 = vld [vmem:[%s6471_s11 + $0x48] sm:$0xff]  ;;  %v6711_v55 = vld [vmem:[%s6471_s11 + $0x50] sm:$0xff] }
  0x2a   : > { %5698 = vmatprep.mubr.msk.f32.mxu0 %vm337_vm0, %v6538_v20  ;;  %v6696_v52 = vld [vmem:[%s6471_s11 + $0x111] sm:$0xff]  ;;  %v6704_v54 = vld [vmem:[%s6471_s11 + $0x121] sm:$0xff]  ;;  %v6716_v56 = vld [vmem:[%s6471_s11 + $0x129] sm:$0xff] }
  0x2b   : > { %v6719_v57 = vld [vmem:[%s6471_s11 + $0x60] sm:$0xff]  ;;  %v6731_v59 = vld [vmem:[%s6471_s11 + $0x68] sm:$0xff]  ;;  %v6739_v61 = vld [vmem:[%s6471_s11 + $0x78] sm:$0xff] }
  0x2c   : > { %5772 = vmatmul.mubr.msk.f32.gmra.mxu1 %vm337_vm0, %v6563_v25  ;;  %v6724_v58 = vld [vmem:[%s6471_s11 + $0x139] sm:$0xff]  ;;  %v6736_v60 = vld [vmem:[%s6471_s11 + $0x141] sm:$0xff]  ;;  %v6744_v62 = vld [vmem:[%s6471_s11 + $0x151] sm:$0xff] }
  0x2d   : > { %5699 = vmatmul.mubr.msk.f32.gmra.mxu0 %vm337_vm0, %v6553_v23  ;;  %5774 = vmatprep.mubr.msk.f32.mxu1 %vm337_vm0, %v6566_v26  ;;  %v6751_v63 = vld [vmem:[%s6471_s11 + $0x80] sm:$0xff]  ;;  %v6759_v1 = vld [vmem:[%s6471_s11 + $0x90] sm:$0xff]  ;;  %v6771_v3 = vld [vmem:[%s6471_s11 + $0x98] sm:$0xff] }
  0x2e   : > { %5701 = vmatprep.mubr.msk.f32.mxu0 %vm337_vm0, %v6558_v24  ;;  %v6756_v0 = vld [vmem:[%s6471_s11 + $0x159] sm:$0xff]  ;;  %v6764_v2 = vld [vmem:[%s6471_s11 + $0x169] sm:$0xff]  ;;  %v6776_v4 = vld [vmem:[%s6471_s11 + $0x171] sm:$0xff] }
  0x2f   : > { %v6779_v5 = vld [vmem:[%s6471_s11 + $0xa8] sm:$0xff]  ;;  %v268_v6 = vld [vmem:[%s6471_s11] sm:$0xff]  ;;  %v6789_v15 = vld [vmem:[%s6471_s11 + $0xb0] sm:$0xff] }
  0x30   : > { %5775 = vmatmul.mubr.msk.f32.gmra.mxu1 %vm337_vm0, %v6583_v29 }
  0x31   : > { %5702 = vmatmul.mubr.msk.f32.gmra.mxu0 %vm337_vm0, %v6573_v27  ;;  %5777 = vmatprep.mubr.msk.f32.mxu1 %vm337_vm0, %v6586_v30 }
  0x32   : > { %5704 = vmatprep.mubr.msk.f32.mxu0 %vm337_vm0, %v6578_v28 }
  0x34   : > { %5778 = vmatmul.mubr.msk.f32.gmra.mxu1 %vm337_vm0, %v6603_v33 }
  0x35   : > { %5705 = vmatmul.mubr.msk.f32.gmra.mxu0 %vm337_vm0, %v6593_v31  ;;  %5780 = vmatprep.mubr.msk.f32.mxu1 %vm337_vm0, %v6606_v34 }
  0x36   : > { %5707 = vmatprep.mubr.msk.f32.mxu0 %vm337_vm0, %v6598_v32 }
  0x38   : > { %5781 = vmatmul.mubr.msk.f32.gmra.mxu1 %vm337_vm0, %v6623_v37 }
  0x39   : > { %5708 = vmatmul.mubr.msk.f32.gmra.mxu0 %vm337_vm0, %v6613_v35  ;;  %5783 = vmatprep.mubr.msk.f32.mxu1 %vm337_vm0, %v6626_v38 }
  0x3a   : > { %5710 = vmatprep.mubr.msk.f32.mxu0 %vm337_vm0, %v6618_v36 }
  0x3c   : > { %5784 = vmatmul.mubr.msk.f32.gmra.mxu1 %vm337_vm0, %v6643_v41 }
  0x3d   : > { %5711 = vmatmul.mubr.msk.f32.gmra.mxu0 %vm337_vm0, %v6633_v39  ;;  %5842 = vmatprep.mubr.msk.f32.mxu1 %vm337_vm0, %v6658_v44 }
  0x3e   : > { %5713 = vmatprep.mubr.msk.f32.mxu0 %vm337_vm0, %v6638_v40 }
  0x40   : > { %5843 = vmatmul.mubr.msk.f32.vlgmr.msra.gmra.mxu1 %vm337_vm0, %v6668_v46 }
  0x41   : > { %5714 = vmatmul.mubr.msk.f32.gmra.mxu0 %vm337_vm0, %v6653_v43  ;;  %5845 = vmatprep.mubr.msk.f32.mxu1 %vm337_vm0, %v6679_v49 }
  0x42   : > { %5716 = vmatprep.mubr.msk.f32.mxu0 %vm337_vm0, %v6661_v45  ;;  %5943 = vmatpush3.msra.mxu1 %v5106_v42  ;;  %v269_v42 = vld [vmem:[%s6471_s11 + $0x8] sm:$0xff] }
  0x43   : > { %5944 = vmatprep.subr.mxu1 %v5105_v47 }
  0x44   : > { %5945 = vmatpush3.msra.mxu1 %v5105_v47  ;;  %v4907_v47 = vld [vmem:[%s8919_s1 + $0x20] sm:$0xff] }
  0x45   : > { %5717 = vmatmul.mubr.msk.f32.gmra.mxu0 %vm337_vm0, %v6676_v48  ;;  %5846 = vmatmul.mubr.msk.f32.gmra.mxu1 %vm337_vm0, %v6691_v51 }
  0x46   : > { %5719 = vmatprep.mubr.msk.f32.mxu0 %vm337_vm0, %v6684_v50  ;;  %5848 = vmatprep.mubr.msk.f32.mxu1 %vm337_vm0, %v6699_v53 }
  0x49   : > { %5720 = vmatmul.mubr.msk.f32.gmra.mxu0 %vm337_vm0, %v6696_v52  ;;  %5849 = vmatmul.mubr.msk.f32.gmra.mxu1 %vm337_vm0, %v6711_v55 }
  0x4a   : > { %5722 = vmatprep.mubr.msk.f32.mxu0 %vm337_vm0, %v6704_v54  ;;  %5851 = vmatprep.mubr.msk.f32.mxu1 %vm337_vm0, %v6719_v57 }
  0x4d   : > { %5723 = vmatmul.mubr.msk.f32.gmra.mxu0 %vm337_vm0, %v6716_v56  ;;  %5852 = vmatmul.mubr.msk.f32.gmra.mxu1 %vm337_vm0, %v6731_v59 }
  0x4e   : > { %5725 = vmatprep.mubr.msk.f32.mxu0 %vm337_vm0, %v6724_v58  ;;  %5854 = vmatprep.mubr.msk.f32.mxu1 %vm337_vm0, %v6739_v61 }
  0x51   : > { %5726 = vmatmul.mubr.msk.f32.gmra.mxu0 %vm337_vm0, %v6736_v60  ;;  %5855 = vmatmul.mubr.msk.f32.gmra.mxu1 %vm337_vm0, %v6751_v63 }
  0x52   : > { %5728 = vmatprep.mubr.msk.f32.mxu0 %vm337_vm0, %v6744_v62  ;;  %5857 = vmatprep.mubr.msk.f32.mxu1 %vm337_vm0, %v6759_v1 }
  0x55   : > { %5729 = vmatmul.mubr.msk.f32.gmra.mxu0 %vm337_vm0, %v6756_v0  ;;  %5858 = vmatmul.mubr.msk.f32.gmra.mxu1 %vm337_vm0, %v6771_v3 }
  0x56   : > { %5731 = vmatprep.mubr.msk.f32.mxu0 %vm337_vm0, %v6764_v2  ;;  %5860 = vmatprep.mubr.msk.f32.mxu1 %vm337_vm0, %v6779_v5 }
  0x59   : > { %5732 = vmatmul.mubr.msk.f32.gmra.mxu0 %vm337_vm0, %v6776_v4  ;;  %5861 = vmatmul.mubr.msk.f32.gmra.mxu1 %vm337_vm0, %v6789_v15 }
  0x5a   : > { %5738 = vmatprep.mubr.msk.f32.mxu0 %vm337_vm0, %v268_v6  ;;  %5863 = vmatprep.mubr.msk.f32.mxu1 %vm337_vm0, %v6489_v10  ;;  %v5040_v6 = vld [vmem:[%s8919_s1 + $0x48] sm:$0xff] }
  0x5d   : > { %5739 = vmatmul.mubr.msk.f32.vlgmr.msra.gmra.mxu0 %vm337_vm0, %v269_v42  ;;  %5864 = vmatmul.mubr.msk.f32.gmra.mxu1 %vm337_vm0, %v6501_v12  ;;  %v6890_v42 = vld [vmem:[%s6471_s11 + $0x32] sm:$0xff] }
  0x5e   : > { %5787 = vmatpush3.msra.mxu0 %v6494_v11  ;;  %5741 = vmatprep.mubr.msk.f32.mxu0 %vm337_vm0, %v6658_v44  ;;  %v980_v11 = vld [vmem:[%s6471_s11 + $0x2] sm:$0xff]  ;;  %v982_v44 = vld [vmem:[%s6471_s11 + $0x1a] sm:$0xff] }
  0x5f   : > { %5788 = vmatprep.subr.mxu0 %v4907_v47  ;;  %5866 = vmatprep.mubr.msk.f32.mxu1 %vm337_vm0, %v6511_v14 }
  0x60   : > { %5789 = vmatpush3.msra.mxu0 %v4907_v47  ;;  %v6900_v47 = vld [vmem:[%s6471_s11 + $0x3a] sm:$0xff] }
  0x61   : > { %5742 = vmatmul.mubr.msk.f32.gmra.mxu0 %vm337_vm0, %v6668_v46  ;;  %5890 = vmatprep.subr.mxu0 %v5040_v6  ;;  %v983_v46 = vld [vmem:[%s6471_s11 + $0x22] sm:$0xff] }
  0x62   : > { %5744 = vmatprep.mubr.msk.f32.mxu0 %vm337_vm0, %v6679_v49  ;;  %5867 = vmatmul.mubr.msk.f32.gmra.mxu1 %vm337_vm0, %v6522_v17 }
  0x63   : > { %5869 = vmatprep.mubr.msk.f32.mxu1 %vm337_vm0, %v6526_v18 }
  0x65   : > { %5745 = vmatmul.mubr.msk.f32.gmra.mxu0 %vm337_vm0, %v6691_v51 }
  0x66   : > { %5747 = vmatprep.mubr.msk.f32.mxu0 %vm337_vm0, %v6699_v53  ;;  %5870 = vmatmul.mubr.msk.f32.gmra.mxu1 %vm337_vm0, %v6543_v21 }
  0x67   : > { %5872 = vmatprep.mubr.msk.f32.mxu1 %vm337_vm0, %v6546_v22 }
  0x69   : > { %5748 = vmatmul.mubr.msk.f32.gmra.mxu0 %vm337_vm0, %v6711_v55 }
  0x6a   : > { %5750 = vmatprep.mubr.msk.f32.mxu0 %vm337_vm0, %v6719_v57  ;;  %5873 = vmatmul.mubr.msk.f32.gmra.mxu1 %vm337_vm0, %v6563_v25 }
  0x6b   : > { %5875 = vmatprep.mubr.msk.f32.mxu1 %vm337_vm0, %v6566_v26 }
  0x6d   : > { %5751 = vmatmul.mubr.msk.f32.gmra.mxu0 %vm337_vm0, %v6731_v59 }
  0x6e   : > { %5753 = vmatprep.mubr.msk.f32.mxu0 %vm337_vm0, %v6739_v61  ;;  %5876 = vmatmul.mubr.msk.f32.gmra.mxu1 %vm337_vm0, %v6583_v29 }
  0x6f   : > { %5878 = vmatprep.mubr.msk.f32.mxu1 %vm337_vm0, %v6586_v30  ;;  %v6863_v30 = vld [vmem:[%s6471_s11 + $0x180] sm:$0xff] }
  0x71   : > { %5754 = vmatmul.mubr.msk.f32.gmra.mxu0 %vm337_vm0, %v6751_v63 }
  0x72   : > { %5756 = vmatprep.mubr.msk.f32.mxu0 %vm337_vm0, %v6759_v1  ;;  %5879 = vmatmul.mubr.msk.f32.gmra.mxu1 %vm337_vm0, %v6603_v33  ;;  %v5238_v33 = vld [vmem:[%s8919_s1 + $0x78] sm:$0xff] }
  0x73   : > { %5881 = vmatprep.mubr.msk.f32.mxu1 %vm337_vm0, %v6606_v34  ;;  %v981_v34 = vld [vmem:[%s6471_s11 + $0xa] sm:$0xff]  ;;  %6046 = vmatprep.subr.mxu1 %v5238_v33 }
  0x75   : > { %5757 = vmatmul.mubr.msk.f32.gmra.mxu0 %vm337_vm0, %v6771_v3 }
  0x76   : > { %5759 = vmatprep.mubr.msk.f32.mxu0 %vm337_vm0, %v6779_v5  ;;  %5882 = vmatmul.mubr.msk.f32.gmra.mxu1 %vm337_vm0, %v6623_v37  ;;  %v5039_v37 = vld [vmem:[%s8919_s1 + $0x40] sm:$0xff] }
  0x77   : > { %5884 = vmatprep.mubr.msk.f32.mxu1 %vm337_vm0, %v6626_v38  ;;  %v6879_v38 = vld [vmem:[%s6471_s11 + $0x188] sm:$0xff] }
  0x79   : > { %5760 = vmatmul.mubr.msk.f32.gmra.mxu0 %vm337_vm0, %v6789_v15 }
  0x7a   : > { %5790 = vmatprep.mubr.msk.f32.mxu0 %vm337_vm0, %v980_v11  ;;  %5885 = vmatmul.mubr.msk.f32.gmra.mxu1 %vm337_vm0, %v6643_v41  ;;  %v6887_v41 = vld [vmem:[%s8919_s1 + $0x68] sm:$0xff] }
  0x7b   : > { %5887 = vmatprep.mubr.msk.f32.mxu1 %vm337_vm0, %v6863_v30  ;;  %v6906_v11 = vld [vmem:[%s6471_s11 + $0x4a] sm:$0xff] }
  0x7c   : > { %8937 = vst [vmem:[#allocation5_spill] sm:$0xff] %v6906_v11 }
  0x7d   : > { %5791 = vmatmul.mubr.msk.f32.vlgmr.msra.gmra.mxu0 %vm337_vm0, %v981_v34  ;;  %v6916_v34 = vld [vmem:[%s6471_s11 + $0x52] sm:$0xff] }
  0x7e   : > { %5891 = vmatpush3.msra.mxu0 %v5040_v6  ;;  %5793 = vmatprep.mubr.msk.f32.mxu0 %vm337_vm0, %v982_v44  ;;  %v5237_v6 = vld [vmem:[%s8919_s1 + $0x70] sm:$0xff]  ;;  %8938 = vst [vmem:[#allocation6_spill] sm:$0xff] %v6916_v34 }
  0x7f   : > { %5892 = vmatprep.subr.mxu0 %v5039_v37  ;;  %5888 = vmatmul.mubr.msk.f32.gmra.mxu1 %vm337_vm0, %v6879_v38 }
  0x80   : > { %5893 = vmatpush3.msra.mxu0 %v5039_v37  ;;  %5946 = vmatprep.mubr.msk.f32.mxu1 %vm337_vm0, %v982_v44  ;;  %v6919_v44 = vld [vmem:[%s6471_s11 + $0x62] sm:$0xff]  ;;  %v6933_v37 = vld [vmem:[%s6471_s11 + $0x7a] sm:$0xff] }
  0x81   : > { %5794 = vmatmul.mubr.msk.f32.gmra.mxu0 %vm337_vm0, %v983_v46  ;;  %5994 = vmatprep.subr.mxu0 %v6887_v41  ;;  %8939 = vst [vmem:[#allocation7_spill] sm:$0xff] %v6919_v44  ;;  %8941 = vst [vmem:[#allocation9_spill] sm:$0xff] %v6933_v37 }
  0x82   : > { %5796 = vmatprep.mubr.msk.f32.mxu0 %vm337_vm0, %v6890_v42 }
  0x83   : > { %5947 = vmatmul.mubr.msk.f32.vlgmr.msra.gmra.mxu1 %vm337_vm0, %v983_v46  ;;  %v6944_v46 = vld [vmem:[%s6471_s11 + $0x82] sm:$0xff] }
  0x84   : > { %5949 = vmatprep.mubr.msk.f32.mxu1 %vm337_vm0, %v6890_v42  ;;  %6047 = vmatpush3.msra.mxu1 %v5238_v33  ;;  %v6930_v33 = vld [vmem:[%s6471_s11 + $0x6a] sm:$0xff]  ;;  %8942 = vst [vmem:[#allocation10_spill] sm:$0xff] %v6944_v46 }
  0x85   : > { %5797 = vmatmul.mubr.msk.f32.gmra.mxu0 %vm337_vm0, %v6900_v47  ;;  %6048 = vmatprep.subr.mxu1 %v5237_v6  ;;  %8940 = vst [vmem:[#allocation8_spill] sm:$0xff] %v6930_v33 }
  0x86   : > { %5799 = vmatprep.mubr.msk.f32.mxu0 %vm337_vm0, %v6906_v11  ;;  %6049 = vmatpush3.msra.mxu1 %v5237_v6  ;;  %v6947_v6 = vld [vmem:[%s6471_s11 + $0x92] sm:$0xff] }
  0x87   : > { %5950 = vmatmul.mubr.msk.f32.gmra.mxu1 %vm337_vm0, %v6900_v47  ;;  %8943 = vst [vmem:[#allocation11_spill] sm:$0xff] %v6947_v6 }
  0x88   : > { %5952 = vmatprep.mubr.msk.f32.mxu1 %vm337_vm0, %v6906_v11  ;;  %v1000_v11 = vld [vmem:[%s6471_s11 + $0xf2] sm:$0xff] }
  0x89   : > { %5800 = vmatmul.mubr.msk.f32.gmra.mxu0 %vm337_vm0, %v6916_v34 }
  0x8a   : > { %5802 = vmatprep.mubr.msk.f32.mxu0 %vm337_vm0, %v6919_v44 }
  0x8b   : > { %5953 = vmatmul.mubr.msk.f32.gmra.mxu1 %vm337_vm0, %v6916_v34  ;;  %v6961_v34 = vld [vmem:[%s6471_s11 + $0xaa] sm:$0xff] }
  0x8c   : > { %5955 = vmatprep.mubr.msk.f32.mxu1 %vm337_vm0, %v6919_v44  ;;  %v6958_v44 = vld [vmem:[%s6471_s11 + $0x9a] sm:$0xff]  ;;  %8945 = vst [vmem:[#allocation13_spill] sm:$0xff] %v6961_v34 }
  0x8d   : > { %5803 = vmatmul.mubr.msk.f32.gmra.mxu0 %vm337_vm0, %v6930_v33  ;;  %8944 = vst [vmem:[#allocation12_spill] sm:$0xff] %v6958_v44 }
  0x8e   : > { %5805 = vmatprep.mubr.msk.f32.mxu0 %vm337_vm0, %v6933_v37 }
  0x8f   : > { %5956 = vmatmul.mubr.msk.f32.gmra.mxu1 %vm337_vm0, %v6930_v33  ;;  %v996_v33 = vld [vmem:[%s6471_s11 + $0xc2] sm:$0xff] }
  0x90   : > { %5958 = vmatprep.mubr.msk.f32.mxu1 %vm337_vm0, %v6933_v37  ;;  %v995_v37 = vld [vmem:[%s6471_s11 + $0xb2] sm:$0xff] }
  0x91   : > { %5806 = vmatmul.mubr.msk.f32.gmra.mxu0 %vm337_vm0, %v6944_v46 }
  0x92   : > { %5808 = vmatprep.mubr.msk.f32.mxu0 %vm337_vm0, %v6947_v6 }
  0x93   : > { %5959 = vmatmul.mubr.msk.f32.gmra.mxu1 %vm337_vm0, %v6944_v46  ;;  %v998_v46 = vld [vmem:[%s6471_s11 + $0xda] sm:$0xff] }
  0x94   : > { %5961 = vmatprep.mubr.msk.f32.mxu1 %vm337_vm0, %v6947_v6  ;;  %v997_v6 = vld [vmem:[%s6471_s11 + $0xca] sm:$0xff] }
  0x95   : > { %5809 = vmatmul.mubr.msk.f32.gmra.mxu0 %vm337_vm0, %v6958_v44 }
  0x96   : > { %5811 = vmatprep.mubr.msk.f32.mxu0 %vm337_vm0, %v6961_v34 }
  0x97   : > { %5962 = vmatmul.mubr.msk.f32.gmra.mxu1 %vm337_vm0, %v6958_v44  ;;  %v999_v44 = vld [vmem:[%s6471_s11 + $0xe2] sm:$0xff] }
  0x98   : > { %5964 = vmatprep.mubr.msk.f32.mxu1 %vm337_vm0, %v6961_v34  ;;  %v1002_v34 = vld [vmem:[%s6471_s11 + $0x10a] sm:$0xff] }
  0x99   : > { %5812 = vmatmul.mubr.msk.f32.gmra.mxu0 %vm337_vm0, %v995_v37 }
  0x9a   : > { %5814 = vmatprep.mubr.msk.f32.mxu0 %vm337_vm0, %v996_v33 }
  0x9b   : > { %5965 = vmatmul.mubr.msk.f32.gmra.mxu1 %vm337_vm0, %v995_v37  ;;  %v1001_v37 = vld [vmem:[%s6471_s11 + $0xfa] sm:$0xff] }
  0x9c   : > { %5967 = vmatprep.mubr.msk.f32.mxu1 %vm337_vm0, %v996_v33  ;;  %v1003_v33 = vld [vmem:[%s6471_s11 + $0x112] sm:$0xff] }
  0x9d   : > { %5815 = vmatmul.mubr.msk.f32.gmra.mxu0 %vm337_vm0, %v997_v6 }
  0x9e   : > { %5817 = vmatprep.mubr.msk.f32.mxu0 %vm337_vm0, %v998_v46 }
  0x9f   : > { %5968 = vmatmul.mubr.msk.f32.gmra.mxu1 %vm337_vm0, %v997_v6  ;;  %v1004_v6 = vld [vmem:[%s6471_s11 + $0x122] sm:$0xff] }
  0xa0   : > { %5970 = vmatprep.mubr.msk.f32.mxu1 %vm337_vm0, %v998_v46  ;;  %v1006_v46 = vld [vmem:[%s6471_s11 + $0x13a] sm:$0xff] }
  0xa1   : > { %5818 = vmatmul.mubr.msk.f32.gmra.mxu0 %vm337_vm0, %v999_v44 }
  0xa2   : > { %5820 = vmatprep.mubr.msk.f32.mxu0 %vm337_vm0, %v1000_v11 }
  0xa3   : > { %5971 = vmatmul.mubr.msk.f32.gmra.mxu1 %vm337_vm0, %v999_v44  ;;  %v1005_v44 = vld [vmem:[%s6471_s11 + $0x12a] sm:$0xff] }
  0xa4   : > { %5973 = vmatprep.mubr.msk.f32.mxu1 %vm337_vm0, %v1000_v11  ;;  %v1007_v11 = vld [vmem:[%s6471_s11 + $0x142] sm:$0xff] }
  0xa5   : > { %5821 = vmatmul.mubr.msk.f32.gmra.mxu0 %vm337_vm0, %v1001_v37 }
  0xa6   : > { %5823 = vmatprep.mubr.msk.f32.mxu0 %vm337_vm0, %v1002_v34 }
  0xa7   : > { %5974 = vmatmul.mubr.msk.f32.gmra.mxu1 %vm337_vm0, %v1001_v37  ;;  %v1008_v37 = vld [vmem:[%s6471_s11 + $0x152] sm:$0xff] }
  0xa8   : > { %5976 = vmatprep.mubr.msk.f32.mxu1 %vm337_vm0, %v1002_v34  ;;  %v1009_v34 = vld [vmem:[%s6471_s11 + $0x15a] sm:$0xff] }
  0xa9   : > { %5824 = vmatmul.mubr.msk.f32.gmra.mxu0 %vm337_vm0, %v1003_v33 }
  0xaa   : > { %5826 = vmatprep.mubr.msk.f32.mxu0 %vm337_vm0, %v1004_v6 }
  0xab   : > { %5977 = vmatmul.mubr.msk.f32.gmra.mxu1 %vm337_vm0, %v1003_v33  ;;  %v1010_v33 = vld [vmem:[%s6471_s11 + $0x16a] sm:$0xff] }
  0xac   : > { %5979 = vmatprep.mubr.msk.f32.mxu1 %vm337_vm0, %v1004_v6  ;;  %v1011_v6 = vld [vmem:[%s6471_s11 + $0x172] sm:$0xff] }
  0xad   : > { %5827 = vmatmul.mubr.msk.f32.gmra.mxu0 %vm337_vm0, %v1005_v44 }
  0xae   : > { %5829 = vmatprep.mubr.msk.f32.mxu0 %vm337_vm0, %v1006_v46 }
  0xaf   : > { %5980 = vmatmul.mubr.msk.f32.gmra.mxu1 %vm337_vm0, %v1005_v44  ;;  %v7026_v44 = vld [vmem:[%s6471_s11 + $0x182] sm:$0xff] }
  0xb0   : > { %5982 = vmatprep.mubr.msk.f32.mxu1 %vm337_vm0, %v1006_v46  ;;  %v5171_v46 = vld [vmem:[%s8919_s1 + $0x60] sm:$0xff] }
  0xb1   : > { %5830 = vmatmul.mubr.msk.f32.gmra.mxu0 %vm337_vm0, %v1007_v11 }
  0xb2   : > { %5832 = vmatprep.mubr.msk.f32.mxu0 %vm337_vm0, %v1008_v37 }
  0xb3   : > { %5983 = vmatmul.mubr.msk.f32.gmra.mxu1 %vm337_vm0, %v1007_v11  ;;  %v7037_v11 = vld [vmem:[%s6471_s11 + $0x18a] sm:$0xff] }
  0xb4   : > { %5985 = vmatprep.mubr.msk.f32.mxu1 %vm337_vm0, %v1008_v37  ;;  %8946 = vst [vmem:[#allocation14_spill] sm:$0xff] %v7037_v11  ;;  %v5230_v37 = vld [vmem:[%s6471_s11 + $0x159] sm:$0xff] }
  0xb5   : > { %5833 = vmatmul.mubr.msk.f32.gmra.mxu0 %vm337_vm0, %v1009_v34 }
  0xb6   : > { %5835 = vmatprep.mubr.msk.f32.mxu0 %vm337_vm0, %v1010_v33 }
  0xb7   : > { %5986 = vmatmul.mubr.msk.f32.gmra.mxu1 %vm337_vm0, %v1009_v34 }
  0xb8   : > { %5988 = vmatprep.mubr.msk.f32.mxu1 %vm337_vm0, %v1010_v33 }
  0xb9   : > { %5836 = vmatmul.mubr.msk.f32.gmra.mxu0 %vm337_vm0, %v1011_v6 }
  0xba   : > { %5894 = vmatprep.mubr.msk.f32.mxu0 %vm337_vm0, %v6476_v7  ;;  %v7047_v7 = vld [vmem:[%s8919_s1 + $0x88] sm:$0xff] }
  0xbb   : > { %5989 = vmatmul.mubr.msk.f32.gmra.mxu1 %vm337_vm0, %v1011_v6  ;;  %v5037_v6 = vld [vmem:[%s6471_s11 + $0x181] sm:$0xff] }
  0xbc   : > { %5991 = vmatprep.mubr.msk.f32.mxu1 %vm337_vm0, %v7026_v44 }
  0xbd   : > { %5895 = vmatmul.mubr.msk.f32.vlgmr.msra.gmra.mxu0 %vm337_vm0, %v6483_v8 }
  0xbe   : > { %5995 = vmatpush3.msra.mxu0 %v6887_v41  ;;  %5897 = vmatprep.mubr.msk.f32.mxu0 %vm337_vm0, %v6486_v9 }
  0xbf   : > { %5996 = vmatprep.subr.mxu0 %v5171_v46  ;;  %5992 = vmatmul.mubr.msk.f32.gmra.mxu1 %vm337_vm0, %v7037_v11 }
  0xc0   : > { %5997 = vmatpush3.msra.mxu0 %v5171_v46  ;;  %6050 = vmatprep.mubr.msk.f32.mxu1 %vm337_vm0, %v6486_v9 }
  0xc1   : > { %5898 = vmatmul.mubr.msk.f32.gmra.mxu0 %vm337_vm0, %v6506_v13  ;;  %6098 = vmatprep.subr.mxu0 %v7047_v7 }
  0xc2   : > { %5900 = vmatprep.mubr.msk.f32.mxu0 %vm337_vm0, %v6517_v16 }
  0xc3   : > { %6051 = vmatmul.mubr.msk.f32.vlgmr.msra.gmra.mxu1 %vm337_vm0, %v6506_v13 }
  0xc4   : > { %6053 = vmatprep.mubr.msk.f32.mxu1 %vm337_vm0, %v6517_v16  ;;  %v5223_v16 = vld [vmem:[%s6471_s11 + $0x109] sm:$0xff] }
  0xc5   : > { %5901 = vmatmul.mubr.msk.f32.gmra.mxu0 %vm337_vm0, %v6533_v19 }
  0xc6   : > { %5903 = vmatprep.mubr.msk.f32.mxu0 %vm337_vm0, %v6538_v20 }
  0xc7   : > { %6054 = vmatmul.mubr.msk.f32.gmra.mxu1 %vm337_vm0, %v6533_v19 }
  0xc8   : > { %6056 = vmatprep.mubr.msk.f32.mxu1 %vm337_vm0, %v6538_v20 }
  0xc9   : > { %5904 = vmatmul.mubr.msk.f32.gmra.mxu0 %vm337_vm0, %v6553_v23 }
  0xca   : > { %5906 = vmatprep.mubr.msk.f32.mxu0 %vm337_vm0, %v6558_v24 }
  0xcb   : > { %6057 = vmatmul.mubr.msk.f32.gmra.mxu1 %vm337_vm0, %v6553_v23 }
  0xcc   : > { %6059 = vmatprep.mubr.msk.f32.mxu1 %vm337_vm0, %v6558_v24  ;;  %v5224_v24 = vld [vmem:[%s6471_s11 + $0x111] sm:$0xff] }
  0xcd   : > { %5907 = vmatmul.mubr.msk.f32.gmra.mxu0 %vm337_vm0, %v6573_v27 }
  0xce   : > { %5909 = vmatprep.mubr.msk.f32.mxu0 %vm337_vm0, %v6578_v28 }
  0xcf   : > { %6060 = vmatmul.mubr.msk.f32.gmra.mxu1 %vm337_vm0, %v6573_v27 }
  0xd0   : > { %6062 = vmatprep.mubr.msk.f32.mxu1 %vm337_vm0, %v6578_v28  ;;  %v5225_v28 = vld [vmem:[%s6471_s11 + $0x121] sm:$0xff] }
  0xd1   : > { %5910 = vmatmul.mubr.msk.f32.gmra.mxu0 %vm337_vm0, %v6593_v31 }
  0xd2   : > { %5912 = vmatprep.mubr.msk.f32.mxu0 %vm337_vm0, %v6598_v32 }
  0xd3   : > { %6063 = vmatmul.mubr.msk.f32.gmra.mxu1 %vm337_vm0, %v6593_v31 }
  0xd4   : > { %6065 = vmatprep.mubr.msk.f32.mxu1 %vm337_vm0, %v6598_v32 }
  0xd5   : > { %5913 = vmatmul.mubr.msk.f32.gmra.mxu0 %vm337_vm0, %v6613_v35 }
  0xd6   : > { %5915 = vmatprep.mubr.msk.f32.mxu0 %vm337_vm0, %v6618_v36 }
  0xd7   : > { %6066 = vmatmul.mubr.msk.f32.gmra.mxu1 %vm337_vm0, %v6613_v35 }
  0xd8   : > { %6068 = vmatprep.mubr.msk.f32.mxu1 %vm337_vm0, %v6618_v36  ;;  %v5226_v36 = vld [vmem:[%s6471_s11 + $0x129] sm:$0xff] }
  0xd9   : > { %5916 = vmatmul.mubr.msk.f32.gmra.mxu0 %vm337_vm0, %v6633_v39 }
  0xda   : > { %5918 = vmatprep.mubr.msk.f32.mxu0 %vm337_vm0, %v6638_v40 }
  0xdb   : > { %6069 = vmatmul.mubr.msk.f32.gmra.mxu1 %vm337_vm0, %v6633_v39 }
  0xdc   : > { %6071 = vmatprep.mubr.msk.f32.mxu1 %vm337_vm0, %v6638_v40  ;;  %v5227_v40 = vld [vmem:[%s6471_s11 + $0x139] sm:$0xff] }
  0xdd   : > { %v7110_v8 = vpop.f32.mrf.mxu0  ;;  %5919 = vmatmul.mubr.msk.f32.gmra.mxu0 %vm337_vm0, %v6653_v43 }
  0xde   : > { %5921 = vmatprep.mubr.msk.f32.mxu0 %vm337_vm0, %v6661_v45 }
  0xdf   : > { %v7116_v9 = vpop.f32.mrf.mxu0  ;;  %6072 = vmatmul.mubr.msk.f32.gmra.mxu1 %vm337_vm0, %v6653_v43 }
  0xe0   : > { %6074 = vmatprep.mubr.msk.f32.mxu1 %vm337_vm0, %v6661_v45  ;;  %v7129_v19 = vpop.f32.mrf.mxu1 }
  0xe1   : > { %v7122_v13 = vpop.f32.mrf.mxu0  ;;  %5922 = vmatmul.mubr.msk.f32.gmra.mxu0 %vm337_vm0, %v6676_v48 }
  0xe2   : > { %5924 = vmatprep.mubr.msk.f32.mxu0 %vm337_vm0, %v6684_v50  ;;  %v7135_v23 = vpop.f32.mrf.mxu1  ;;  %v5228_v50 = vld [vmem:[%s6471_s11 + $0x141] sm:$0xff] }
  0xe3   : > { %v7131_v20 = vpop.f32.mrf.mxu0  ;;  %6075 = vmatmul.mubr.msk.f32.gmra.mxu1 %vm337_vm0, %v6676_v48 }
  0xe4   : > { %6077 = vmatprep.mubr.msk.f32.mxu1 %vm337_vm0, %v5223_v16  ;;  %v7146_v31 = vpop.f32.mrf.mxu1  ;;  %v5232_v16 = vld [vmem:[%s6471_s11 + $0x171] sm:$0xff] }
  0xe5   : > { %v7139_v27 = vpop.f32.mrf.mxu0  ;;  %5925 = vmatmul.mubr.msk.f32.gmra.mxu0 %vm337_vm0, %v6696_v52 }
  0xe6   : > { %5927 = vmatprep.mubr.msk.f32.mxu0 %vm337_vm0, %v6704_v54  ;;  %v7151_v35 = vpop.f32.mrf.mxu1  ;;  %v5229_v54 = vld [vmem:[%s6471_s11 + $0x151] sm:$0xff] }
  0xe7   : > { %v7148_v32 = vpop.f32.mrf.mxu0  ;;  %6078 = vmatmul.mubr.msk.f32.gmra.mxu1 %vm337_vm0, %v5224_v24 }
  0xe8   : > { %6080 = vmatprep.mubr.msk.f32.mxu1 %vm337_vm0, %v5225_v28  ;;  %v7162_v43 = vpop.f32.mrf.mxu1 }
  0xe9   : > { %v7155_v39 = vpop.f32.mrf.mxu0  ;;  %5928 = vmatmul.mubr.msk.f32.gmra.mxu0 %vm337_vm0, %v6716_v56 }
  0xea   : > { %5930 = vmatprep.mubr.msk.f32.mxu0 %vm337_vm0, %v6724_v58  ;;  %v7167_v48 = vpop.f32.mrf.mxu1 }
  0xeb   : > { %v7164_v45 = vpop.f32.mrf.mxu0  ;;  %6081 = vmatmul.mubr.msk.f32.gmra.mxu1 %vm337_vm0, %v5226_v36 }
  0xec   : > { %6083 = vmatprep.mubr.msk.f32.mxu1 %vm337_vm0, %v5227_v40  ;;  %v7178_v56 = vpop.f32.mrf.mxu1 }
  0xed   : > { %v7171_v52 = vpop.f32.mrf.mxu0  ;;  %5931 = vmatmul.mubr.msk.f32.gmra.mxu0 %vm337_vm0, %v6736_v60  ;;  %v5231_v60 = vld [vmem:[%s6471_s11 + $0x169] sm:$0xff] }
  0xee   : > { %5933 = vmatprep.mubr.msk.f32.mxu0 %vm337_vm0, %v6744_v62  ;;  %v7183_v41 = vpop.f32.mrf.mxu1 }
  0xef   : > { %v7180_v58 = vpop.f32.mrf.mxu0  ;;  %6084 = vmatmul.mubr.msk.f32.gmra.mxu1 %vm337_vm0, %v5228_v50  ;;  %v5235_v50 = vld [vmem:[%s6471_s11 + $0x199] sm:$0xff] }
  0xf0   : > { %6086 = vmatprep.mubr.msk.f32.mxu1 %vm337_vm0, %v5229_v54  ;;  %v5776_v62 = vpop.f32.mrf.mxu1 }
  0xf1   : > { %v7187_v34 = vpop.f32.mrf.mxu0  ;;  %5934 = vmatmul.mubr.msk.f32.gmra.mxu0 %vm337_vm0, %v6756_v0  ;;  %v5038_v0 = vld [vmem:[%s6471_s11 + $0x189] sm:$0xff] }
  0xf2   : > { %5936 = vmatprep.mubr.msk.f32.mxu0 %vm337_vm0, %v6764_v2  ;;  %v7198_v46 = vpop.f32.mrf.mxu1 }
  0xf3   : > { %v7194_v33 = vpop.f32.mrf.mxu0  ;;  %6087 = vmatmul.mubr.msk.f32.gmra.mxu1 %vm337_vm0, %v5230_v37 }
  0xf4   : > { %6089 = vmatprep.mubr.msk.f32.mxu1 %vm337_vm0, %v5231_v60  ;;  %v5779_v2 = vpop.f32.mrf.mxu1  ;;  %v5303_v60 = vld [vmem:[%s8919_s1 + $0x80] sm:$0xff] }
  0xf5   : > { %v7202_v24 = vpop.f32.mrf.mxu0  ;;  %5937 = vmatmul.mubr.msk.f32.gmra.mxu0 %vm337_vm0, %v6776_v4 }
  0xf6   : > { %5939 = vmatprep.mubr.msk.f32.mxu0 %vm337_vm0, %v5037_v6  ;;  %v7211_v36 = vpop.f32.mrf.mxu1 }
  0xf7   : > { %v7208_v28 = vpop.f32.mrf.mxu0  ;;  %6090 = vmatmul.mubr.msk.f32.gmra.mxu1 %vm337_vm0, %v5232_v16 }
  0xf8   : > { %6092 = vmatprep.mubr.msk.f32.mxu1 %vm337_vm0, %v5037_v6  ;;  %v5782_v4 = vpop.f32.mrf.mxu1  ;;  %v5236_v6 = vld [vmem:[%s6471_s11 + $0x1a1] sm:$0xff] }
  0xf9   : > { %v7214_v40 = vpop.f32.mrf.mxu0  ;;  %5940 = vmatmul.mubr.msk.f32.gmra.mxu0 %vm337_vm0, %v5038_v0 }
  0xfa   : > { %5998 = vmatprep.mubr.msk.f32.mxu0 %vm337_vm0, %v6679_v49  ;;  %v7223_v37 = vpop.f32.mrf.mxu1 }
  0xfb   : > { %v7220_v54 = vpop.f32.mrf.mxu0  ;;  %6093 = vmatmul.mubr.msk.f32.gmra.mxu1 %vm337_vm0, %v5038_v0  ;;  %8947 = vst [vmem:[#allocation15_spill] sm:$0xff] %v7223_v37 }
  0xfc   : > { %6095 = vmatprep.mubr.msk.f32.mxu1 %vm337_vm0, %v5235_v50  ;;  %v5785_v0 = vpop.f32.mrf.mxu1 }
  0xfd   : > { %v5712_v16 = vpop.f32.mrf.mxu0  ;;  %5999 = vmatmul.mubr.msk.f32.vlgmr.msra.gmra.mxu0 %vm337_vm0, %v6691_v51 }
  0xfe   : > { %v7233_v49 = vadd.f32 %v7129_v19, %v5712_v16  ;;  %6099 = vmatpush3.msra.mxu0 %v7047_v7  ;;  %6001 = vmatprep.mubr.msk.f32.mxu0 %vm337_vm0, %v6699_v53  ;;  %v7241_v50 = vpop.f32.mrf.mxu1 }
  0xff   : > { %v7238_v37 = vpop.f32.mrf.mxu0  ;;  %6100 = vmatprep.subr.mxu0 %v5303_v60  ;;  %6096 = vmatmul.mubr.msk.f32.gmra.mxu1 %vm337_vm0, %v5236_v6  ;;  %8948 = vst [vmem:[#allocation16_spill] sm:$0xff] %v7241_v50 }
 0x100   : > { %6101 = vmatpush3.msra.mxu0 %v5303_v60  ;;  %v7250_v53 = vpop.f32.mrf.mxu1 }
 0x101   : > { %v5715_v11 = vpop.f32.mrf.mxu0  ;;  %6002 = vmatmul.mubr.msk.f32.gmra.mxu0 %vm337_vm0, %v6711_v55 }
 0x102   : > { %v7246_v51 = vadd.f32 %v7146_v31, %v5715_v11  ;;  %6004 = vmatprep.mubr.msk.f32.mxu0 %vm337_vm0, %v6719_v57  ;;  %v7254_v19 = vpop.f32.mrf.mxu1 }
 0x103   : > { %v7252_v7 = vpop.f32.mrf.mxu0  ;;  %8949 = vst [vmem:[#allocation17_spill] sm:$0xff] %v7254_v19 }
 0x105   : > { %v5718_v6 = vpop.f32.mrf.mxu0  ;;  %6005 = vmatmul.mubr.msk.f32.gmra.mxu0 %vm337_vm0, %v6731_v59  ;;  %v7263_v55 = vpop.f32.mrf.mxu1 }
 0x106   : > { %v7259_v60 = vadd.f32 %v7162_v43, %v5718_v6  ;;  %6007 = vmatprep.mubr.msk.f32.mxu0 %vm337_vm0, %v6739_v61 }
 0x107   : > { %v7265_v11 = vpop.f32.mrf.mxu0  ;;  %v7267_v57 = vpop.f32.mrf.mxu1 }
 0x108   : > { %8950 = vst [vmem:[#allocation18_spill] sm:$0xff] %v7267_v57 }
 0x109   : > { %v5721_v31 = vpop.f32.mrf.mxu0  ;;  %6008 = vmatmul.mubr.msk.f32.gmra.mxu0 %vm337_vm0, %v6751_v63  ;;  %v7276_v59 = vpop.f32.mrf.mxu1 }
 0x10a   : > { %v7272_v16 = vadd.f32 %v7178_v56, %v5721_v31  ;;  %6010 = vmatprep.mubr.msk.f32.mxu0 %vm337_vm0, %v6759_v1 }
 0x10b   : > { %v7278_v43 = vpop.f32.mrf.mxu0  ;;  %v7280_v61 = vpop.f32.mrf.mxu1 }
 0x10c   : > { %8951 = vst [vmem:[#allocation19_spill] sm:$0xff] %v7280_v61 }
 0x10d   : > { %v5724_v6 = vpop.f32.mrf.mxu0  ;;  %6011 = vmatmul.mubr.msk.f32.gmra.mxu0 %vm337_vm0, %v6771_v3  ;;  %v7288_v63 = vpop.f32.mrf.mxu1 }
 0x10e   : > { %v7284_v57 = vadd.f32 %v5776_v62, %v5724_v6  ;;  %6013 = vmatprep.mubr.msk.f32.mxu0 %vm337_vm0, %v6779_v5 }
 0x10f   : > { %v7290_v56 = vpop.f32.mrf.mxu0  ;;  %v7292_v1 = vpop.f32.mrf.mxu1 }
 0x110   : > { %8952 = vst [vmem:[#allocation20_spill] sm:$0xff] %v7292_v1 }
 0x111   : > { %v5727_v31 = vpop.f32.mrf.mxu0  ;;  %6014 = vmatmul.mubr.msk.f32.gmra.mxu0 %vm337_vm0, %v6789_v15  ;;  %v7300_v3 = vpop.f32.mrf.mxu1 }
 0x112   : > { %v7296_v61 = vadd.f32 %v5779_v2, %v5727_v31  ;;  %6016 = vmatprep.mubr.msk.f32.mxu0 %vm337_vm0, %v6489_v10 }
 0x113   : > { %v7302_v62 = vpop.f32.mrf.mxu0  ;;  %v7304_v5 = vpop.f32.mrf.mxu1 }
 0x114   : > { %8953 = vst [vmem:[#allocation21_spill] sm:$0xff] %v7304_v5 }
 0x115   : > { %v5730_v6 = vpop.f32.mrf.mxu0  ;;  %6017 = vmatmul.mubr.msk.f32.gmra.mxu0 %vm337_vm0, %v6501_v12  ;;  %v7312_v15 = vpop.f32.mrf.mxu1 }
 0x116   : > { %v7308_v1 = vadd.f32 %v5782_v4, %v5730_v6  ;;  %6019 = vmatprep.mubr.msk.f32.mxu0 %vm337_vm0, %v6511_v14 }
 0x117   : > { %v7314_v2 = vpop.f32.mrf.mxu0  ;;  %v7316_v10 = vpop.f32.mrf.mxu1 }
 0x118   : > { %8954 = vst [vmem:[#allocation22_spill] sm:$0xff] %v7316_v10 }
 0x119   : > { %v5733_v31 = vpop.f32.mrf.mxu0  ;;  %6020 = vmatmul.mubr.msk.f32.gmra.mxu0 %vm337_vm0, %v6522_v17  ;;  %v7324_v12 = vpop.f32.mrf.mxu1 }
 0x11a   : > { %v7320_v5 = vadd.f32 %v5785_v0, %v5733_v31  ;;  %6022 = vmatprep.mubr.msk.f32.mxu0 %vm337_vm0, %v6526_v18 }
 0x11b   : > { %v7326_v4 = vpop.f32.mrf.mxu0  ;;  %v7328_v14 = vpop.f32.mrf.mxu1 }
 0x11c   : > { %8955 = vst [vmem:[#allocation23_spill] sm:$0xff] %v7320_v5  ;;  %8956 = vst [vmem:[#allocation24_spill] sm:$0xff] %v7328_v14 }
 0x11d   : > { %v5740_v6 = vpop.f32.mrf.mxu0  ;;  %6023 = vmatmul.mubr.msk.f32.gmra.mxu0 %vm337_vm0, %v6543_v21  ;;  %v7337_v0 = vpop.f32.mrf.mxu1 }
 0x11e   : > { %v7333_v10 = vadd.f32 %v5740_v6, %v7110_v8  ;;  %6025 = vmatprep.mubr.msk.f32.mxu0 %vm337_vm0, %v6546_v22  ;;  %v5161_v8 = vld [vmem:[%s6471_s11 + $0x138] sm:$0xff] }
 0x11f   : > { %v821_v17 = vpop.f32.mrf.mxu0  ;;  %v7344_v14 = vpop.f32.mrf.mxu1 }
 0x120   : > { %v7340_v18 = vadd.f32 %v821_v17, %v7116_v9  ;;  %8957 = vst [vmem:[#allocation25_spill] sm:$0xff] %v7344_v14  ;;  %v5163_v14 = vld [vmem:[%s6471_s11 + $0x150] sm:$0xff] }
 0x121   : > { %v5743_v31 = vpop.f32.mrf.mxu0  ;;  %6026 = vmatmul.mubr.msk.f32.gmra.mxu0 %vm337_vm0, %v6563_v25 }
 0x122   : > { %v7347_v21 = vadd.f32 %v5743_v31, %v7122_v13  ;;  %6028 = vmatprep.mubr.msk.f32.mxu0 %vm337_vm0, %v6566_v26  ;;  %v7352_v6 = vpop.f32.mrf.mxu1  ;;  %v5162_v26 = vld [vmem:[%s6471_s11 + $0x140] sm:$0xff] }
 0x123   : > { %v831_v22 = vpop.f32.mrf.mxu0 }
 0x124   : > { %v7355_v9 = vadd.f32 %v831_v22, %v7131_v20  ;;  %v7359_v25 = vpop.f32.mrf.mxu1 }
 0x125   : > { %v5746_v17 = vpop.f32.mrf.mxu0  ;;  %6029 = vmatmul.mubr.msk.f32.gmra.mxu0 %vm337_vm0, %v6583_v29  ;;  %8958 = vst [vmem:[#allocation26_spill] sm:$0xff] %v7359_v25 }
 0x126   : > { %v7362_v13 = vadd.f32 %v5746_v17, %v7139_v27  ;;  %6031 = vmatprep.mubr.msk.f32.mxu0 %vm337_vm0, %v5161_v8  ;;  %v7367_v19 = vpop.f32.mrf.mxu1  ;;  %v5164_v27 = vld [vmem:[%s6471_s11 + $0x158] sm:$0xff]  ;;  %v5165_v17 = vld [vmem:[%s6471_s11 + $0x168] sm:$0xff] }
 0x127   : > { %v841_v31 = vpop.f32.mrf.mxu0 }
 0x128   : > { %v7370_v20 = vadd.f32 %v841_v31, %v7148_v32  ;;  %v7373_v29 = vpop.f32.mrf.mxu1 }
 0x129   : > { %v5749_v22 = vpop.f32.mrf.mxu0  ;;  %6032 = vmatmul.mubr.msk.f32.gmra.mxu0 %vm337_vm0, %v5162_v26  ;;  %8959 = vst [vmem:[#allocation27_spill] sm:$0xff] %v7373_v29 }
 0x12a   : > { %v7376_v25 = vadd.f32 %v5749_v22, %v7155_v39  ;;  %6034 = vmatprep.mubr.msk.f32.mxu0 %vm337_vm0, %v5163_v14  ;;  %v7381_v5 = vpop.f32.mrf.mxu1  ;;  %v5166_v39 = vld [vmem:[%s6471_s11 + $0x170] sm:$0xff] }
 0x12b   : > { %v851_v8 = vpop.f32.mrf.mxu0 }
 0x12c   : > { %v7384_v50 = vadd.f32 %v851_v8, %v7164_v45  ;;  %v7387_v26 = vpop.f32.mrf.mxu1 }
 0x12d   : > { %v5752_v32 = vpop.f32.mrf.mxu0  ;;  %6035 = vmatmul.mubr.msk.f32.gmra.mxu0 %vm337_vm0, %v5164_v27  ;;  %8960 = vst [vmem:[#allocation28_spill] sm:$0xff] %v7387_v26 }
 0x12e   : > { %v7390_v31 = vadd.f32 %v5752_v32, %v7171_v52  ;;  %6037 = vmatprep.mubr.msk.f32.mxu0 %vm337_vm0, %v5165_v17  ;;  %v7394_v22 = vpop.f32.mrf.mxu1  ;;  %v5169_v17 = vld [vmem:[%s6471_s11 + $0x198] sm:$0xff] }
 0x12f   : > { %v861_v14 = vpop.f32.mrf.mxu0 }
 0x130   : > { %v7397_v29 = vadd.f32 %v861_v14, %v7180_v58  ;;  %v7400_v8 = vpop.f32.mrf.mxu1 }
 0x131   : > { %v5755_v45 = vpop.f32.mrf.mxu0  ;;  %6038 = vmatmul.mubr.msk.f32.gmra.mxu0 %vm337_vm0, %v5166_v39  ;;  %8961 = vst [vmem:[#allocation29_spill] sm:$0xff] %v7400_v8 }
 0x132   : > { %v7403_v27 = vadd.f32 %v5755_v45, %v7187_v34  ;;  %6040 = vmatprep.mubr.msk.f32.mxu0 %vm337_vm0, %v6863_v30  ;;  %v7408_v32 = vpop.f32.mrf.mxu1  ;;  %v5170_v34 = vld [vmem:[%s6471_s11 + $0x1a0] sm:$0xff] }
 0x133   : > { %v871_v52 = vpop.f32.mrf.mxu0 }
 0x134   : > { %v7411_v26 = vadd.f32 %v871_v52, %v7194_v33  ;;  %v7415_v39 = vpop.f32.mrf.mxu1 }
 0x135   : > { %v5758_v58 = vpop.f32.mrf.mxu0  ;;  %6041 = vmatmul.mubr.msk.f32.gmra.mxu0 %vm337_vm0, %v6879_v38  ;;  %8962 = vst [vmem:[#allocation30_spill] sm:$0xff] %v7415_v39 }
 0x136   : > { %v7418_v14 = vadd.f32 %v5758_v58, %v7202_v24  ;;  %6043 = vmatprep.mubr.msk.f32.mxu0 %vm337_vm0, %v5169_v17  ;;  %v7422_v45 = vpop.f32.mrf.mxu1 }
 0x137   : > { %v881_v30 = vpop.f32.mrf.mxu0 }
 0x138   : > { %v7425_v8 = vadd.f32 %v881_v30, %v7208_v28  ;;  %v7428_v52 = vpop.f32.mrf.mxu1  ;;  %v8965_v30 = vld [vmem:[#allocation5_spill] sm:$0xff] }
 0x139   : > { %v5761_v33 = vpop.f32.mrf.mxu0  ;;  %6044 = vmatmul.mubr.msk.f32.gmra.mxu0 %vm337_vm0, %v5170_v34  ;;  %8963 = vst [vmem:[#allocation31_spill] sm:$0xff] %v7428_v52  ;;  %v8966_v52 = vld [vmem:[#allocation6_spill] sm:$0xff] }
 0x13a   : > { %v7431_v38 = vadd.f32 %v5761_v33, %v7214_v40  ;;  %6102 = vmatprep.mubr.msk.f32.mxu0 %vm337_vm0, %v6890_v42  ;;  %v7435_v17 = vpop.f32.mrf.mxu1 }
 0x13b   : > { %v891_v24 = vpop.f32.mrf.mxu0 }
 0x13c   : > { %v7438_v58 = vadd.f32 %v891_v24, %v7220_v54  ;;  %v7442_v28 = vpop.f32.mrf.mxu1 }
 0x13d   : > { %v5792_v39 = vpop.f32.mrf.mxu0  ;;  %6103 = vmatmul.mubr.msk.f32.vlgmr.msra.gmra.mxu0 %vm337_vm0, %v6900_v47  ;;  %8964 = vst [vmem:[#allocation32_spill] sm:$0xff] %v7442_v28 }
 0x13e   : > { %v1337_v34 = vadd.f32 %v5792_v39, %v7333_v10  ;;  %6105 = vmatprep.mubr.msk.f32.mxu0 %vm337_vm0, %v8965_v30  ;;  %v8968_v39 = vld [vmem:[#allocation7_spill] sm:$0xff] }
 0x13f   : > { %v1177_v40 = vpop.f32.mrf.mxu0  ;;  %v7447_v33 = vpop.f32.mrf.mxu1 }
 0x140   : > { %v7450_v42 = vadd.f32 %v1177_v40, %v7340_v18  ;;  %v7453_v54 = vadd.f32 %v7250_v53, %v1337_v34  ;;  %v8969_v40 = vld [vmem:[#allocation8_spill] sm:$0xff] }
 0x141   : > { %v5795_v24 = vpop.f32.mrf.mxu0  ;;  %6106 = vmatmul.mubr.msk.f32.gmra.mxu0 %vm337_vm0, %v8966_v52  ;;  %v7457_v47 = vpop.f32.mrf.mxu1 }
 0x142   : > { %8967 = vst [vmem:[#allocation5_spill] sm:$0xff] %v7457_v47  ;;  %v1339_v10 = vadd.f32 %v5795_v24, %v7347_v21  ;;  %6108 = vmatprep.mubr.msk.f32.mxu0 %vm337_vm0, %v8968_v39  ;;  %v8971_v24 = vld [vmem:[#allocation9_spill] sm:$0xff]  ;;  %v3776_v39 = vld [vmem:[%s8921_s3 + $0x18] sm:$0xff]  ;;  %v8974_v47 = vld [vmem:[#allocation11_spill] sm:$0xff] }
 0x143   : > { %v1187_v30 = vpop.f32.mrf.mxu0  ;;  %v7462_v28 = vpop.f32.mrf.mxu1  ;;  %3913 = vmatprep.subr.mxu1 %v3776_v39 }
 0x144   : > { %v7465_v18 = vadd.f32 %v1187_v30, %v7355_v9  ;;  %v7468_v53 = vadd.f32 %v7263_v55, %v1339_v10  ;;  %v3775_v55 = vld [vmem:[%s8921_s3 + $0x10] sm:$0xff] }
 0x145   : > { %v5798_v34 = vpop.f32.mrf.mxu0  ;;  %6109 = vmatmul.mubr.msk.f32.gmra.mxu0 %vm337_vm0, %v8969_v40  ;;  %v7472_v52 = vpop.f32.mrf.mxu1  ;;  %3914 = vmatpush1.msra.mxu1 %v3775_v55  ;;  %v8972_v40 = vld [vmem:[#allocation10_spill] sm:$0xff]  ;;  %v8976_v55 = vld [vmem:[#allocation12_spill] sm:$0xff] }
 0x146   : > { %8970 = vst [vmem:[#allocation6_spill] sm:$0xff] %v7472_v52  ;;  %v1341_v21 = vadd.f32 %v5798_v34, %v7362_v13  ;;  %6111 = vmatprep.mubr.msk.f32.mxu0 %vm337_vm0, %v8971_v24 }
 0x147   : > { %v1197_v9 = vpop.f32.mrf.mxu0  ;;  %v7483_v10 = vpop.f32.mrf.mxu1 }
 0x148   : > { %v7486_v30 = vadd.f32 %v1197_v9, %v7370_v20  ;;  %v7489_v13 = vadd.f32 %v7276_v59, %v1341_v21 }
 0x149   : > { %v5801_v34 = vpop.f32.mrf.mxu0  ;;  %6112 = vmatmul.mubr.msk.f32.gmra.mxu0 %vm337_vm0, %v8972_v40  ;;  %v7493_v24 = vpop.f32.mrf.mxu1 }
 0x14a   : > { %8973 = vst [vmem:[#allocation7_spill] sm:$0xff] %v7493_v24  ;;  %v1343_v52 = vadd.f32 %v5801_v34, %v7376_v25  ;;  %6114 = vmatprep.mubr.msk.f32.mxu0 %vm337_vm0, %v8974_v47  ;;  %v8977_v34 = vld [vmem:[#allocation13_spill] sm:$0xff]  ;;  %v5282_v47 = vld [vmem:[%s6471_s11 + $0xb2] sm:$0xff] }
 0x14b   : > { %v1207_v39 = vpop.f32.mrf.mxu0  ;;  %v7498_v20 = vpop.f32.mrf.mxu1  ;;  %v5283_v24 = vld [vmem:[%s6471_s11 + $0xc2] sm:$0xff] }
 0x14c   : > { %8975 = vst [vmem:[#allocation8_spill] sm:$0xff] %v7498_v20  ;;  %v7501_v9 = vadd.f32 %v1207_v39, %v7384_v50  ;;  %v7504_v59 = vadd.f32 %v7288_v63, %v1343_v52  ;;  %v5284_v39 = vld [vmem:[%s6471_s11 + $0xca] sm:$0xff] }
 0x14d   : > { %v5804_v21 = vpop.f32.mrf.mxu0  ;;  %6115 = vmatmul.mubr.msk.f32.gmra.mxu0 %vm337_vm0, %v8976_v55  ;;  %v7513_v20 = vpop.f32.mrf.mxu1  ;;  %v5285_v55 = vld [vmem:[%s6471_s11 + $0xda] sm:$0xff] }
 0x14e   : > { %v1345_v25 = vadd.f32 %v5804_v21, %v7390_v31  ;;  %6117 = vmatprep.mubr.msk.f32.mxu0 %vm337_vm0, %v8977_v34 }
 0x14f   : > { %v1217_v40 = vpop.f32.mrf.mxu0  ;;  %v7526_v34 = vpop.f32.mrf.mxu1 }
 0x150   : > { %v7516_v50 = vadd.f32 %v1217_v40, %v7397_v29  ;;  %v7519_v63 = vadd.f32 %v7300_v3, %v1345_v25  ;;  %v5287_v40 = vld [vmem:[%s6471_s11 + $0xf2] sm:$0xff] }
 0x151   : > { %v5807_v52 = vpop.f32.mrf.mxu0  ;;  %6118 = vmatmul.mubr.msk.f32.gmra.mxu0 %vm337_vm0, %v5282_v47 }
 0x152   : > { %v1347_v31 = vadd.f32 %v5807_v52, %v7403_v27  ;;  %6120 = vmatprep.mubr.msk.f32.mxu0 %vm337_vm0, %v5283_v24  ;;  %v5286_v24 = vld [vmem:[%s6471_s11 + $0xe2] sm:$0xff]  ;;  %v7539_v52 = vpop.f32.mrf.mxu1 }
 0x153   : > { %v1227_v21 = vpop.f32.mrf.mxu0 }
 0x154   : > { %v7529_v29 = vadd.f32 %v1227_v21, %v7411_v26  ;;  %v7532_v3 = vadd.f32 %v7312_v15, %v1347_v31  ;;  %v5288_v31 = vld [vmem:[%s6471_s11 + $0xfa] sm:$0xff] }
 0x155   : > { %v5810_v25 = vpop.f32.mrf.mxu0  ;;  %6121 = vmatmul.mubr.msk.f32.gmra.mxu0 %vm337_vm0, %v5284_v39 }
 0x156   : > { %v1349_v27 = vadd.f32 %v5810_v25, %v7418_v14  ;;  %6123 = vmatprep.mubr.msk.f32.mxu0 %vm337_vm0, %v5285_v55  ;;  %v5289_v55 = vld [vmem:[%s6471_s11 + $0x10a] sm:$0xff]  ;;  %v7552_v25 = vpop.f32.mrf.mxu1 }
 0x157   : > { %v1237_v47 = vpop.f32.mrf.mxu0 }
 0x158   : > { %v7542_v26 = vadd.f32 %v1237_v47, %v7425_v8  ;;  %v7545_v21 = vadd.f32 %v7324_v12, %v1349_v27  ;;  %v5290_v47 = vld [vmem:[%s6471_s11 + $0x112] sm:$0xff] }
 0x159   : > { %v5813_v15 = vpop.f32.mrf.mxu0  ;;  %6124 = vmatmul.mubr.msk.f32.gmra.mxu0 %vm337_vm0, %v5286_v24 }
 0x15a   : > { %v1351_v14 = vadd.f32 %v5813_v15, %v7431_v38  ;;  %6126 = vmatprep.mubr.msk.f32.mxu0 %vm337_vm0, %v5287_v40  ;;  %v902_v38 = vadd.f32 %v7135_v23, %v7238_v37  ;;  %v5291_v15 = vld [vmem:[%s6471_s11 + $0x122] sm:$0xff]  ;;  %v912_v23 = vadd.f32 %v7151_v35, %v7252_v7  ;;  %v922_v35 = vadd.f32 %v7167_v48, %v7265_v11 }
 0x15b   : > { %v1247_v39 = vpop.f32.mrf.mxu0  ;;  %v5294_v7 = vld [vmem:[%s6471_s11 + $0x142] sm:$0xff] }
 0x15c   : > { %v7555_v8 = vadd.f32 %v1247_v39, %v7438_v58  ;;  %v7558_v12 = vadd.f32 %v7337_v0, %v1351_v14  ;;  %v7567_v58 = vpop.f32.mrf.mxu1 }
 0x15d   : > { %v5816_v27 = vpop.f32.mrf.mxu0  ;;  %6127 = vmatmul.mubr.msk.f32.gmra.mxu0 %vm337_vm0, %v5288_v31 }
 0x15e   : > { %v1353_v24 = vadd.f32 %v5816_v27, %v7233_v49  ;;  %6129 = vmatprep.mubr.msk.f32.mxu0 %vm337_vm0, %v5289_v55  ;;  %v5292_v49 = vld [vmem:[%s6471_s11 + $0x12a] sm:$0xff]  ;;  %v5293_v55 = vld [vmem:[%s6471_s11 + $0x13a] sm:$0xff]  ;;  %v7581_v27 = vpop.f32.mrf.mxu1 }
 0x15f   : > { %v1257_v40 = vpop.f32.mrf.mxu0 }
 0x160   : > { %v7569_v39 = vadd.f32 %v1257_v40, %v902_v38  ;;  %v7572_v0 = vadd.f32 %v7352_v6, %v1353_v24 }
 0x161   : > { %v5819_v14 = vpop.f32.mrf.mxu0  ;;  %6130 = vmatmul.mubr.msk.f32.gmra.mxu0 %vm337_vm0, %v5290_v47  ;;  %v3774_v47 = vld [vmem:[%s8921_s3 + $0x8] sm:$0xff] }
 0x162   : > { %v1355_v37 = vadd.f32 %v5819_v14, %v7246_v51  ;;  %6132 = vmatprep.mubr.msk.f32.mxu0 %vm337_vm0, %v5291_v15  ;;  %v5295_v15 = vld [vmem:[%s6471_s11 + $0x152] sm:$0xff]  ;;  %v7601_v14 = vpop.f32.mrf.mxu1  ;;  %3915 = vmatprep.subr.mxu1 %v3774_v47 }
 0x163   : > { %v1267_v31 = vpop.f32.mrf.mxu0 }
 0x164   : > { %v7583_v38 = vadd.f32 %v1267_v31, %v912_v23  ;;  %v7586_v6 = vadd.f32 %v7367_v19, %v1355_v37  ;;  %v3773_v19 = vld [vmem:[%s8921_s3] sm:$0xff]  ;;  %v932_v23 = vadd.f32 %v7183_v41, %v7278_v43  ;;  %v942_v41 = vadd.f32 %v7198_v46, %v7290_v56  ;;  %v5298_v43 = vld [vmem:[%s6471_s11 + $0x172] sm:$0xff] }
 0x165   : > { %v5822_v24 = vpop.f32.mrf.mxu0  ;;  %6133 = vmatmul.mubr.msk.f32.gmra.mxu0 %vm337_vm0, %v5292_v49  ;;  %3916 = vmatpush1.msra.mxu1 %v3773_v19  ;;  %v5296_v49 = vld [vmem:[%s6471_s11 + $0x15a] sm:$0xff]  ;;  %v952_v46 = vadd.f32 %v7211_v36, %v7302_v62  ;;  %v8979_v36 = vld [vmem:[#allocation15_spill] sm:$0xff] }
 0x166   : > { %v1357_v51 = vadd.f32 %v5822_v24, %v7259_v60  ;;  %6135 = vmatprep.mubr.msk.f32.mxu0 %vm337_vm0, %v5293_v55  ;;  %v5297_v55 = vld [vmem:[%s6471_s11 + $0x16a] sm:$0xff]  ;;  %v7615_v24 = vpop.f32.mrf.mxu1  ;;  %v962_v62 = vadd.f32 %v8979_v36, %v7314_v2 }
 0x167   : > { %v1277_v40 = vpop.f32.mrf.mxu0  ;;  %v8981_v2 = vld [vmem:[#allocation23_spill] sm:$0xff] }
 0x168   : > { %v7603_v48 = vadd.f32 %v1277_v40, %v922_v35  ;;  %v7606_v60 = vadd.f32 %v7381_v5, %v1357_v51  ;;  %v7628_v47 = vpop.f32.mrf.mxu1 }
 0x169   : > { %v5825_v11 = vpop.f32.mrf.mxu0  ;;  %6136 = vmatmul.mubr.msk.f32.gmra.mxu0 %vm337_vm0, %v5294_v7 }
 0x16a   : > { %v1359_v37 = vadd.f32 %v5825_v11, %v7272_v16  ;;  %6138 = vmatprep.mubr.msk.f32.mxu0 %vm337_vm0, %v5295_v15  ;;  %v5301_v15 = vld [vmem:[%s6471_s11 + $0x19a] sm:$0xff]  ;;  %v7642_v11 = vpop.f32.mrf.mxu1 }
 0x16b   : > { %v1287_v31 = vpop.f32.mrf.mxu0 }
 0x16c   : > { %v7617_v35 = vadd.f32 %v1287_v31, %v932_v23  ;;  %v7620_v5 = vadd.f32 %v7394_v22, %v1359_v37 }
 0x16d   : > { %v5828_v51 = vpop.f32.mrf.mxu0  ;;  %6139 = vmatmul.mubr.msk.f32.gmra.mxu0 %vm337_vm0, %v5296_v49  ;;  %v8978_v49 = vld [vmem:[#allocation14_spill] sm:$0xff] }
 0x16e   : > { %v1361_v16 = vadd.f32 %v5828_v51, %v7284_v57  ;;  %6141 = vmatprep.mubr.msk.f32.mxu0 %vm337_vm0, %v5297_v55  ;;  %v7656_v55 = vpop.f32.mrf.mxu1 }
 0x16f   : > { %v1297_v7 = vpop.f32.mrf.mxu0 }
 0x170   : > { %v7630_v19 = vadd.f32 %v1297_v7, %v942_v41  ;;  %v7633_v22 = vadd.f32 %v7408_v32, %v1361_v16  ;;  %v8980_v16 = vld [vmem:[#allocation16_spill] sm:$0xff] }
 0x171   : > { %v5831_v40 = vpop.f32.mrf.mxu0  ;;  %6142 = vmatmul.mubr.msk.f32.gmra.mxu0 %vm337_vm0, %v5298_v43  ;;  %v972_v43 = vadd.f32 %v8980_v16, %v7326_v4 }
 0x172   : > { %v1363_v57 = vadd.f32 %v5831_v40, %v7296_v61  ;;  %6144 = vmatprep.mubr.msk.f32.mxu0 %vm337_vm0, %v7026_v44  ;;  %v5302_v44 = vld [vmem:[%s6471_s11 + $0x1a2] sm:$0xff]  ;;  %v7667_v40 = vpop.f32.mrf.mxu1  ;;  %s6278_s11 = scalar_lea.vmem %s8866_s16, 4096 }
 0x173   : > { %v1307_v56 = vpop.f32.mrf.mxu0  ;;  %p6279_p12 = scmp.ne.s32.totalorder %s8866_s16, %s6278_s11  ;;  %p6286_p2 = scmp.lt.s32.totalorder %s6284_s28, %s6278_s11 }
 0x174   : > { %v7644_v23 = vadd.f32 %v1307_v56, %v952_v46  ;;  %v7647_v32 = vadd.f32 %v7422_v45, %v1363_v57  ;;  %v7677_v36 = vpop.f32.mrf.mxu1 }
 0x175   : > { %v5834_v37 = vpop.f32.mrf.mxu0  ;;  %6145 = vmatmul.mubr.msk.f32.gmra.mxu0 %vm337_vm0, %v8978_v49  ;;  %p6280_p13 = pnand %p6279_p12, %p6436_p4  ;;  %p6287_p3 = por %p6286_p2, %p6285_p1 }
 0x176   : > { %v1365_v61 = vadd.f32 %v5834_v37, %v7308_v1  ;;  %6147 = vmatprep.mubr.msk.f32.mxu0 %vm337_vm0, %v5301_v15  ;;  %v5975_v16 = vpop.f32.mrf.mxu1 }
 0x177   : > { %v1317_v31 = vpop.f32.mrf.mxu0  ;;  %p6281_p0 = pneg %p6280_p13 }
 0x178   : > { %v7658_v51 = vadd.f32 %v1317_v31, %v962_v62  ;;  %v7661_v45 = vadd.f32 %v7435_v17, %v1365_v61  ;;  %v8982_v17 = vld [vmem:[#allocation17_spill] sm:$0xff] }
 0x179   : > { %v5837_v41 = vpop.f32.mrf.mxu0  ;;  %6148 = vmatmul.mubr.msk.f32.gmra.mxu0 %vm337_vm0, %v5302_v44  ;;  %v1727_v15 = vadd.f32 %v8982_v17, %v7450_v42  ;;  %v8983_v44 = vld [vmem:[#allocation18_spill] sm:$0xff]  ;;  %p6288_p5 = pnand %p6287_p3, %p6281_p0 }
 0x17a   : > { %v1367_v7 = vadd.f32 %v5837_v41, %v8981_v2  ;;  %v1729_v31 = vadd.f32 %v8983_v44, %v7465_v18  ;;  %v6356_v2 = vmov 0.0   ;;  %v2434_v18 = vpop.f32.mrf.mxu1 }
 0x17b   : > { %v1327_v1 = vpop.f32.mrf.mxu0  ;;  %3949 = vmatprep.mubr.f32.mxu1 %v6356_v2 }
 0x17c   : > { %v7669_v46 = vadd.f32 %v1327_v1, %v972_v43  ;;  %v7672_v57 = vadd.f32 %v7447_v33, %v1367_v7 }
 0x17d   : > { %v5896_v56 = vpop.f32.mrf.mxu0 }
 0x17e   : > { %v2116_v37 = vadd.f32 %v5896_v56, %v7453_v54 }
 0x17f   : > { %v1956_v49 = vpop.f32.mrf.mxu0 }
 0x180   : > { %v7679_v4 = vadd.f32 %v1956_v49, %v1727_v15  ;;  %v7682_v62 = vadd.f32 %v7462_v28, %v2116_v37  ;;  %v8984_v28 = vld [vmem:[#allocation19_spill] sm:$0xff] }
 0x181   : > { %v5899_v61 = vpop.f32.mrf.mxu0  ;;  %v1731_v7 = vadd.f32 %v8984_v28, %v7486_v30 }
 0x182   : > { %v2118_v33 = vadd.f32 %v5899_v61, %v7468_v53  ;;  %v8985_v53 = vld [vmem:[#allocation8_spill] sm:$0xff] }
 0x183   : > { %v1966_v41 = vpop.f32.mrf.mxu0 }
 0x184   : > { %v7687_v43 = vadd.f32 %v1966_v41, %v1729_v31  ;;  %v7690_v42 = vadd.f32 %v7483_v10, %v2118_v33  ;;  %v8986_v10 = vld [vmem:[#allocation20_spill] sm:$0xff]  ;;  %v5978_v31 = vpop.f32.mrf.mxu1  ;;  %v8987_v41 = vld [vmem:[#allocation21_spill] sm:$0xff] }
 0x185   : > { %v5902_v54 = vpop.f32.mrf.mxu0  ;;  %v1733_v49 = vadd.f32 %v8986_v10, %v7501_v9 }
 0x186   : > { %v2120_v1 = vadd.f32 %v5902_v54, %v7489_v13  ;;  %v1735_v54 = vadd.f32 %v8987_v41, %v7516_v50 }
 0x187   : > { %v1976_v56 = vpop.f32.mrf.mxu0 }
 0x188   : > { %v7696_v17 = vadd.f32 %v1976_v56, %v1731_v7  ;;  %v7699_v15 = vadd.f32 %v8985_v53, %v2120_v1  ;;  %v2444_v1 = vpop.f32.mrf.mxu1  ;;  %v8988_v53 = vld [vmem:[#allocation22_spill] sm:$0xff] }
 0x189   : > { %v5905_v37 = vpop.f32.mrf.mxu0 }
 0x18a   : > { %v2122_v61 = vadd.f32 %v5905_v37, %v7504_v59  ;;  %v1737_v37 = vadd.f32 %v8988_v53, %v7529_v29 }
 0x18b   : > { %v1986_v44 = vpop.f32.mrf.mxu0 }
 0x18c   : > { %v7704_v33 = vadd.f32 %v1986_v44, %v1733_v49  ;;  %v7707_v30 = vadd.f32 %v7526_v34, %v2122_v61  ;;  %v5981_v49 = vpop.f32.mrf.mxu1  ;;  %v8989_v44 = vld [vmem:[#allocation24_spill] sm:$0xff] }
 0x18d   : > { %v5908_v13 = vpop.f32.mrf.mxu0 }
 0x18e   : > { %v2124_v28 = vadd.f32 %v5908_v13, %v7519_v63  ;;  %v1739_v13 = vadd.f32 %v8989_v44, %v7542_v26 }
 0x18f   : > { %v1996_v7 = vpop.f32.mrf.mxu0 }
 0x190   : > { %v7712_v56 = vadd.f32 %v1996_v7, %v1735_v54  ;;  %v7715_v9 = vadd.f32 %v7552_v25, %v2124_v28  ;;  %v2454_v54 = vpop.f32.mrf.mxu1  ;;  %v8990_v7 = vld [vmem:[#allocation25_spill] sm:$0xff] }
 0x191   : > { %v5911_v59 = vpop.f32.mrf.mxu0 }
 0x192   : > { %v2126_v34 = vadd.f32 %v5911_v59, %v7532_v3  ;;  %v1741_v59 = vadd.f32 %v8990_v7, %v7555_v8 }
 0x193   : > { %v2006_v10 = vpop.f32.mrf.mxu0 }
 0x194   : > { %v7720_v61 = vadd.f32 %v2006_v10, %v1737_v37  ;;  %v7723_v50 = vadd.f32 %v7581_v27, %v2126_v34  ;;  %v5984_v37 = vpop.f32.mrf.mxu1  ;;  %v8991_v10 = vld [vmem:[#allocation26_spill] sm:$0xff] }
 0x195   : > { %v5914_v63 = vpop.f32.mrf.mxu0 }
 0x196   : > { %v2128_v25 = vadd.f32 %v5914_v63, %v7545_v21  ;;  %v1743_v63 = vadd.f32 %v8991_v10, %v7569_v39 }
 0x197   : > { %v2016_v41 = vpop.f32.mrf.mxu0 }
 0x198   : > { %v7728_v28 = vadd.f32 %v2016_v41, %v1739_v13  ;;  %v7731_v29 = vadd.f32 %v7615_v24, %v2128_v25  ;;  %v2464_v13 = vpop.f32.mrf.mxu1  ;;  %v8992_v41 = vld [vmem:[#allocation27_spill] sm:$0xff] }
 0x199   : > { %v5917_v3 = vpop.f32.mrf.mxu0 }
 0x19a   : > { %v2130_v27 = vadd.f32 %v5917_v3, %v7558_v12  ;;  %v1745_v3 = vadd.f32 %v8992_v41, %v7583_v38 }
 0x19b   : > { %v2026_v53 = vpop.f32.mrf.mxu0 }
 0x19c   : > { %v7736_v34 = vadd.f32 %v2026_v53, %v1741_v59  ;;  %v7739_v26 = vadd.f32 %v7642_v11, %v2130_v27  ;;  %v5987_v27 = vpop.f32.mrf.mxu1 }
 0x19d   : > { %v5920_v21 = vpop.f32.mrf.mxu0 }
 0x19e   : > { %v2132_v24 = vadd.f32 %v5920_v21, %v7572_v0  ;;  %v8993_v21 = vld [vmem:[#allocation28_spill] sm:$0xff]  ;;  %v2474_v38 = vpop.f32.mrf.mxu1 }
 0x19f   : > { %v2036_v44 = vpop.f32.mrf.mxu0  ;;  %v1747_v10 = vadd.f32 %v8993_v21, %v7603_v48 }
 0x1a0   : > { %v2131_v25 = vadd.f32 %v2036_v44, %v1743_v63  ;;  %v7745_v8 = vadd.f32 %v7667_v40, %v2132_v24 }
 0x1a1   : > { %v5923_v12 = vpop.f32.mrf.mxu0 }
 0x1a2   : > { %v2134_v7 = vadd.f32 %v5923_v12, %v7586_v6  ;;  %v7751_v11 = vadd.f32 %v7677_v36, %v2131_v25  ;;  %v8994_v25 = vld [vmem:[#allocation29_spill] sm:$0xff] }
 0x1a3   : > { %v2046_v59 = vpop.f32.mrf.mxu0  ;;  %v1749_v12 = vadd.f32 %v8994_v25, %v7617_v35 }
 0x1a4   : > { %v2133_v39 = vadd.f32 %v2046_v59, %v1745_v3  ;;  %v7753_v53 = vadd.f32 %v5975_v16, %v2134_v7  ;;  %v5990_v7 = vpop.f32.mrf.mxu1 }
 0x1a5   : > { %v5926_v0 = vpop.f32.mrf.mxu0 }
 0x1a6   : > { %v2136_v40 = vadd.f32 %v5926_v0, %v7606_v60  ;;  %v7758_v63 = vadd.f32 %v2434_v18, %v2133_v39  ;;  %v8995_v18 = vld [vmem:[#allocation30_spill] sm:$0xff] }
 0x1a7   : > { %v2056_v24 = vpop.f32.mrf.mxu0  ;;  %v1751_v39 = vadd.f32 %v8995_v18, %v7630_v19 }
 0x1a8   : > { %v2135_v44 = vadd.f32 %v2056_v24, %v1747_v10  ;;  %v7760_v6 = vadd.f32 %v5978_v31, %v2136_v40  ;;  %v2484_v10 = vpop.f32.mrf.mxu1 }
 0x1a9   : > { %v5929_v36 = vpop.f32.mrf.mxu0 }
 0x1aa   : > { %v2138_v16 = vadd.f32 %v5929_v36, %v7620_v5  ;;  %v7765_v41 = vadd.f32 %v2444_v1, %v2135_v44  ;;  %v8996_v1 = vld [vmem:[#allocation31_spill] sm:$0xff]  ;;  %v5993_v25 = vpop.f32.mrf.mxu1 }
 0x1ab   : > { %v2066_v3 = vpop.f32.mrf.mxu0  ;;  %v1753_v24 = vadd.f32 %v8996_v1, %v7644_v23 }
 0x1ac   : > { %v2137_v48 = vadd.f32 %v2066_v3, %v1749_v12  ;;  %v7767_v59 = vadd.f32 %v5981_v49, %v2138_v16 }
 0x1ad   : > { %v5932_v60 = vpop.f32.mrf.mxu0 }
 0x1ae   : > { %v2140_v31 = vadd.f32 %v5932_v60, %v7633_v22  ;;  %v7772_v0 = vadd.f32 %v2454_v54, %v2137_v48  ;;  %v8997_v54 = vld [vmem:[#allocation32_spill] sm:$0xff]  ;;  %v2494_v60 = vpop.f32.mrf.mxu1 }
 0x1af   : > { %v2076_v21 = vpop.f32.mrf.mxu0  ;;  %v1755_v16 = vadd.f32 %v8997_v54, %v7658_v51 }
 0x1b0   : > { %v2139_v35 = vadd.f32 %v2076_v21, %v1751_v39  ;;  %v7774_v40 = vadd.f32 %v5984_v37, %v2140_v31 }
 0x1b1   : > { %v5935_v5 = vpop.f32.mrf.mxu0 }
 0x1b2   : > { %v2142_v49 = vadd.f32 %v5935_v5, %v7647_v32  ;;  %v7779_v44 = vadd.f32 %v2464_v13, %v2139_v35  ;;  %v8998_v13 = vld [vmem:[#allocation5_spill] sm:$0xff]  ;;  %v7795_v35 = vpop.f32.mrf.mxu1 }
 0x1b3   : > { %v2086_v36 = vpop.f32.mrf.mxu0  ;;  %v1757_v39 = vadd.f32 %v8998_v13, %v7669_v46 }
 0x1b4   : > { %v2141_v19 = vadd.f32 %v2086_v36, %v1753_v24  ;;  %v7781_v12 = vadd.f32 %v5987_v27, %v2142_v49  ;;  %v7806_v24 = vpop.f32.mrf.mxu1 }
 0x1b5   : > { %v5938_v22 = vpop.f32.mrf.mxu0 }
 0x1b6   : > { %v2144_v37 = vadd.f32 %v5938_v22, %v7661_v45  ;;  %v7786_v3 = vadd.f32 %v2474_v38, %v2141_v19 }
 0x1b7   : > { %v2096_v48 = vpop.f32.mrf.mxu0 }
 0x1b8   : > { %v2143_v23 = vadd.f32 %v2096_v48, %v1755_v16  ;;  %v7788_v18 = vadd.f32 %v5990_v7, %v2144_v37 }
 0x1b9   : > { %v5941_v32 = vpop.f32.mrf.mxu0 }
 0x1ba   : > { %v2146_v27 = vadd.f32 %v5941_v32, %v7672_v57  ;;  %v7793_v31 = vadd.f32 %v2484_v10, %v2143_v23  ;;  %v8999_v57 = vld [vmem:[#allocation7_spill] sm:$0xff] }
 0x1bb   : > { %v2106_v21 = vpop.f32.mrf.mxu0  ;;  %v2505_v10 = vadd.f32 %v8999_v57, %v7687_v43 }
 0x1bc   : > { %v2145_v51 = vadd.f32 %v2106_v21, %v1757_v39  ;;  %v7797_v45 = vadd.f32 %v5993_v25, %v2146_v27  ;;  %v7813_v25 = vpop.f32.mrf.mxu1 }
 0x1bd   : > { %v6000_v38 = vpop.f32.mrf.mxu0 }
 0x1be   : > { %v7799_v5 = vadd.f32 %v2494_v60, %v2145_v51  ;;  %v7802_v7 = vadd.f32 %v6000_v38, %v7682_v62  ;;  %v2507_v62 = vadd.f32 %v7513_v20, %v7696_v17  ;;  %v7822_v16 = vpop.f32.mrf.mxu1  ;;  %v2511_v17 = vadd.f32 %v7567_v58, %v7712_v56 }
 0x1bf   : > { %v7804_v1 = vpop.f32.mrf.mxu0  ;;  %v2515_v56 = vadd.f32 %v7628_v47, %v7728_v28 }
 0x1c0   : > { %v7831_v23 = vpop.f32.mrf.mxu1 }
 0x1c1   : > { %v6003_v46 = vpop.f32.mrf.mxu0 }
 0x1c2   : > { %v7811_v49 = vadd.f32 %v6003_v46, %v7690_v42  ;;  %v2509_v42 = vadd.f32 %v7539_v52, %v7704_v33  ;;  %v7840_v39 = vpop.f32.mrf.mxu1  ;;  %v2513_v33 = vadd.f32 %v7601_v14, %v7720_v61  ;;  %v2517_v61 = vadd.f32 %v7656_v55, %v7736_v34 }
 0x1c3   : > { %v2745_v36 = vpop.f32.mrf.mxu0 }
 0x1c4   : > { %v7815_v19 = vadd.f32 %v2745_v36, %v2505_v10  ;;  %v7849_v51 = vpop.f32.mrf.mxu1 }
 0x1c5   : > { %v6006_v22 = vpop.f32.mrf.mxu0 }
 0x1c6   : > { %v7820_v54 = vadd.f32 %v6006_v22, %v7699_v15  ;;  %v7858_v57 = vpop.f32.mrf.mxu1 }
 0x1c7   : > { %v2755_v37 = vpop.f32.mrf.mxu0 }
 0x1c8   : > { %v7824_v48 = vadd.f32 %v2755_v37, %v2507_v62  ;;  %v7867_v22 = vpop.f32.mrf.mxu1 }
 0x1c9   : > { %v6009_v43 = vpop.f32.mrf.mxu0 }
 0x1ca   : > { %v7829_v60 = vadd.f32 %v6009_v43, %v7707_v30 }
 0x1cb   : > { %v2765_v32 = vpop.f32.mrf.mxu0 }
 0x1cc   : > { %v7833_v13 = vadd.f32 %v2765_v32, %v2509_v42 }
 0x1cd   : > { %v6012_v20 = vpop.f32.mrf.mxu0 }
 0x1ce   : > { %v7838_v15 = vadd.f32 %v6012_v20, %v7715_v9 }
 0x1cf   : > { %v2775_v27 = vpop.f32.mrf.mxu0 }
 0x1d0   : > { %v7842_v21 = vadd.f32 %v2775_v27, %v2511_v17 }
 0x1d1   : > { %v6015_v52 = vpop.f32.mrf.mxu0 }
 0x1d2   : > { %v7847_v30 = vadd.f32 %v6015_v52, %v7723_v50 }
 0x1d3   : > { %v2785_v38 = vpop.f32.mrf.mxu0 }
 0x1d4   : > { %v7851_v46 = vadd.f32 %v2785_v38, %v2513_v33 }
 0x1d5   : > { %v6018_v58 = vpop.f32.mrf.mxu0 }
 0x1d6   : > { %v7856_v9 = vadd.f32 %v6018_v58, %v7731_v29  ;;  %v7874_v29 = vpop.f32.mrf.mxu1 }
 0x1d7   : > { %v2795_v10 = vpop.f32.mrf.mxu0 }
 0x1d8   : > { %v7860_v36 = vadd.f32 %v2795_v10, %v2515_v56  ;;  %v7882_v34 = vpop.f32.mrf.mxu1 }
 0x1d9   : > { %v6021_v14 = vpop.f32.mrf.mxu0 }
 0x1da   : > { %v7865_v50 = vadd.f32 %v6021_v14, %v7739_v26  ;;  %v7890_v27 = vpop.f32.mrf.mxu1 }
 0x1db   : > { %v2805_v62 = vpop.f32.mrf.mxu0 }
 0x1dc   : > { %v7869_v37 = vadd.f32 %v2805_v62, %v2517_v61  ;;  %v7898_v38 = vpop.f32.mrf.mxu1 }
 0x1dd   : > { %v6024_v47 = vpop.f32.mrf.mxu0 }
 0x1de   : > { %v7872_v28 = vadd.f32 %v6024_v47, %v7745_v8  ;;  %v7906_v10 = vpop.f32.mrf.mxu1 }
 0x1df   : > { %v2815_v43 = vpop.f32.mrf.mxu0 }
 0x1e0   : > { %v7877_v42 = vadd.f32 %v2815_v43, %v7751_v11  ;;  %v7914_v62 = vpop.f32.mrf.mxu1 }
 0x1e1   : > { %v6027_v32 = vpop.f32.mrf.mxu0 }
 0x1e2   : > { %v7880_v55 = vadd.f32 %v6027_v32, %v7753_v53  ;;  %v7922_v32 = vpop.f32.mrf.mxu1 }
 0x1e3   : > { %v2825_v26 = vpop.f32.mrf.mxu0 }
 0x1e4   : > { %v7885_v20 = vadd.f32 %v2825_v26, %v7758_v63 }
 0x1e5   : > { %v6030_v17 = vpop.f32.mrf.mxu0 }
 0x1e6   : > { %v7888_v8 = vadd.f32 %v6030_v17, %v7760_v6 }
 0x1e7   : > { %v2835_v52 = vpop.f32.mrf.mxu0 }
 0x1e8   : > { %v7893_v11 = vadd.f32 %v2835_v52, %v7765_v41 }
 0x1e9   : > { %v6033_v33 = vpop.f32.mrf.mxu0 }
 0x1ea   : > { %v7896_v53 = vadd.f32 %v6033_v33, %v7767_v59 }
 0x1eb   : > { %v2845_v58 = vpop.f32.mrf.mxu0 }
 0x1ec   : > { %v7901_v63 = vadd.f32 %v2845_v58, %v7772_v0 }
 0x1ed   : > { %v6036_v56 = vpop.f32.mrf.mxu0 }
 0x1ee   : > { %v7904_v6 = vadd.f32 %v6036_v56, %v7774_v40 }
 0x1ef   : > { %v2855_v14 = vpop.f32.mrf.mxu0 }
 0x1f0   : > { %v7909_v41 = vadd.f32 %v2855_v14, %v7779_v44  ;;  %v9000_v44 = vld [vmem:[#allocation6_spill] sm:$0xff] }
 0x1f1   : > { %v6039_v61 = vpop.f32.mrf.mxu0  ;;  %v2503_v17 = vadd.f32 %v9000_v44, %v7679_v4 }
 0x1f2   : > { %v7912_v59 = vadd.f32 %v6039_v61, %v7781_v12  ;;  %v3283_v61 = vadd.f32 %v7795_v35, %v7802_v7 }
 0x1f3   : > { %v2865_v47 = vpop.f32.mrf.mxu0  ;;  %v2894_v33 = vadd.f32 %v7804_v1, %v2503_v17 }
 0x1f4   : > { %v7917_v0 = vadd.f32 %v2865_v47, %v7786_v3  ;;  %v7933_v3 = vpop.f32.mrf.mxu1 }
 0x1f5   : > { %v6042_v43 = vpop.f32.mrf.mxu0  ;;  %v3282_v4 = vadd.f32 %v7806_v24, %v2894_v33 }
 0x1f6   : > { %v7920_v40 = vadd.f32 %v6042_v43, %v7788_v18 }
 0x1f7   : > { %v2875_v26 = vpop.f32.mrf.mxu0 }
 0x1f8   : > { %v7927_v52 = vadd.f32 %v2875_v26, %v7793_v31  ;;  %v7941_v31 = vpop.f32.mrf.mxu1 }
 0x1f9   : > { %v6045_v12 = vpop.f32.mrf.mxu0 }
 0x1fa   : > { %v7931_v58 = vadd.f32 %v6045_v12, %v7797_v45  ;;  %v7946_v45 = vld [vmem:[%s8920_s2] ss:$0 sm:$0xff]  ;;  %v7951_v17 = vpop.f32.mrf.mxu1 }
 0x1fb   : > { %v2885_v56 = vpop.f32.mrf.mxu0 }
 0x1fc   : > { %v7936_v18 = vadd.f32 %v2885_v56, %v7799_v5  ;;  %v3284_v5 = vadd.f32 %v7822_v16, %v7815_v19  ;;  %v3285_v56 = vadd.f32 %v7813_v25, %v7811_v49 }
 0x1fd   : > { %v6104_v14 = vpop.f32.mrf.mxu0 }
 0x1fe   : > { %v3671_v43 = vadd.f32 %v6104_v14, %v3283_v61  ;;  %v7957_v14 = vpop.f32.mrf.mxu1 }
 0x1ff   : > { %v3511_v47 = vpop.f32.mrf.mxu0 }
 0x200   : > { %v3670_v1 = vadd.f32 %v3511_v47, %v3282_v4  ;;  %v3710_v7 = vadd.f32 %v7946_v45, %v3671_v43  ;;  %v3286_v43 = vadd.f32 %v7840_v39, %v7824_v48 }
 0x201   : > { %v6107_v26 = vpop.f32.mrf.mxu0 }
 0x202   : > { %v3709_v44 = vadd.f32 %v7946_v45, %v3670_v1  ;;  %v3742_v19 = vmax.f32 %v3710_v7, 0.0  ;;  %v3673_v16 = vadd.f32 %v6107_v26, %v3285_v56  ;;  %v7964_v1 = vpop.f32.mrf.mxu1  ;;  %v3287_v26 = vadd.f32 %v7831_v23, %v7820_v54 }
 0x203   : > { %v3521_v35 = vpop.f32.mrf.mxu0 }
 0x204   : > { %v3741_v24 = vmax.f32 %v3709_v44, 0.0  ;;  %v3672_v12 = vadd.f32 %v3521_v35, %v3284_v5  ;;  %v3712_v25 = vadd.f32 %v7946_v45, %v3673_v16  ;;  %v7971_v7 = vpop.f32.mrf.mxu1 }
 0x205   : > { %v6110_v33 = vpop.f32.mrf.mxu0 }
 0x206   : > { %5338 = vmatmul.mubr.msk.f32.vlgmr.msra.gmra.mxu1 %vm337_vm0, %v3741_v24  ;;  %v3711_v4 = vadd.f32 %v7946_v45, %v3672_v12  ;;  %v3744_v39 = vmax.f32 %v3712_v25, 0.0  ;;  %v3675_v24 = vadd.f32 %v6110_v33, %v3287_v26  ;;  %v3289_v33 = vadd.f32 %v7849_v51, %v7829_v60 }
 0x207   : > { %v3531_v61 = vpop.f32.mrf.mxu0  ;;  %3955 = vmatprep.mubr.f32.mxu1 %v6356_v2  ;;  %v3299_v51 = vadd.f32 %v7933_v3, %v7872_v28 }
 0x208   : > { %v3743_v5 = vmax.f32 %v3711_v4, 0.0  ;;  %v3674_v44 = vadd.f32 %v3531_v61, %v3286_v43  ;;  %v3288_v61 = vadd.f32 %v7858_v57, %v7833_v13  ;;  %v3714_v23 = vadd.f32 %v7946_v45, %v3675_v24 }
 0x209   : > { %v6113_v47 = vpop.f32.mrf.mxu0 }
 0x20a   : > { %5339 = vmatmul.mubr.msk.f32.gmra.mxu1 %vm337_vm0, %v3742_v19  ;;  %v3713_v12 = vadd.f32 %v7946_v45, %v3674_v44  ;;  %v6085_v19 = vpop.f32.mrf.mxu1  ;;  %v3746_v13 = vmax.f32 %v3714_v23, 0.0  ;;  %v3677_v57 = vadd.f32 %v6113_v47, %v3289_v33 }
 0x20b   : > { %v3541_v49 = vpop.f32.mrf.mxu0  ;;  %3961 = vmatprep.mubr.f32.mxu1 %v6356_v2 }
 0x20c   : > { %v3745_v16 = vmax.f32 %v3713_v12, 0.0  ;;  %v3676_v4 = vadd.f32 %v3541_v49, %v3288_v61  ;;  %v3233_v25 = vpop.f32.mrf.mxu1  ;;  %v3290_v49 = vadd.f32 %v7874_v29, %v7842_v21  ;;  %v3716_v24 = vadd.f32 %v7946_v45, %v3677_v57 }
 0x20d   : > { %v6116_v35 = vpop.f32.mrf.mxu0  ;;  %v3291_v61 = vadd.f32 %v7867_v22, %v7838_v15  ;;  %v3298_v21 = vadd.f32 %v7941_v31, %v7877_v42  ;;  %v3292_v42 = vadd.f32 %v7890_v27, %v7851_v46  ;;  %v3300_v31 = vadd.f32 %v7957_v14, %v7885_v20 }
 0x20e   : > { %5340 = vmatmul.mubr.msk.f32.gmra.mxu1 %vm337_vm0, %v3743_v5  ;;  %v3715_v44 = vadd.f32 %v7946_v45, %v3676_v4  ;;  %v3748_v3 = vmax.f32 %v3716_v24, 0.0  ;;  %v3293_v14 = vadd.f32 %v7882_v34, %v7847_v30 }
 0x20f   : > { %v3551_v48 = vpop.f32.mrf.mxu0  ;;  %3967 = vmatprep.mubr.f32.mxu1 %v6356_v2  ;;  %v3679_v33 = vadd.f32 %v6116_v35, %v3291_v61  ;;  %v3303_v35 = vadd.f32 %v7964_v1, %v7888_v8 }
 0x210   : > { %v3747_v47 = vmax.f32 %v3715_v44, 0.0  ;;  %v3678_v12 = vadd.f32 %v3551_v48, %v3290_v49 }
 0x211   : > { %v7975_v56 = vpop.f32.mrf.mxu0  ;;  %v3718_v44 = vadd.f32 %v7946_v45, %v3679_v33 }
 0x212   : > { %5341 = vmatmul.mubr.msk.f32.gmra.mxu1 %vm337_vm0, %v3744_v39  ;;  %v6088_v39 = vpop.f32.mrf.mxu1  ;;  %v3717_v48 = vadd.f32 %v7946_v45, %v3678_v12  ;;  %v3305_v12 = vadd.f32 %v6085_v19, %v7896_v53  ;;  %v3681_v61 = vadd.f32 %v7975_v56, %v3293_v14 }
 0x213   : > { %v3561_v54 = vpop.f32.mrf.mxu0  ;;  %3973 = vmatprep.mubr.f32.mxu1 %v6356_v2  ;;  %v3307_v19 = vadd.f32 %v6088_v39, %v7904_v6 }
 0x214   : > { %v3243_v4 = vpop.f32.mrf.mxu1  ;;  %v3680_v46 = vadd.f32 %v3561_v54, %v3292_v42 }
 0x215   : > { %v7982_v43 = vpop.f32.mrf.mxu0 }
 0x216   : > { %5342 = vmatmul.mubr.msk.f32.gmra.mxu1 %vm337_vm0, %v3745_v16  ;;  %v3301_v16 = vadd.f32 %v7951_v17, %v7880_v55  ;;  %v6091_v57 = vpop.f32.mrf.mxu1  ;;  %v3719_v30 = vadd.f32 %v7946_v45, %v3680_v46 }
 0x217   : > { %v7987_v5 = vpop.f32.mrf.mxu0  ;;  %3979 = vmatprep.mubr.f32.mxu1 %v6356_v2  ;;  %v3309_v42 = vadd.f32 %v6091_v57, %v7912_v59 }
 0x218   : > { %v3253_v54 = vpop.f32.mrf.mxu1 }
 0x219   : > { %v7991_v26 = vpop.f32.mrf.mxu0 }
 0x21a   : > { %5343 = vmatmul.mubr.msk.f32.gmra.mxu1 %vm337_vm0, %v3746_v13  ;;  %v6094_v33 = vpop.f32.mrf.mxu1 }
 0x21b   : > { %v7996_v60 = vpop.f32.mrf.mxu0  ;;  %3985 = vmatprep.mubr.f32.mxu1 %v6356_v2  ;;  %v3311_v57 = vadd.f32 %v6094_v33, %v7920_v40 }
 0x21d   : > { %v6128_v23 = vpop.f32.mrf.mxu0 }
 0x21e   : > { %v3687_v29 = vadd.f32 %v6128_v23, %v3299_v51  ;;  %5344 = vmatmul.mubr.msk.f32.gmra.mxu1 %vm337_vm0, %v3747_v47  ;;  %v3749_v51 = vmax.f32 %v3717_v48, 0.0  ;;  %v3302_v47 = vadd.f32 %v7971_v7, %v7893_v11  ;;  %v3751_v48 = vmax.f32 %v3719_v30, 0.0 }
 0x21f   : > { %v3591_v28 = vpop.f32.mrf.mxu0  ;;  %3991 = vmatprep.mubr.f32.mxu1 %v6356_v2 }
 0x220   : > { %v8012_v15 = vadd.f32 %v7946_v45, %v3687_v29  ;;  %v3686_v22 = vadd.f32 %v3591_v28, %v3298_v21  ;;  %v3750_v21 = vmax.f32 %v3718_v44, 0.0  ;;  %v3294_v29 = vadd.f32 %v7906_v10, %v7860_v36 }
 0x221   : > { %v6131_v13 = vpop.f32.mrf.mxu0  ;;  %v3720_v28 = vadd.f32 %v7946_v45, %v3681_v61  ;;  %v3295_v10 = vadd.f32 %v7898_v38, %v7856_v9  ;;  %v3296_v44 = vadd.f32 %v7922_v32, %v7869_v37 }
 0x222   : > { %v8019_v55 = vadd.f32 %v7946_v45, %v3686_v22  ;;  %v3689_v17 = vadd.f32 %v6131_v13, %v3301_v16  ;;  %5345 = vmatmul.mubr.msk.f32.gmra.mxu1 %vm337_vm0, %v3748_v3  ;;  %v3304_v16 = vadd.f32 %v3233_v25, %v7901_v63  ;;  %v3682_v22 = vadd.f32 %v7987_v5, %v3294_v29 }
 0x223   : > { %v3601_v49 = vpop.f32.mrf.mxu0  ;;  %3997 = vmatprep.mubr.f32.mxu1 %v6356_v2  ;;  %v3306_v13 = vadd.f32 %v3243_v4, %v7909_v41  ;;  %v3683_v5 = vadd.f32 %v7982_v43, %v3295_v10 }
 0x224   : > { %v8027_v27 = vadd.f32 %v7946_v45, %v3689_v17  ;;  %v3688_v20 = vadd.f32 %v3601_v49, %v3300_v31  ;;  %v3263_v31 = vpop.f32.mrf.mxu1  ;;  %v3721_v9 = vadd.f32 %v7946_v45, %v3682_v22  ;;  %v3308_v49 = vadd.f32 %v3253_v54, %v7917_v0 }
 0x225   : > { %v6134_v24 = vpop.f32.mrf.mxu0  ;;  %v3722_v46 = vadd.f32 %v7946_v45, %v3683_v5 }
 0x226   : > { %v8034_v8 = vadd.f32 %v7946_v45, %v3688_v20  ;;  %v3691_v1 = vadd.f32 %v6134_v24, %v3303_v35  ;;  %5346 = vmatmul.mubr.msk.f32.gmra.mxu1 %vm337_vm0, %v3749_v51  ;;  %v3752_v35 = vmax.f32 %v3720_v28, 0.0  ;;  %v6097_v51 = vpop.f32.mrf.mxu1  ;;  %v3753_v14 = vmax.f32 %v3721_v9, 0.0 }
 0x227   : > { %v3611_v23 = vpop.f32.mrf.mxu0  ;;  %4003 = vmatprep.mubr.f32.mxu1 %v6356_v2  ;;  %v3684_v24 = vadd.f32 %v7996_v60, %v3296_v44  ;;  %v3313_v54 = vadd.f32 %v6097_v51, %v7931_v58  ;;  %v3757_v28 = vmax.f32 %v8019_v55, 0.0 }
 0x228   : > { %v8042_v34 = vadd.f32 %v7946_v45, %v3691_v1  ;;  %v3690_v11 = vadd.f32 %v3611_v23, %v3302_v47  ;;  %v3297_v47 = vadd.f32 %v7914_v62, %v7865_v50  ;;  %v3310_v1 = vadd.f32 %v3263_v31, %v7927_v52  ;;  %v3273_v61 = vpop.f32.mrf.mxu1  ;;  %v3777_v31 = vld [vmem:[%s8922_s4] sm:$0x3] }
 0x229   : > { %v6137_v7 = vpop.f32.mrf.mxu0  ;;  %v3754_v23 = vmax.f32 %v3722_v46, 0.0  ;;  %v3723_v30 = vadd.f32 %v7946_v45, %v3684_v24 }
 0x22a   : > { %v8048_v53 = vadd.f32 %v7946_v45, %v3690_v11  ;;  %v3693_v56 = vadd.f32 %v6137_v7, %v3305_v12  ;;  %5347 = vmatmul.mubr.msk.f32.gmra.mxu1 %vm337_vm0, %v3750_v21  ;;  %v3685_v21 = vadd.f32 %v7991_v26, %v3297_v47  ;;  %v3312_v11 = vadd.f32 %v3273_v61, %v7936_v18 }
 0x22b   : > { %v3621_v3 = vpop.f32.mrf.mxu0  ;;  %4009 = vmatprep.mubr.f32.mxu1 %v6356_v2 }
 0x22c   : > { %v8056_v36 = vadd.f32 %v7946_v45, %v3693_v56  ;;  %v3692_v63 = vadd.f32 %v3621_v3, %v3304_v16  ;;  %v3724_v16 = vadd.f32 %v7946_v45, %v3685_v21  ;;  %v3755_v56 = vmax.f32 %v3723_v30, 0.0 }
 0x22d   : > { %v6140_v25 = vpop.f32.mrf.mxu0  ;;  %v3758_v3 = vmax.f32 %v8012_v15, 0.0  ;;  %v3761_v55 = vmax.f32 %v8048_v53, 0.0  ;;  %v3762_v15 = vmax.f32 %v8042_v34, 0.0 }
 0x22e   : > { %v8062_v6 = vadd.f32 %v7946_v45, %v3692_v63  ;;  %v3695_v39 = vadd.f32 %v6140_v25, %v3307_v19  ;;  %5348 = vmatmul.mubr.msk.f32.gmra.mxu1 %vm337_vm0, %v3751_v48  ;;  %v3756_v18 = vmax.f32 %v3724_v16, 0.0  ;;  %v3760_v48 = vmax.f32 %v8027_v27, 0.0 }
 0x22f   : > { %v3631_v17 = vpop.f32.mrf.mxu0  ;;  %4015 = vmatprep.mubr.f32.mxu1 %v6356_v2  ;;  %v3764_v27 = vmax.f32 %v8056_v36, 0.0 }
 0x230   : > { %v8070_v38 = vadd.f32 %v7946_v45, %v3695_v39  ;;  %v3694_v41 = vadd.f32 %v3631_v17, %v3306_v13 }
 0x231   : > { %v6143_v4 = vpop.f32.mrf.mxu0 }
 0x232   : > { %v8076_v59 = vadd.f32 %v7946_v45, %v3694_v41  ;;  %v3697_v43 = vadd.f32 %v6143_v4, %v3309_v42  ;;  %5349 = vmatmul.mubr.msk.f32.gmra.mxu1 %vm337_vm0, %v3752_v35  ;;  %v3766_v34 = vmax.f32 %v8070_v38, 0.0  ;;  %v8160_v35 = vld [vmem:[%s8923_s5] sm:$0xff] }
 0x233   : > { %v3641_v20 = vpop.f32.mrf.mxu0  ;;  %4021 = vmatprep.mubr.f32.mxu1 %v6356_v2  ;;  %vm4664_vm1 = vcmp.gt.f32.partialorder %v8160_v35, 0.0 }
 0x234   : > { %v8084_v37 = vadd.f32 %v7946_v45, %v3697_v43  ;;  %v3696_v0 = vadd.f32 %v3641_v20, %v3308_v49  ;;  %v3765_v53 = vmax.f32 %v8076_v59, 0.0 }
 0x235   : > { %v6146_v32 = vpop.f32.mrf.mxu0 }
 0x236   : > { %v3735_v40 = vadd.f32 %v7946_v45, %v3696_v0  ;;  %v3699_v12 = vadd.f32 %v6146_v32, %v3311_v57  ;;  %5350 = vmatmul.mubr.msk.f32.gmra.mxu1 %vm337_vm0, %v3753_v14  ;;  %v3768_v36 = vmax.f32 %v8084_v37, 0.0 }
 0x237   : > { %v3651_v60 = vpop.f32.mrf.mxu0  ;;  %4027 = vmatprep.mubr.f32.mxu1 %v6356_v2 }
 0x238   : > { %v3738_v50 = vadd.f32 %v7946_v45, %v3699_v12  ;;  %v3698_v62 = vadd.f32 %v3651_v60, %v3310_v1  ;;  %v3767_v22 = vmax.f32 %v3735_v40, 0.0 }
 0x239   : > { %v6149_v52 = vpop.f32.mrf.mxu0 }
 0x23a   : > { %v3737_v7 = vadd.f32 %v7946_v45, %v3698_v62  ;;  %v3701_v29 = vadd.f32 %v6149_v52, %v3313_v54  ;;  %5351 = vmatmul.mubr.msk.f32.gmra.mxu1 %vm337_vm0, %v3754_v23  ;;  %v3770_v10 = vmax.f32 %v3738_v50, 0.0 }
 0x23b   : > { %v3661_v58 = vpop.f32.mrf.mxu0  ;;  %4033 = vmatprep.mubr.f32.mxu1 %v6356_v2 }
 0x23c   : > { %v3740_v26 = vadd.f32 %v7946_v45, %v3701_v29  ;;  %v3700_v19 = vadd.f32 %v3661_v58, %v3312_v11  ;;  %v3769_v63 = vmax.f32 %v3737_v7, 0.0 }
 0x23e   : > { %v3739_v33 = vadd.f32 %v7946_v45, %v3700_v19  ;;  %5352 = vmatmul.mubr.msk.f32.gmra.mxu1 %vm337_vm0, %v3755_v56  ;;  %v3759_v45 = vmax.f32 %v8034_v8, 0.0  ;;  %v3763_v8 = vmax.f32 %v8062_v6, 0.0  ;;  %v3772_v13 = vmax.f32 %v3740_v26, 0.0 }
 0x23f   : > { %4039 = vmatprep.mubr.f32.mxu1 %v6356_v2  ;;  %v3779_v6 = vlaneseq }
 0x240   : > { %v3771_v25 = vmax.f32 %v3739_v33, 0.0 }
 0x241   : > { %v8149_v39 = vshrl.u32 %v3779_v6, 7 }
 0x242   : > { %5353 = vmatmul.mubr.msk.f32.gmra.mxu1 %vm337_vm0, %v3756_v18 }
 0x243   : > { %4045 = vmatprep.mubr.f32.mxu1 %v6356_v2  ;;  %v3785_v42 = vsub.s32 1, %v8149_v39  ;;  %v4146_v41 = vcvt.s32.f32 %v8149_v39  ;;  %v4145_v44 = vadd.s32 8, %v8149_v39  ;;  %v4152_v49 = vsub.s32 2, %v8149_v39 }
 0x244   : > { %v4206_v59 = vsub.s32 3, %v8149_v39  ;;  %v3781_v51 = vsub.s32 0, %v8149_v39  ;;  %v4362_v54 = vsub.s32 4, %v8149_v39  ;;  %v4494_v18 = vsub.s32 5, %v8149_v39 }
 0x245   : > { %v8155_v5 = vrot.slane %v3777_v31, %v3785_v42  ;;  %v4148_v14 = vmul.f32 8.0, %v4146_v41  ;;  %v4147_v24 = vcvt.s32.f32 %v4145_v44  ;;  %v4153_v0 = vrot.slane %v8160_v35, %v4152_v49 }
 0x246   : > { %5354 = vmatmul.mubr.msk.f32.gmra.mxu1 %vm337_vm0, %v3757_v28  ;;  %v8175_v32 = vrot.slane %v8160_v35, %v4206_v59  ;;  %v8178_v12 = vrot.slane %v3777_v31, %v3781_v51  ;;  %v8188_v52 = vrot.slane %v8160_v35, %v3781_v51  ;;  %v8195_v58 = vrot.slane %v8160_v35, %v4362_v54 }
 0x247   : > { %4051 = vmatprep.mubr.f32.mxu1 %v6356_v2  ;;  %v4149_v23 = vmul.f32 8.0, %v4147_v24  ;;  %v8184_v30 = vmul.f32 %v4153_v0, %v4148_v14  ;;  %v8221_v6 = vrot.slane %v8160_v35, %v4494_v18 }
 0x248   : > { %v4208_v50 = vmul.f32 0.0, %v8175_v32  ;;  %v4209_v28 = vmul.f32 8.0, %v8175_v32 }
 0x249   : > { %v8199_v56 = vmul.f32 %v4153_v0, %v4149_v23 }
 0x24a   : > { %5355 = vmatmul.mubr.msk.f32.gmra.mxu1 %vm337_vm0, %v3758_v3  ;;  %v4224_v33 = vadd.f32 %v4208_v50, %v8184_v30 }
 0x24b   : > { %4057 = vmatprep.mubr.f32.mxu1 %v6356_v2  ;;  %v8233_v41 = vadd.f32 %v4209_v28, %v8199_v56 }
 0x24e   : > { %5356 = vmatmul.mubr.msk.f32.gmra.mxu1 %vm337_vm0, %v3759_v45  ;;  %v4530_v45 = vsub.s32 6, %v8149_v39 }
 0x24f   : > { %4063 = vmatprep.mubr.f32.mxu1 %v6356_v2 }
 0x250   : > { %v8237_v49 = vrot.slane %v8160_v35, %v4530_v45 }
 0x252   : > { %5357 = vmatmul.mubr.msk.f32.gmra.mxu1 %vm337_vm0, %v3760_v48  ;;  %v4630_v48 = vsub.s32 7, %v8149_v39 }
 0x253   : > { %4069 = vmatprep.mubr.f32.mxu1 %v6356_v2 }
 0x256   : > { %5358 = vmatmul.mubr.msk.f32.gmra.mxu1 %vm337_vm0, %v3761_v55 }
 0x257   : > { %4075 = vmatprep.mubr.f32.mxu1 %v6356_v2 }
 0x25a   : > { %5359 = vmatmul.mubr.msk.f32.gmra.mxu1 %vm337_vm0, %v3762_v15 }
 0x25b   : > { %4081 = vmatprep.mubr.f32.mxu1 %v6356_v2 }
 0x25e   : > { %5360 = vmatmul.mubr.msk.f32.gmra.mxu1 %vm337_vm0, %v3763_v8 }
 0x25f   : > { %4087 = vmatprep.mubr.f32.mxu1 %v6356_v2 }
 0x262   : > { %5361 = vmatmul.mubr.msk.f32.gmra.mxu1 %vm337_vm0, %v3764_v27 }
 0x263   : > { %4093 = vmatprep.mubr.f32.mxu1 %v6356_v2 }
 0x266   : > { %5362 = vmatmul.mubr.msk.f32.gmra.mxu1 %vm337_vm0, %v3765_v53  ;;  %v6357_v53 = vmov 0  }
 0x267   : > { %4099 = vmatprep.mubr.f32.mxu1 %v6356_v2 }
 0x26a   : > { %5363 = vmatmul.mubr.msk.f32.gmra.mxu1 %vm337_vm0, %v3766_v34  ;;  %v4665_v34 = vsel %vm4664_vm1, 1, %v6357_v53 }
 0x26b   : > { %4105 = vmatprep.mubr.f32.mxu1 %v6356_v2 }
 0x26e   : > { %5364 = vmatmul.mubr.msk.f32.gmra.mxu1 %vm337_vm0, %v3767_v22 }
 0x26f   : > { %4111 = vmatprep.mubr.f32.mxu1 %v6356_v2 }
 0x272   : > { %5365 = vmatmul.mubr.msk.f32.gmra.mxu1 %vm337_vm0, %v3768_v36 }
 0x273   : > { %4117 = vmatprep.mubr.f32.mxu1 %v6356_v2 }
 0x276   : > { %5366 = vmatmul.mubr.msk.f32.gmra.mxu1 %vm337_vm0, %v3769_v63  ;;  %v4225_v63 = vadd.f32 %v4208_v50, %v8199_v56 }
 0x277   : > { %4123 = vmatprep.mubr.f32.mxu1 %v6356_v2 }
 0x27a   : > { %5367 = vmatmul.mubr.msk.f32.gmra.mxu1 %vm337_vm0, %v3770_v10  ;;  %v4210_v10 = vmul.f32 16.0, %v8175_v32 }
 0x27b   : > { %4129 = vmatprep.mubr.f32.mxu1 %v6356_v2 }
 0x27c   : > { %v8243_v51 = vadd.f32 %v4210_v10, %v8199_v56 }
 0x27e   : > { %5368 = vmatmul.mubr.msk.f32.gmra.mxu1 %vm337_vm0, %v3771_v25 }
 0x27f   : > { %4135 = vmatprep.mubr.f32.mxu1 %v6356_v2  ;;  %v8163_v2 = vrot.slane %v8160_v35, %v3785_v42 }
 0x282   : > { %5369 = vmatmul.mubr.msk.f32.gmra.mxu1 %vm337_vm0, %v3772_v13  ;;  %v4211_v13 = vmul.f32 24.0, %v8175_v32 }
 0x284   : > { %v8249_v14 = vadd.f32 %v4211_v13, %v8184_v30 }
 0x2c6   : > { %v3951_v17 = vpop.f32.mrf.mxu1 }
 0x2c7   : > { %v8192_v29 = vadd.f32 %v3951_v17, %v8178_v12  ;;  %v8227_v17 = vrot.slane %v4665_v34, %v4630_v48 }
 0x2c8   : > { %v3953_v9 = vpop.f32.mrf.mxu1 }
 0x2c9   : > { %v3954_v38 = vadd.f32 %v3953_v9, %v8155_v5  ;;  %v4260_v27 = vmul.f32 %v8188_v52, %v8192_v29  ;;  %vm4670_vm2 = vcmp.eq.s32.totalorder %v8227_v17, 1 }
 0x2ca   : > { %v3957_v4 = vpop.f32.mrf.mxu1 }
 0x2cb   : > { %v4296_v43 = vmul.f32 %v8163_v2, %v3954_v38  ;;  %v8210_v55 = vadd.f32 %v3957_v4, %v8178_v12  ;;  %v4226_v38 = vadd.f32 %v4209_v28, %v8184_v30  ;;  %v4364_v44 = vmul.f32 %v8195_v58, %v4260_v27 }
 0x2cc   : > { %v3959_v57 = vpop.f32.mrf.mxu1 }
 0x2cd   : > { %v4328_v46 = vmin.f32 %v4296_v43, 4.1351666  ;;  %v3960_v20 = vadd.f32 %v3959_v57, %v8155_v5  ;;  %v4261_v9 = vmul.f32 %v8188_v52, %v8210_v55  ;;  %v8240_v57 = vadd.f32 %v4210_v10, %v8184_v30 }
 0x2ce   : > { %v3963_v37 = vpop.f32.mrf.mxu1  ;;  %v4396_v23 = vadd.f32 %v4364_v44, %v4224_v33 }
 0x2cf   : > { %v4428_v47 = vmul.f32 1.442695, %v4328_v46  ;;  %v4297_v1 = vmul.f32 %v8163_v2, %v3960_v20  ;;  %v8224_v39 = vadd.f32 %v3963_v37, %v8178_v12 }
 0x2d0   : > { %v3965_v40 = vpop.f32.mrf.mxu1 }
 0x2d1   : > { %6214 = vpow2.f32 %v4428_v47  ;;  %v4329_v61 = vmin.f32 %v4297_v1, 4.1351666  ;;  %v3966_v60 = vadd.f32 %v3965_v40, %v8155_v5  ;;  %v4262_v37 = vmul.f32 %v8188_v52, %v8224_v39 }
 0x2d2   : > { %v8182_v21 = vpop.f32.mrf.mxu1  ;;  %v4212_v47 = vmul.f32 32.0, %v8175_v32  ;;  %v8256_v1 = vrot.slane %v8160_v35, %v4630_v48  ;;  %v4365_v40 = vmul.f32 %v8195_v58, %v4261_v9 }
 0x2d3   : > { %v4430_v62 = vmul.f32 1.442695, %v4329_v61  ;;  %v4298_v11 = vmul.f32 %v8163_v2, %v3966_v60  ;;  %v8265_v50 = vadd.f32 %v8182_v21, %v8178_v12  ;;  %v4366_v28 = vmul.f32 %v8195_v58, %v4262_v37 }
 0x2d4   : > { %v3971_v7 = vpop.f32.mrf.mxu1  ;;  %v8277_v21 = vadd.f32 %v4212_v47, %v8184_v30 }
 0x2d5   : > { %6216 = vpow2.f32 %v4430_v62  ;;  %v3972_v16 = vadd.f32 %v3971_v7, %v8155_v5  ;;  %v4330_v26 = vmin.f32 %v4298_v11, 4.1351666  ;;  %v4263_v34 = vmul.f32 %v8188_v52, %v8265_v50 }
 0x2d6   : > { %v8201_v19 = vpop.f32.mrf.mxu1 }
 0x2d7   : > { %v4299_v3 = vmul.f32 %v8163_v2, %v3972_v16  ;;  %v4432_v15 = vmul.f32 1.442695, %v4330_v26  ;;  %v8271_v16 = vadd.f32 %v4211_v13, %v8199_v56  ;;  %v4213_v26 = vmul.f32 40.0, %v8175_v32 }
 0x2d8   : > { %v3977_v8 = vpop.f32.mrf.mxu1 }
 0x2d9   : > { %v4331_v22 = vmin.f32 %v4299_v3, 4.1351666  ;;  %v3978_v36 = vadd.f32 %v3977_v8, %v8155_v5  ;;  %6218 = vpow2.f32 %v4432_v15  ;;  %v4397_v3 = vadd.f32 %v4365_v40, %v4225_v63 }
 0x2da   : > { %v8217_v25 = vpop.f32.mrf.mxu1  ;;  %v8283_v8 = vadd.f32 %v4212_v47, %v8199_v56  ;;  %v8296_v13 = vadd.f32 %v4213_v26, %v8184_v30  ;;  %v8300_v44 = vadd.f32 %v4213_v26, %v8199_v56 }
 0x2db   : > { %v4434_v42 = vmul.f32 1.442695, %v4331_v22  ;;  %v4300_v31 = vmul.f32 %v8163_v2, %v3978_v36  ;;  %v8290_v22 = vadd.f32 %v8201_v19, %v8178_v12 }
 0x2dc   : > { %v3983_v4 = vpop.f32.mrf.mxu1 }
 0x2dd   : > { %6220 = vpow2.f32 %v4434_v42  ;;  %v4332_v59 = vmin.f32 %v4300_v31, 4.1351666  ;;  %v3984_v46 = vadd.f32 %v3983_v4, %v8155_v5  ;;  %v4398_v4 = vadd.f32 %v4366_v28, %v4226_v38 }
 0x2de   : > { %v6215_v43 = vpop.eup %6214  ;;  %v8246_v20 = vpop.f32.mrf.mxu1  ;;  %v4367_v38 = vmul.f32 %v8195_v58, %v4263_v34  ;;  %v4264_v47 = vmul.f32 %v8188_v52, %v8290_v22 }
 0x2df   : > { %v4496_v24 = vmul.f32 %v6215_v43, %v8221_v6  ;;  %v4436_v0 = vmul.f32 1.442695, %v4332_v59  ;;  %v4301_v54 = vmul.f32 %v8163_v2, %v3984_v46  ;;  %v8305_v59 = vadd.f32 %v8217_v25, %v8178_v12 }
 0x2e0   : > { %v3989_v61 = vpop.f32.mrf.mxu1 }
 0x2e1   : > { %v4532_v60 = vmul.f32 %v8237_v49, %v4496_v24  ;;  %6222 = vpow2.f32 %v4436_v0  ;;  %v4333_v35 = vmin.f32 %v4301_v54, 4.1351666  ;;  %v3990_v11 = vadd.f32 %v3989_v61, %v8155_v5 }
 0x2e2   : > { %v6217_v62 = vpop.eup %6216  ;;  %v8268_v7 = vpop.f32.mrf.mxu1  ;;  %v4265_v26 = vmul.f32 %v8188_v52, %v8305_v59 }
 0x2e3   : > { %v4564_v33 = vadd.f32 %v4532_v60, %v4396_v23  ;;  %v4497_v18 = vmul.f32 %v6217_v62, %v8221_v6  ;;  %v4438_v45 = vmul.f32 1.442695, %v4333_v35  ;;  %v4302_v48 = vmul.f32 %v8163_v2, %v3990_v11 }
 0x2e4   : > { %v3995_v15 = vpop.f32.mrf.mxu1  ;;  %v8325_v62 = vadd.f32 %v8246_v20, %v8178_v12  ;;  %v4214_v35 = vmul.f32 48.0, %v8175_v32  ;;  %v4368_v20 = vmul.f32 %v8195_v58, %v4264_v47 }
 0x2e5   : > { %v4596_v27 = vmax.f32 %v4564_v33, 0.0  ;;  %v4533_v53 = vmul.f32 %v8237_v49, %v4497_v18  ;;  %6224 = vpow2.f32 %v4438_v45  ;;  %v4334_v36 = vmin.f32 %v4302_v48, 4.1351666 }
 0x2e6   : > { %v3996_v63 = vadd.f32 %v3995_v15, %v8155_v5  ;;  %v8293_v10 = vpop.f32.mrf.mxu1  ;;  %v6219_v42 = vpop.eup %6218  ;;  %v4399_v45 = vadd.f32 %v4367_v38, %v8233_v41  ;;  %v8343_v41 = vadd.f32 %v4214_v35, %v8184_v30 }
 0x2e7   : > { %v4632_v31 = vmin.f32 %v8256_v1, %v4596_v27  ;;  %v4565_v9 = vadd.f32 %v4533_v53, %v4397_v3  ;;  %v4498_v19 = vmul.f32 %v6219_v42, %v8221_v6  ;;  %v4440_v43 = vmul.f32 1.442695, %v4334_v36 }
 0x2e8   : > { %v4303_v46 = vmul.f32 %v8163_v2, %v3996_v63  ;;  %v4001_v24 = vpop.f32.mrf.mxu1 }
 0x2e9   : > { %v4671_v37 = vsel %vm4670_vm2, %v4632_v31, %v8192_v29  ;;  %v4597_v0 = vmax.f32 %v4565_v9, 0.0  ;;  %v4534_v25 = vmul.f32 %v8237_v49, %v4498_v19  ;;  %6226 = vpow2.f32 %v4440_v43 }
 0x2ea   : > { %v6221_v40 = vpop.eup %6220  ;;  %4703 = vst [vmem:[%s8314_s14] sm:$0xff] %v4671_v37  ;;  %v4335_v54 = vmin.f32 %v4303_v46, 4.1351666  ;;  %v4002_v61 = vadd.f32 %v4001_v24, %v8155_v5  ;;  %v8319_v23 = vpop.f32.mrf.mxu1  ;;  %v4369_v9 = vmul.f32 %v8195_v58, %v4265_v26  ;;  %v4400_v24 = vadd.f32 %v4368_v20, %v8240_v57 }
 0x2eb   : > { %v4633_v29 = vmin.f32 %v8256_v1, %v4597_v0  ;;  %v4499_v60 = vmul.f32 %v6221_v40, %v8221_v6  ;;  %v4566_v11 = vadd.f32 %v4534_v25, %v4398_v4  ;;  %v8352_v0 = vadd.f32 %v8268_v7, %v8178_v12 }
 0x2ec   : > { %v4442_v33 = vmul.f32 1.442695, %v4335_v54  ;;  %v4304_v18 = vmul.f32 %v8163_v2, %v4002_v61  ;;  %v4007_v28 = vpop.f32.mrf.mxu1  ;;  %v8364_v7 = vadd.f32 %v4214_v35, %v8199_v56  ;;  %v8376_v35 = vadd.f32 %v8293_v10, %v8178_v12 }
 0x2ed   : > { %v4672_v3 = vsel %vm4670_vm2, %v4633_v29, %v8210_v55  ;;  %v4535_v48 = vmul.f32 %v8237_v49, %v4499_v60  ;;  %v4598_v27 = vmax.f32 %v4566_v11, 0.0  ;;  %v4008_v34 = vadd.f32 %v4007_v28, %v8155_v5 }
 0x2ee   : > { %v6223_v15 = vpop.eup %6222  ;;  %4704 = vst [vmem:[%s8314_s14 + $0x8] sm:$0xff] %v4672_v3  ;;  %6228 = vpow2.f32 %v4442_v33  ;;  %v4336_v53 = vmin.f32 %v4304_v18, 4.1351666  ;;  %v4011_v36 = vpop.f32.mrf.mxu1  ;;  %v4266_v55 = vmul.f32 %v8188_v52, %v8325_v62  ;;  %v4401_v60 = vadd.f32 %v4369_v9, %v8243_v51 }
 0x2ef   : > { %v4567_v63 = vadd.f32 %v4535_v48, %v4399_v45  ;;  %v4500_v42 = vmul.f32 %v6223_v15, %v8221_v6  ;;  %v4634_v31 = vmin.f32 %v8256_v1, %v4598_v27  ;;  %v4305_v19 = vmul.f32 %v8163_v2, %v4008_v34 }
 0x2f0   : > { %v4444_v4 = vmul.f32 1.442695, %v4336_v53  ;;  %v4013_v43 = vpop.f32.mrf.mxu1  ;;  %v4370_v29 = vmul.f32 %v8195_v58, %v4266_v55  ;;  %v4267_v3 = vmul.f32 %v8188_v52, %v8352_v0  ;;  %v8387_v53 = vadd.f32 %v8319_v23, %v8178_v12 }
 0x2f1   : > { %v4599_v46 = vmax.f32 %v4567_v63, 0.0  ;;  %v4536_v37 = vmul.f32 %v8237_v49, %v4500_v42  ;;  %v4673_v38 = vsel %vm4670_vm2, %v4634_v31, %v8224_v39  ;;  %v4337_v47 = vmin.f32 %v4305_v19, 4.1351666 }
 0x2f2   : > { %6230 = vpow2.f32 %v4444_v4  ;;  %v4014_v40 = vadd.f32 %v4013_v43, %v8155_v5  ;;  %v8358_v25 = vpop.f32.mrf.mxu1  ;;  %v6225_v54 = vpop.eup %6224  ;;  %4705 = vst [vmem:[%s8314_s14 + $0x10] sm:$0xff] %v4673_v38  ;;  %v4402_v27 = vadd.f32 %v4370_v29, %v8249_v14  ;;  %v4215_v10 = vmul.f32 56.0, %v8175_v32 }
 0x2f3   : > { %v4635_v57 = vmin.f32 %v8256_v1, %v4599_v46  ;;  %v4568_v61 = vadd.f32 %v4536_v37, %v4400_v24  ;;  %v4501_v39 = vmul.f32 %v6225_v54, %v8221_v6  ;;  %v4446_v11 = vmul.f32 1.442695, %v4337_v47 }
 0x2f4   : > { %v4306_v26 = vmul.f32 %v8163_v2, %v4014_v40  ;;  %v4019_v33 = vpop.f32.mrf.mxu1  ;;  %v4371_v4 = vmul.f32 %v8195_v58, %v4267_v3  ;;  %v4268_v14 = vmul.f32 %v8188_v52, %v8376_v35  ;;  %v4269_v38 = vmul.f32 %v8188_v52, %v8387_v53 }
 0x2f5   : > { %v4674_v18 = vsel %vm4670_vm2, %v4635_v57, %v8265_v50  ;;  %v4600_v28 = vmax.f32 %v4568_v61, 0.0  ;;  %v4537_v51 = vmul.f32 %v8237_v49, %v4501_v39  ;;  %6232 = vpow2.f32 %v4446_v11 }
 0x2f6   : > { %4706 = vst [vmem:[%s8314_s14 + $0x18] sm:$0xff] %v4674_v18  ;;  %v4338_v45 = vmin.f32 %v4306_v26, 4.1351666  ;;  %v4020_v48 = vadd.f32 %v4019_v33, %v8155_v5  ;;  %v8381_v20 = vpop.f32.mrf.mxu1  ;;  %v6227_v15 = vpop.eup %6226  ;;  %v8410_v40 = vadd.f32 %v4215_v10, %v8184_v30  ;;  %v4403_v39 = vadd.f32 %v4371_v4, %v8271_v16 }
 0x2f7   : > { %v4636_v50 = vmin.f32 %v8256_v1, %v4600_v28  ;;  %v4569_v34 = vadd.f32 %v4537_v51, %v4401_v60  ;;  %v4502_v63 = vmul.f32 %v6227_v15, %v8221_v6  ;;  %v4372_v11 = vmul.f32 %v8195_v58, %v4268_v14 }
 0x2f8   : > { %v4448_v42 = vmul.f32 1.442695, %v4338_v45  ;;  %v4307_v55 = vmul.f32 %v8163_v2, %v4020_v48  ;;  %v4025_v31 = vpop.f32.mrf.mxu1  ;;  %v4373_v45 = vmul.f32 %v8195_v58, %v4269_v38 }
 0x2f9   : > { %v4675_v9 = vsel %vm4670_vm2, %v4636_v50, %v8290_v22  ;;  %v4026_v23 = vadd.f32 %v4025_v31, %v8155_v5  ;;  %v4601_v19 = vmax.f32 %v4569_v34, 0.0  ;;  %v4538_v43 = vmul.f32 %v8237_v49, %v4502_v63 }
 0x2fa   : > { %4707 = vst [vmem:[%s8314_s14 + $0x20] sm:$0xff] %v4675_v9  ;;  %6234 = vpow2.f32 %v4448_v42  ;;  %v4339_v46 = vmin.f32 %v4307_v55, 4.1351666  ;;  %v8401_v24 = vpop.f32.mrf.mxu1  ;;  %v8406_v22 = vadd.f32 %v4011_v36, %v8178_v12  ;;  %v8431_v63 = vadd.f32 %v4215_v10, %v8199_v56 }
 0x2fb   : > { %v6229_v37 = vpop.eup %6228  ;;  %v4308_v47 = vmul.f32 %v8163_v2, %v4026_v23  ;;  %v4637_v54 = vmin.f32 %v8256_v1, %v4601_v19  ;;  %v4570_v57 = vadd.f32 %v4538_v43, %v4402_v27  ;;  %v4404_v42 = vadd.f32 %v4372_v11, %v8277_v21 }
 0x2fc   : > { %v4503_v61 = vmul.f32 %v6229_v37, %v8221_v6  ;;  %v4450_v29 = vmul.f32 1.442695, %v4339_v46  ;;  %v4031_v60 = vpop.f32.mrf.mxu1  ;;  %v4270_v16 = vmul.f32 %v8188_v52, %v8406_v22  ;;  %v8436_v55 = vadd.f32 %v8358_v25, %v8178_v12 }
 0x2fd   : > { %v4340_v26 = vmin.f32 %v4308_v47, 4.1351666  ;;  %v4032_v36 = vadd.f32 %v4031_v60, %v8155_v5  ;;  %v4676_v33 = vsel %vm4670_vm2, %v4637_v54, %v8305_v59  ;;  %v4602_v18 = vmax.f32 %v4570_v57, 0.0 }
 0x2fe   : > { %v4539_v28 = vmul.f32 %v8237_v49, %v4503_v61  ;;  %6236 = vpow2.f32 %v4450_v29  ;;  %v8421_v3 = vpop.f32.mrf.mxu1  ;;  %4708 = vst [vmem:[%s8314_s14 + $0x28] sm:$0xff] %v4676_v33  ;;  %v4405_v21 = vadd.f32 %v4373_v45, %v8283_v8  ;;  %v4374_v25 = vmul.f32 %v8195_v58, %v4270_v16 }
 0x2ff   : > { %v6231_v51 = vpop.eup %6230  ;;  %v4452_v48 = vmul.f32 1.442695, %v4340_v26  ;;  %v4309_v15 = vmul.f32 %v8163_v2, %v4032_v36  ;;  %v4638_v50 = vmin.f32 %v8256_v1, %v4602_v18  ;;  %v4216_v46 = vmul.f32 64.0, %v8175_v32 }
 0x300   : > { %v4571_v59 = vadd.f32 %v4539_v28, %v4403_v39  ;;  %v4504_v27 = vmul.f32 %v6231_v51, %v8221_v6  ;;  %v4037_v34 = vpop.f32.mrf.mxu1  ;;  %v4271_v57 = vmul.f32 %v8188_v52, %v8436_v55  ;;  %v8456_v8 = vadd.f32 %v8381_v20, %v8178_v12 }
 0x301   : > { %6238 = vpow2.f32 %v4452_v48  ;;  %v4341_v31 = vmin.f32 %v4309_v15, 4.1351666  ;;  %v4677_v9 = vsel %vm4670_vm2, %v4638_v50, %v8325_v62  ;;  %v4038_v23 = vadd.f32 %v4037_v34, %v8155_v5 }
 0x302   : > { %v4603_v4 = vmax.f32 %v4571_v59, 0.0  ;;  %v4540_v14 = vmul.f32 %v8237_v49, %v4504_v27  ;;  %v8443_v19 = vpop.f32.mrf.mxu1  ;;  %v6233_v10 = vpop.eup %6232  ;;  %4709 = vst [vmem:[%s8314_s14 + $0x30] sm:$0xff] %v4677_v9  ;;  %v4406_v33 = vadd.f32 %v4374_v25, %v8296_v13  ;;  %v8469_v20 = vadd.f32 %v8401_v24, %v8178_v12 }
 0x303   : > { %v4454_v43 = vmul.f32 1.442695, %v4341_v31  ;;  %v4505_v38 = vmul.f32 %v6233_v10, %v8221_v6  ;;  %v4310_v47 = vmul.f32 %v8163_v2, %v4038_v23  ;;  %v8473_v28 = vadd.f32 %v4216_v46, %v8184_v30 }
 0x304   : > { %v4639_v37 = vmin.f32 %v8256_v1, %v4603_v4  ;;  %v4572_v62 = vadd.f32 %v4540_v14, %v4404_v42  ;;  %v4043_v54 = vpop.f32.mrf.mxu1  ;;  %v4375_v15 = vmul.f32 %v8195_v58, %v4271_v57  ;;  %v4272_v13 = vmul.f32 %v8188_v52, %v8456_v8 }
 0x305   : > { %6240 = vpow2.f32 %v4454_v43  ;;  %v4044_v61 = vadd.f32 %v4043_v54, %v8155_v5  ;;  %v4541_v39 = vmul.f32 %v8237_v49, %v4505_v38  ;;  %v4342_v11 = vmin.f32 %v4310_v47, 4.1351666 }
 0x306   : > { %v4678_v29 = vsel %vm4670_vm2, %v4639_v37, %v8352_v0  ;;  %v4604_v60 = vmax.f32 %v4572_v62, 0.0  ;;  %v8463_v26 = vpop.f32.mrf.mxu1  ;;  %v8490_v9 = vadd.f32 %v8421_v3, %v8178_v12  ;;  %v8494_v23 = vadd.f32 %v4216_v46, %v8199_v56 }
 0x307   : > { %v6235_v36 = vpop.eup %6234  ;;  %4710 = vst [vmem:[%s8314_s14 + $0x38] sm:$0xff] %v4678_v29  ;;  %v4311_v18 = vmul.f32 %v8163_v2, %v4044_v61  ;;  %v4573_v51 = vadd.f32 %v4541_v39, %v4405_v21  ;;  %v4456_v16 = vmul.f32 1.442695, %v4342_v11  ;;  %v4273_v25 = vmul.f32 %v8188_v52, %v8469_v20 }
 0x308   : > { %v4640_v0 = vmin.f32 %v8256_v1, %v4604_v60  ;;  %v4506_v45 = vmul.f32 %v6235_v36, %v8221_v6  ;;  %v4049_v48 = vpop.f32.mrf.mxu1  ;;  %v4407_v37 = vadd.f32 %v4375_v15, %v8300_v44  ;;  %v4376_v3 = vmul.f32 %v8195_v58, %v4272_v13 }
 0x309   : > { %v4343_v24 = vmin.f32 %v4311_v18, 4.1351666  ;;  %v4050_v50 = vadd.f32 %v4049_v48, %v8155_v5  ;;  %v4605_v27 = vmax.f32 %v4573_v51, 0.0  ;;  %6242 = vpow2.f32 %v4456_v16 }
 0x30a   : > { %v4679_v59 = vsel %vm4670_vm2, %v4640_v0, %v8376_v35  ;;  %v4542_v34 = vmul.f32 %v8237_v49, %v4506_v45  ;;  %v8485_v42 = vpop.f32.mrf.mxu1  ;;  %v4274_v44 = vmul.f32 %v8188_v52, %v8490_v9  ;;  %v4217_v39 = vmul.f32 72.0, %v8175_v32 }
 0x30b   : > { %v6237_v31 = vpop.eup %6236  ;;  %4711 = vst [vmem:[%s8314_s14 + $0x40] sm:$0xff] %v4679_v59  ;;  %v4458_v4 = vmul.f32 1.442695, %v4343_v24  ;;  %v4312_v14 = vmul.f32 %v8163_v2, %v4050_v50  ;;  %v4641_v35 = vmin.f32 %v8256_v1, %v4605_v27  ;;  %v4377_v36 = vmul.f32 %v8195_v58, %v4273_v25 }
 0x30c   : > { %v4574_v10 = vadd.f32 %v4542_v34, %v4406_v33  ;;  %v4507_v21 = vmul.f32 %v6237_v31, %v8221_v6  ;;  %v4055_v43 = vpop.f32.mrf.mxu1  ;;  %v4408_v0 = vadd.f32 %v4376_v3, %v8343_v41  ;;  %v8521_v45 = vadd.f32 %v8443_v19, %v8178_v12 }
 0x30d   : > { %6244 = vpow2.f32 %v4458_v4  ;;  %v4344_v62 = vmin.f32 %v4312_v14, 4.1351666  ;;  %v4680_v46 = vsel %vm4670_vm2, %v4641_v35, %v8387_v53  ;;  %v4056_v57 = vadd.f32 %v4055_v43, %v8155_v5 }
 0x30e   : > { %v6239_v38 = vpop.eup %6238  ;;  %v4606_v47 = vmax.f32 %v4574_v10, 0.0  ;;  %v4543_v54 = vmul.f32 %v8237_v49, %v4507_v21  ;;  %v8507_v61 = vpop.f32.mrf.mxu1  ;;  %4712 = vst [vmem:[%s8314_s14 + $0x48] sm:$0xff] %v4680_v46  ;;  %v4378_v27 = vmul.f32 %v8195_v58, %v4274_v44  ;;  %v8533_v19 = vadd.f32 %v4217_v39, %v8184_v30 }
 0x30f   : > { %v4508_v29 = vmul.f32 %v6239_v38, %v8221_v6  ;;  %v4460_v60 = vmul.f32 1.442695, %v4344_v62  ;;  %v4313_v33 = vmul.f32 %v8163_v2, %v4056_v57  ;;  %v4275_v21 = vmul.f32 %v8188_v52, %v8521_v45 }
 0x310   : > { %v4642_v11 = vmin.f32 %v8256_v1, %v4606_v47  ;;  %v4575_v53 = vadd.f32 %v4543_v54, %v4407_v37  ;;  %v4061_v18 = vpop.f32.mrf.mxu1  ;;  %v8543_v25 = vadd.f32 %v8463_v26, %v8178_v12  ;;  %v4410_v47 = vadd.f32 %v4378_v27, %v8410_v40 }
 0x311   : > { %v4544_v51 = vmul.f32 %v8237_v49, %v4508_v29  ;;  %6246 = vpow2.f32 %v4460_v60  ;;  %v4345_v13 = vmin.f32 %v4313_v33, 4.1351666  ;;  %v4062_v24 = vadd.f32 %v4061_v18, %v8155_v5 }
 0x312   : > { %v6241_v16 = vpop.eup %6240  ;;  %v4681_v48 = vsel %vm4670_vm2, %v4642_v11, %v8406_v22  ;;  %v4607_v15 = vmax.f32 %v4575_v53, 0.0  ;;  %v8527_v50 = vpop.f32.mrf.mxu1  ;;  %v4409_v22 = vadd.f32 %v4377_v36, %v8364_v7  ;;  %v8555_v26 = vadd.f32 %v4217_v39, %v8199_v56 }
 0x313   : > { %4713 = vst [vmem:[%s8314_s14 + $0x50] sm:$0xff] %v4681_v48  ;;  %v4576_v41 = vadd.f32 %v4544_v51, %v4408_v0  ;;  %v4509_v59 = vmul.f32 %v6241_v16, %v8221_v6  ;;  %v4462_v31 = vmul.f32 1.442695, %v4345_v13  ;;  %v4314_v4 = vmul.f32 %v8163_v2, %v4062_v24 }
 0x314   : > { %v4643_v34 = vmin.f32 %v8256_v1, %v4607_v15  ;;  %v4067_v14 = vpop.f32.mrf.mxu1  ;;  %v4379_v40 = vmul.f32 %v8195_v58, %v4275_v21  ;;  %v4276_v39 = vmul.f32 %v8188_v52, %v8543_v25  ;;  %v8578_v51 = vadd.f32 %v8507_v61, %v8178_v12 }
 0x315   : > { %v4608_v35 = vmax.f32 %v4576_v41, 0.0  ;;  %v4545_v10 = vmul.f32 %v8237_v49, %v4509_v59  ;;  %6248 = vpow2.f32 %v4462_v31  ;;  %v4346_v7 = vmin.f32 %v4314_v4, 4.1351666 }
 0x316   : > { %v4682_v43 = vsel %vm4670_vm2, %v4643_v34, %v8436_v55  ;;  %v4068_v37 = vadd.f32 %v4067_v14, %v8155_v5  ;;  %v8549_v3 = vpop.f32.mrf.mxu1  ;;  %v6243_v62 = vpop.eup %6242  ;;  %v8560_v55 = vadd.f32 %v8485_v42, %v8178_v12  ;;  %v4218_v16 = vmul.f32 80.0, %v8175_v32 }
 0x317   : > { %4714 = vst [vmem:[%s8314_s14 + $0x58] sm:$0xff] %v4682_v43  ;;  %v4644_v38 = vmin.f32 %v8256_v1, %v4608_v35  ;;  %v4577_v46 = vadd.f32 %v4545_v10, %v4409_v22  ;;  %v4510_v54 = vmul.f32 %v6243_v62, %v8221_v6  ;;  %v4464_v57 = vmul.f32 1.442695, %v4346_v7 }
 0x318   : > { %v4315_v29 = vmul.f32 %v8163_v2, %v4068_v37  ;;  %v4073_v44 = vpop.f32.mrf.mxu1  ;;  %v4277_v15 = vmul.f32 %v8188_v52, %v8560_v55  ;;  %v4411_v27 = vadd.f32 %v4379_v40, %v8431_v63  ;;  %v4380_v61 = vmul.f32 %v8195_v58, %v4276_v39 }
 0x319   : > { %v4683_v60 = vsel %vm4670_vm2, %v4644_v38, %v8456_v8  ;;  %v4609_v11 = vmax.f32 %v4577_v46, 0.0  ;;  %v4546_v36 = vmul.f32 %v8237_v49, %v4510_v54  ;;  %6250 = vpow2.f32 %v4464_v57 }
 0x31a   : > { %v6245_v53 = vpop.eup %6244  ;;  %4715 = vst [vmem:[%s8314_s14 + $0x60] sm:$0xff] %v4683_v60  ;;  %v4347_v42 = vmin.f32 %v4315_v29, 4.1351666  ;;  %v4074_v33 = vadd.f32 %v4073_v44, %v8155_v5  ;;  %v8572_v18 = vpop.f32.mrf.mxu1  ;;  %v8596_v63 = vadd.f32 %v4218_v16, %v8184_v30  ;;  %v4381_v7 = vmul.f32 %v8195_v58, %v4277_v15 }
 0x31b   : > { %v4645_v0 = vmin.f32 %v8256_v1, %v4609_v11  ;;  %v4511_v8 = vmul.f32 %v6245_v53, %v8221_v6  ;;  %v4578_v48 = vadd.f32 %v4546_v36, %v4410_v47  ;;  %v4412_v47 = vadd.f32 %v4380_v61, %v8473_v28 }
 0x31c   : > { %v4466_v13 = vmul.f32 1.442695, %v4347_v42  ;;  %v4316_v24 = vmul.f32 %v8163_v2, %v4074_v33  ;;  %v4079_v41 = vpop.f32.mrf.mxu1  ;;  %v8605_v57 = vadd.f32 %v8527_v50, %v8178_v12  ;;  %v8617_v50 = vadd.f32 %v4218_v16, %v8199_v56 }
 0x31d   : > { %v4684_v59 = vsel %vm4670_vm2, %v4645_v0, %v8469_v20  ;;  %v4547_v34 = vmul.f32 %v8237_v49, %v4511_v8  ;;  %v4610_v31 = vmax.f32 %v4578_v48, 0.0  ;;  %v4080_v14 = vadd.f32 %v4079_v41, %v8155_v5 }
 0x31e   : > { %v6247_v22 = vpop.eup %6246  ;;  %4716 = vst [vmem:[%s8314_s14 + $0x68] sm:$0xff] %v4684_v59  ;;  %6252 = vpow2.f32 %v4466_v13  ;;  %v4348_v4 = vmin.f32 %v4316_v24, 4.1351666  ;;  %v4083_v35 = vpop.f32.mrf.mxu1  ;;  %v4278_v20 = vmul.f32 %v8188_v52, %v8578_v51  ;;  %v4413_v36 = vadd.f32 %v4381_v7, %v8494_v23 }
 0x31f   : > { %v4579_v10 = vadd.f32 %v4547_v34, %v4411_v27  ;;  %v4512_v21 = vmul.f32 %v6247_v22, %v8221_v6  ;;  %v4646_v43 = vmin.f32 %v8256_v1, %v4610_v31  ;;  %v4317_v62 = vmul.f32 %v8163_v2, %v4080_v14 }
 0x320   : > { %v4468_v37 = vmul.f32 1.442695, %v4348_v4  ;;  %v4085_v38 = vpop.f32.mrf.mxu1  ;;  %v4382_v53 = vmul.f32 %v8195_v58, %v4278_v20  ;;  %v4279_v15 = vmul.f32 %v8188_v52, %v8605_v57  ;;  %v8629_v16 = vadd.f32 %v8549_v3, %v8178_v12 }
 0x321   : > { %v4611_v46 = vmax.f32 %v4579_v10, 0.0  ;;  %v4548_v54 = vmul.f32 %v8237_v49, %v4512_v21  ;;  %v4685_v29 = vsel %vm4670_vm2, %v4646_v43, %v8490_v9  ;;  %v4349_v44 = vmin.f32 %v4317_v62, 4.1351666 }
 0x322   : > { %6254 = vpow2.f32 %v4468_v37  ;;  %v4086_v60 = vadd.f32 %v4085_v38, %v8155_v5  ;;  %v8611_v11 = vpop.f32.mrf.mxu1  ;;  %v6249_v40 = vpop.eup %6248  ;;  %4717 = vst [vmem:[%s8314_s14 + $0x70] sm:$0xff] %v4685_v29  ;;  %v4414_v27 = vadd.f32 %v4382_v53, %v8533_v19  ;;  %v8640_v34 = vadd.f32 %v8572_v18, %v8178_v12 }
 0x323   : > { %v4647_v28 = vmin.f32 %v8256_v1, %v4611_v46  ;;  %v4580_v39 = vadd.f32 %v4548_v54, %v4412_v47  ;;  %v4513_v9 = vmul.f32 %v6249_v40, %v8221_v6  ;;  %v4470_v42 = vmul.f32 1.442695, %v4349_v44 }
 0x324   : > { %v4318_v33 = vmul.f32 %v8163_v2, %v4086_v60  ;;  %v4091_v0 = vpop.f32.mrf.mxu1  ;;  %v4219_v3 = vmul.f32 88.0, %v8175_v32  ;;  %v4383_v21 = vmul.f32 %v8195_v58, %v4279_v15  ;;  %v4280_v19 = vmul.f32 %v8188_v52, %v8629_v16 }
 0x325   : > { %v4686_v8 = vsel %vm4670_vm2, %v4647_v28, %v8521_v45  ;;  %v4612_v48 = vmax.f32 %v4580_v39, 0.0  ;;  %v4549_v23 = vmul.f32 %v8237_v49, %v4513_v9  ;;  %6256 = vpow2.f32 %v4470_v42 }
 0x326   : > { %4718 = vst [vmem:[%s8314_s14 + $0x78] sm:$0xff] %v4686_v8  ;;  %v4350_v13 = vmin.f32 %v4318_v33, 4.1351666  ;;  %v4092_v24 = vadd.f32 %v4091_v0, %v8155_v5  ;;  %v8634_v41 = vpop.f32.mrf.mxu1  ;;  %v6251_v59 = vpop.eup %6250  ;;  %v4281_v38 = vmul.f32 %v8188_v52, %v8640_v34  ;;  %v4246_v46 = vadd.f32 %v4219_v3, %v8184_v30 }
 0x327   : > { %v4648_v45 = vmin.f32 %v8256_v1, %v4612_v48  ;;  %v4581_v61 = vadd.f32 %v4549_v23, %v4413_v36  ;;  %v4514_v22 = vmul.f32 %v6251_v59, %v8221_v6  ;;  %v4415_v28 = vadd.f32 %v4383_v21, %v8555_v26 }
 0x328   : > { %v4472_v31 = vmul.f32 1.442695, %v4350_v13  ;;  %v4319_v4 = vmul.f32 %v8163_v2, %v4092_v24  ;;  %v4097_v14 = vpop.f32.mrf.mxu1  ;;  %v4384_v39 = vmul.f32 %v8195_v58, %v4280_v19  ;;  %v4385_v8 = vmul.f32 %v8195_v58, %v4281_v38 }
 0x329   : > { %v4687_v10 = vsel %vm4670_vm2, %v4648_v45, %v8543_v25  ;;  %v4098_v18 = vadd.f32 %v4097_v14, %v8155_v5  ;;  %v4613_v20 = vmax.f32 %v4581_v61, 0.0  ;;  %v4550_v43 = vmul.f32 %v8237_v49, %v4514_v22 }
 0x32a   : > { %4719 = vst [vmem:[%s8314_s14 + $0x80] sm:$0xff] %v4687_v10  ;;  %6258 = vpow2.f32 %v4472_v31  ;;  %v4351_v7 = vmin.f32 %v4319_v4, 4.1351666  ;;  %v8654_v37 = vpop.f32.mrf.mxu1  ;;  %v8659_v25 = vadd.f32 %v4083_v35, %v8178_v12  ;;  %v4247_v24 = vadd.f32 %v4219_v3, %v8199_v56 }
 0x32b   : > { %v6253_v62 = vpop.eup %6252  ;;  %v4320_v47 = vmul.f32 %v8163_v2, %v4098_v18  ;;  %v4649_v54 = vmin.f32 %v8256_v1, %v4613_v20  ;;  %v4582_v29 = vadd.f32 %v4550_v43, %v4414_v27  ;;  %v4416_v45 = vadd.f32 %v4384_v39, %v8596_v63 }
 0x32c   : > { %v4515_v44 = vmul.f32 %v6253_v62, %v8221_v6  ;;  %v4474_v60 = vmul.f32 1.442695, %v4351_v7  ;;  %v4103_v40 = vpop.f32.mrf.mxu1  ;;  %v4282_v26 = vmul.f32 %v8188_v52, %v8659_v25  ;;  %v8685_v27 = vadd.f32 %v8611_v11, %v8178_v12 }
 0x32d   : > { %v4352_v53 = vmin.f32 %v4320_v47, 4.1351666  ;;  %v4104_v35 = vadd.f32 %v4103_v40, %v8155_v5  ;;  %v4688_v36 = vsel %vm4670_vm2, %v4649_v54, %v8560_v55  ;;  %v4614_v9 = vmax.f32 %v4582_v29, 0.0 }
 0x32e   : > { %v4551_v42 = vmul.f32 %v8237_v49, %v4515_v44  ;;  %6260 = vpow2.f32 %v4474_v60  ;;  %v8672_v33 = vpop.f32.mrf.mxu1  ;;  %4720 = vst [vmem:[%s8314_s14 + $0x88] sm:$0xff] %v4688_v36  ;;  %v4417_v63 = vadd.f32 %v4385_v8, %v8617_v50  ;;  %v4386_v11 = vmul.f32 %v8195_v58, %v4282_v26 }
 0x32f   : > { %v6255_v0 = vpop.eup %6254  ;;  %v4476_v48 = vmul.f32 1.442695, %v4352_v53  ;;  %v4321_v15 = vmul.f32 %v8163_v2, %v4104_v35  ;;  %v4650_v23 = vmin.f32 %v8256_v1, %v4614_v9  ;;  %v4220_v21 = vmul.f32 96.0, %v8175_v32 }
 0x330   : > { %v4583_v55 = vadd.f32 %v4551_v42, %v4415_v28  ;;  %v4516_v13 = vmul.f32 %v6255_v0, %v8221_v6  ;;  %v4109_v59 = vpop.f32.mrf.mxu1  ;;  %v4283_v62 = vmul.f32 %v8188_v52, %v8685_v27  ;;  %v8705_v50 = vadd.f32 %v8634_v41, %v8178_v12 }
 0x331   : > { %6262 = vpow2.f32 %v4476_v48  ;;  %v4353_v61 = vmin.f32 %v4321_v15, 4.1351666  ;;  %v4689_v22 = vsel %vm4670_vm2, %v4650_v23, %v8578_v51  ;;  %v4110_v14 = vadd.f32 %v4109_v59, %v8155_v5 }
 0x332   : > { %v4615_v31 = vmax.f32 %v4583_v55, 0.0  ;;  %v4552_v4 = vmul.f32 %v8237_v49, %v4516_v13  ;;  %v8692_v10 = vpop.f32.mrf.mxu1  ;;  %v6257_v3 = vpop.eup %6256  ;;  %4721 = vst [vmem:[%s8314_s14 + $0x90] sm:$0xff] %v4689_v22  ;;  %v4418_v28 = vadd.f32 %v4386_v11, %v4246_v46  ;;  %v4248_v39 = vadd.f32 %v4220_v21, %v8184_v30 }
 0x333   : > { %v4478_v19 = vmul.f32 1.442695, %v4353_v61  ;;  %v4517_v20 = vmul.f32 %v6257_v3, %v8221_v6  ;;  %v4322_v43 = vmul.f32 %v8163_v2, %v4110_v14  ;;  %v8718_v41 = vadd.f32 %v8654_v37, %v8178_v12 }
 0x334   : > { %v4651_v18 = vmin.f32 %v8256_v1, %v4615_v31  ;;  %v4584_v51 = vadd.f32 %v4552_v4, %v4416_v45  ;;  %v4115_v7 = vpop.f32.mrf.mxu1  ;;  %v4387_v0 = vmul.f32 %v8195_v58, %v4283_v62  ;;  %v4284_v46 = vmul.f32 %v8188_v52, %v8705_v50 }
 0x335   : > { %6264 = vpow2.f32 %v4478_v19  ;;  %v4116_v38 = vadd.f32 %v4115_v7, %v8155_v5  ;;  %v4553_v29 = vmul.f32 %v8237_v49, %v4517_v20  ;;  %v4354_v44 = vmin.f32 %v4322_v43, 4.1351666 }
 0x336   : > { %v4690_v47 = vsel %vm4670_vm2, %v4651_v18, %v8605_v57  ;;  %v4616_v54 = vmax.f32 %v4584_v51, 0.0  ;;  %v8712_v60 = vpop.f32.mrf.mxu1  ;;  %v4249_v13 = vadd.f32 %v4220_v21, %v8199_v56  ;;  %v4285_v59 = vmul.f32 %v8188_v52, %v8718_v41 }
 0x337   : > { %v6259_v40 = vpop.eup %6258  ;;  %4722 = vst [vmem:[%s8314_s14 + $0x98] sm:$0xff] %v4690_v47  ;;  %v4323_v53 = vmul.f32 %v8163_v2, %v4116_v38  ;;  %v4585_v35 = vadd.f32 %v4553_v29, %v4417_v63  ;;  %v4480_v9 = vmul.f32 1.442695, %v4354_v44  ;;  %v8742_v4 = vadd.f32 %v8672_v33, %v8178_v12 }
 0x338   : > { %v4652_v57 = vmin.f32 %v8256_v1, %v4616_v54  ;;  %v4518_v36 = vmul.f32 %v6259_v40, %v8221_v6  ;;  %v4121_v42 = vpop.f32.mrf.mxu1  ;;  %v4419_v3 = vadd.f32 %v4387_v0, %v4247_v24  ;;  %v4388_v63 = vmul.f32 %v8195_v58, %v4284_v46 }
 0x339   : > { %v4355_v8 = vmin.f32 %v4323_v53, 4.1351666  ;;  %v4122_v26 = vadd.f32 %v4121_v42, %v8155_v5  ;;  %v4617_v48 = vmax.f32 %v4585_v35, 0.0  ;;  %6266 = vpow2.f32 %v4480_v9 }
 0x33a   : > { %v4691_v37 = vsel %vm4670_vm2, %v4652_v57, %v8629_v16  ;;  %v4554_v15 = vmul.f32 %v8237_v49, %v4518_v36  ;;  %v8731_v23 = vpop.f32.mrf.mxu1  ;;  %v4389_v24 = vmul.f32 %v8195_v58, %v4285_v59  ;;  %v4221_v7 = vmul.f32 104.0, %v8175_v32 }
 0x33b   : > { %v6261_v55 = vpop.eup %6260  ;;  %4723 = vst [vmem:[%s8314_s14 + $0xa0] sm:$0xff] %v4691_v37  ;;  %v4482_v45 = vmul.f32 1.442695, %v4355_v8  ;;  %v4324_v61 = vmul.f32 %v8163_v2, %v4122_v26  ;;  %v4653_v22 = vmin.f32 %v8256_v1, %v4617_v48  ;;  %v4420_v44 = vadd.f32 %v4388_v63, %v4248_v39 }
 0x33c   : > { %v4586_v16 = vadd.f32 %v4554_v15, %v4418_v28  ;;  %v4519_v31 = vmul.f32 %v6261_v55, %v8221_v6  ;;  %v4127_v14 = vpop.f32.mrf.mxu1  ;;  %v8763_v28 = vadd.f32 %v8692_v10, %v8178_v12  ;;  %v4421_v0 = vadd.f32 %v4389_v24, %v4249_v13 }
 0x33d   : > { %6268 = vpow2.f32 %v4482_v45  ;;  %v4356_v11 = vmin.f32 %v4324_v61, 4.1351666  ;;  %v4692_v19 = vsel %vm4670_vm2, %v4653_v22, %v8640_v34  ;;  %v4128_v20 = vadd.f32 %v4127_v14, %v8155_v5 }
 0x33e   : > { %v6263_v21 = vpop.eup %6262  ;;  %v4618_v18 = vmax.f32 %v4586_v16, 0.0  ;;  %v4555_v51 = vmul.f32 %v8237_v49, %v4519_v31  ;;  %v8750_v43 = vpop.f32.mrf.mxu1  ;;  %4724 = vst [vmem:[%s8314_s14 + $0xa8] sm:$0xff] %v4692_v19  ;;  %v4286_v34 = vmul.f32 %v8188_v52, %v8742_v4  ;;  %v4250_v10 = vadd.f32 %v4221_v7, %v8184_v30 }
 0x33f   : > { %v4520_v33 = vmul.f32 %v6263_v21, %v8221_v6  ;;  %v4484_v62 = vmul.f32 1.442695, %v4356_v11  ;;  %v4325_v54 = vmul.f32 %v8163_v2, %v4128_v20  ;;  %v4287_v59 = vmul.f32 %v8188_v52, %v8763_v28 }
 0x340   : > { %v4654_v38 = vmin.f32 %v8256_v1, %v4618_v18  ;;  %v4587_v47 = vadd.f32 %v4555_v51, %v4419_v3  ;;  %v4133_v29 = vpop.f32.mrf.mxu1  ;;  %v4390_v26 = vmul.f32 %v8195_v58, %v4286_v34  ;;  %v8782_v13 = vadd.f32 %v8712_v60, %v8178_v12 }
 0x341   : > { %v4556_v40 = vmul.f32 %v8237_v49, %v4520_v33  ;;  %6270 = vpow2.f32 %v4484_v62  ;;  %v4357_v36 = vmin.f32 %v4325_v54, 4.1351666  ;;  %v4134_v9 = vadd.f32 %v4133_v29, %v8155_v5 }
 0x342   : > { %v6265_v53 = vpop.eup %6264  ;;  %v4693_v57 = vsel %vm4670_vm2, %v4654_v38, %v8659_v25  ;;  %v4619_v35 = vmax.f32 %v4587_v47, 0.0  ;;  %v8769_v42 = vpop.f32.mrf.mxu1  ;;  %v4251_v3 = vadd.f32 %v4221_v7, %v8199_v56  ;;  %v4222_v63 = vmul.f32 112.0, %v8175_v32 }
 0x343   : > { %4725 = vst [vmem:[%s8314_s14 + $0xb0] sm:$0xff] %v4693_v57  ;;  %v4588_v39 = vadd.f32 %v4556_v40, %v4420_v44  ;;  %v4521_v46 = vmul.f32 %v6265_v53, %v8221_v6  ;;  %v4486_v37 = vmul.f32 1.442695, %v4357_v36  ;;  %v4326_v25 = vmul.f32 %v8163_v2, %v4134_v9 }
 0x344   : > { %v4655_v8 = vmin.f32 %v8256_v1, %v4619_v35  ;;  %v4139_v48 = vpop.f32.mrf.mxu1  ;;  %v4422_v60 = vadd.f32 %v4390_v26, %v4250_v10  ;;  %v4391_v18 = vmul.f32 %v8195_v58, %v4287_v59  ;;  %v4288_v51 = vmul.f32 %v8188_v52, %v8782_v13 }
 0x345   : > { %v4620_v15 = vmax.f32 %v4588_v39, 0.0  ;;  %v4557_v55 = vmul.f32 %v8237_v49, %v4521_v46  ;;  %6272 = vpow2.f32 %v4486_v37  ;;  %v4358_v61 = vmin.f32 %v4326_v25, 4.1351666 }
 0x346   : > { %v4694_v45 = vsel %vm4670_vm2, %v4655_v8, %v8685_v27  ;;  %v4140_v22 = vadd.f32 %v4139_v48, %v8155_v5  ;;  %v6267_v16 = vpop.eup %6266  ;;  %v4126_v24 = vadd.f32 %v8731_v23, %v8178_v12  ;;  %v4252_v38 = vadd.f32 %v4222_v63, %v8184_v30 }
 0x347   : > { %4726 = vst [vmem:[%s8314_s14 + $0xb8] sm:$0xff] %v4694_v45  ;;  %v4656_v31 = vmin.f32 %v8256_v1, %v4620_v15  ;;  %v4589_v14 = vadd.f32 %v4557_v55, %v4421_v0  ;;  %v4522_v11 = vmul.f32 %v6267_v16, %v8221_v6  ;;  %v4488_v21 = vmul.f32 1.442695, %v4358_v61 }
 0x348   : > { %v4327_v27 = vmul.f32 %v8163_v2, %v4140_v22  ;;  %v4423_v54 = vadd.f32 %v4391_v18, %v4251_v3  ;;  %v4392_v44 = vmul.f32 %v8195_v58, %v4288_v51  ;;  %v4289_v53 = vmul.f32 %v8188_v52, %v4126_v24 }
 0x349   : > { %v4695_v5 = vsel %vm4670_vm2, %v4656_v31, %v8705_v50  ;;  %v4621_v19 = vmax.f32 %v4589_v14, 0.0  ;;  %v4558_v33 = vmul.f32 %v8237_v49, %v4522_v11  ;;  %6274 = vpow2.f32 %v4488_v21 }
 0x34a   : > { %v6269_v20 = vpop.eup %6268  ;;  %4727 = vst [vmem:[%s8314_s14 + $0xc0] sm:$0xff] %v4695_v5  ;;  %v4359_v2 = vmin.f32 %v4327_v27, 4.1351666  ;;  %v4132_v57 = vadd.f32 %v8750_v43, %v8178_v12  ;;  %v4253_v9 = vadd.f32 %v4222_v63, %v8199_v56  ;;  %v4424_v0 = vadd.f32 %v4392_v44, %v4252_v38 }
 0x34b   : > { %v4657_v7 = vmin.f32 %v8256_v1, %v4621_v19  ;;  %v4523_v50 = vmul.f32 %v6269_v20, %v8221_v6  ;;  %v4590_v62 = vadd.f32 %v4558_v33, %v4422_v60  ;;  %v4223_v10 = vmul.f32 120.0, %v8175_v32 }
 0x34c   : > { %v4490_v47 = vmul.f32 1.442695, %v4359_v2  ;;  %v4393_v43 = vmul.f32 %v8195_v58, %v4289_v53  ;;  %v4290_v26 = vmul.f32 %v8188_v52, %v4132_v57  ;;  %v4138_v37 = vadd.f32 %v8769_v42, %v8178_v12 }
 0x34d   : > { %v4696_v34 = vsel %vm4670_vm2, %v4657_v7, %v8718_v41  ;;  %v4559_v29 = vmul.f32 %v8237_v49, %v4523_v50  ;;  %v4622_v40 = vmax.f32 %v4590_v62, 0.0  ;;  %v4254_v59 = vadd.f32 %v4223_v10, %v8184_v30 }
 0x34e   : > { %v6271_v23 = vpop.eup %6270  ;;  %4728 = vst [vmem:[%s8314_s14 + $0xc8] sm:$0xff] %v4696_v34  ;;  %6276 = vpow2.f32 %v4490_v47  ;;  %v4425_v45 = vadd.f32 %v4393_v43, %v4253_v9  ;;  %v4394_v12 = vmul.f32 %v8195_v58, %v4290_v26  ;;  %v4291_v42 = vmul.f32 %v8188_v52, %v4138_v37 }
 0x34f   : > { %v4591_v35 = vadd.f32 %v4559_v29, %v4423_v54  ;;  %v4524_v36 = vmul.f32 %v6271_v23, %v8221_v6  ;;  %v4658_v41 = vmin.f32 %v8256_v1, %v4622_v40  ;;  %v4255_v30 = vadd.f32 %v4223_v10, %v8199_v56 }
 0x350   : > { %v4426_v63 = vadd.f32 %v4394_v12, %v4254_v59  ;;  %v4395_v60 = vmul.f32 %v8195_v58, %v4291_v42 }
 0x351   : > { %v4623_v39 = vmax.f32 %v4591_v35, 0.0  ;;  %v4560_v46 = vmul.f32 %v8237_v49, %v4524_v36  ;;  %v4697_v8 = vsel %vm4670_vm2, %v4658_v41, %v8742_v4 }
 0x352   : > { %v6273_v25 = vpop.eup %6272  ;;  %4729 = vst [vmem:[%s8314_s14 + $0xd0] sm:$0xff] %v4697_v8  ;;  %v4427_v19 = vadd.f32 %v4395_v60, %v4255_v30 }
 0x353   : > { %v4659_v48 = vmin.f32 %v8256_v1, %v4623_v39  ;;  %v4592_v15 = vadd.f32 %v4560_v46, %v4424_v0  ;;  %v4525_v55 = vmul.f32 %v6273_v25, %v8221_v6 }
 0x355   : > { %v4698_v32 = vsel %vm4670_vm2, %v4659_v48, %v8763_v28  ;;  %v4624_v4 = vmax.f32 %v4592_v15, 0.0  ;;  %v4561_v61 = vmul.f32 %v8237_v49, %v4525_v55 }
 0x356   : > { %4730 = vst [vmem:[%s8314_s14 + $0xd8] sm:$0xff] %v4698_v32  ;;  %v6275_v22 = vpop.eup %6274 }
 0x357   : > { %v4660_v16 = vmin.f32 %v8256_v1, %v4624_v4  ;;  %v4593_v31 = vadd.f32 %v4561_v61, %v4425_v45  ;;  %v4526_v14 = vmul.f32 %v6275_v22, %v8221_v6 }
 0x359   : > { %v4699_v28 = vsel %vm4670_vm2, %v4660_v16, %v8782_v13  ;;  %v4625_v3 = vmax.f32 %v4593_v31, 0.0  ;;  %v4562_v52 = vmul.f32 %v8237_v49, %v4526_v14 }
 0x35a   : > { %4731 = vst [vmem:[%s8314_s14 + $0xe0] sm:$0xff] %v4699_v28 }
 0x35b   : > { %v6277_v11 = vpop.eup %6276  ;;  %v4661_v21 = vmin.f32 %v8256_v1, %v4625_v3  ;;  %v4594_v27 = vadd.f32 %v4562_v52, %v4426_v63 }
 0x35c   : > { %v4527_v5 = vmul.f32 %v6277_v11, %v8221_v6 }
 0x35d   : > { %v4700_v13 = vsel %vm4670_vm2, %v4661_v21, %v4126_v24  ;;  %v4626_v56 = vmax.f32 %v4594_v27, 0.0 }
 0x35e   : > { %v4563_v18 = vmul.f32 %v8237_v49, %v4527_v5  ;;  %4732 = vst [vmem:[%s8314_s14 + $0xe8] sm:$0xff] %v4700_v13 }
 0x35f   : > { %v4662_v58 = vmin.f32 %v8256_v1, %v4626_v56 }
 0x360   : > { %v4595_v51 = vadd.f32 %v4563_v18, %v4427_v19 }
 0x361   : > { %v4701_v20 = vsel %vm4670_vm2, %v4662_v58, %v4132_v57 }
 0x362   : > { %v4627_v6 = vmax.f32 %v4595_v51, 0.0  ;;  %4733 = vst [vmem:[%s8314_s14 + $0xf0] sm:$0xff] %v4701_v20 }
 0x364   : > { %v4663_v33 = vmin.f32 %v8256_v1, %v4627_v6 }
 0x366   : > { %v4702_v49 = vsel %vm4670_vm2, %v4663_v33, %v4138_v37 }
 0x367   : > { %4734 = vst [vmem:[%s8314_s14 + $0xf8] sm:$0xff] %v4702_v49 }
 0x368   : > { %6291 = shalt.err (!%p6288_p5)
}
 0x369   : > { %s6292_s30 = scalar_lea.hbm %s8864_s19, 4096  ;;  %s6296_s13 = scalar_lea.hbm %s8924_s6, 8192 }
 0x36a   : > { %p6293_p6 = scmp.ne.s32.totalorder %s8864_s19, %s6292_s30  ;;  %p6297_p10 = scmp.lt.s32.totalorder %s8864_s19, %s8924_s6 }
 0x36b   : > { %p6298_p11 = scmp.lt.s32.totalorder %s6296_s13, %s6292_s30 }
 0x36c   : > { %p6294_p7 = pnand %p6293_p6, %p6436_p4 }
 0x36d   : > { %p6299_p12 = por %p6298_p11, %p6297_p10 }
 0x36e   : > { %p6295_p9 = pneg %p6294_p7 }
 0x370   : > { %p6300_p13 = pnand %p6299_p12, %p6295_p9 }
 0x372   : > { %6303 = shalt.err (!%p6300_p13)
}
 0x373   : > { %s6359_s17 = smov 128   ;;  %s6360_s18 = smov 8  }
 0x374   : > { %6155 = dma.vmem_to_hbm [thread:$0]  (%p6436_p4), %s8866_s16, 4096, %s8864_s19, %s8873_s24, %s6359_s17, %s6359_s17, %s6360_s18  }
 0x375 PF: > { %p6161_p0 = scmp.ge.s32.totalorder %s6354_s26, 2  ;;  %s4766_s11 = sand.u32 1, %s6334_s21  }
 0x376   : > { %s4767_s20 = scalar_lea.sflag [#allocation3], %s4766_s11 }
 0x377   : > { %p6158_p1 = pnand %p6161_p0, %p6443_p8 }
 0x379   : > { %p6159_p2 = pneg %p6158_p1 }
 0x37b   : > { %6329 = dma.done.wait (%p6159_p2), %s4767_s20, 4096  }
 0x37c   : > { %6331 = vsyncadd (%p6159_p2), %s4767_s20, 4294963200  ;;  %s19_s26 = sadd.s32 1, %s6354_s26   ;;  %s9001_s21 = smov %s6338_s22 }
 0x37d   : > { %p16_p3 = scmp.ge.s32.totalorder %s19_s26, 4   ;;  %s9002_s22 = smov %s6342_s23 }
 0x37e   : > { %s9003_s23 = smov %s6449_s10  ;;  %s9004_s24 = smov %s6350_s25 }
 0x37f   : > { %s9005_s25 = smov %s9007_s29  ;;  %18 = sbr.rel (!%p16_p3) target bundleno = 4 (0x4), region = 90 }
 0x384   :  { %4772 = vsyncpa [#allocation3], 1 }
 0x385   :  { %4774 = vsyncpa [#allocation3 + $0x1], 1 }

</bundles_post_ra>
